<compile_context>
chip_gen: v7x
topology: tpu7x:2x2x1
jax: 0.10.0
libtpu: 0.0.40
codegen_flags: <defaults>
</compile_context>

<pallas_src>
import math
import functools

import jax
import jax.numpy as jnp
from jax.experimental import pallas as pl
from jax.experimental.pallas import tpu as pltpu

# ----------------------------------------------------------------------------
# Pallas kernel: single full-K matmul with fused (bias, leaky-relu) epilogue.
# ----------------------------------------------------------------------------
TN = 128   # all layer output widths (incl. 4*Cout for deconvs) are <= 128


def _mm_fused_kernel(a_ref, b_ref, bias_ref, o_ref, *, alpha):
    # bf16 x bf16 -> f32 accumulate on the MXU, f32 epilogue on the VPU.
    acc = jnp.dot(a_ref[...], b_ref[...], preferred_element_type=jnp.float32)
    y = acc + bias_ref[...]
    if alpha != 1.0:                       # LeakyReLU(alpha); alpha=1 -> identity
        y = jnp.where(y > 0, y, alpha * y)
    o_ref[...] = y.astype(o_ref.dtype)


def _round_up(x, m):
    return ((x + m - 1) // m) * m


def matmul_fused(cols, wmat_p, bias_p, alpha, out_dtype):
    """(M,Kp) @ pre-padded (Kp,128) weight, then bias + LeakyReLU(alpha)."""
    M, K = cols.shape
    Kp, Np = wmat_p.shape
    assert Np == TN and K == Kp, (cols.shape, wmat_p.shape)

    # One block while M is small (per-step overhead dominates); otherwise
    # 256-row tiles: bounded VMEM at large resolutions, >=2 "parallel" blocks
    # so v7x's two TensorCores both get work.
    TM = _round_up(M, 16) if M < 512 else 256
    Mp = _round_up(M, TM)
    nm = Mp // TM

    a = cols.astype(jnp.bfloat16)
    if M != Mp:
        a = jnp.pad(a, ((0, Mp - M), (0, 0)))

    out = pl.pallas_call(
        functools.partial(_mm_fused_kernel, alpha=alpha),
        out_shape=jax.ShapeDtypeStruct((Mp, Np), out_dtype),
        grid_spec=pltpu.PrefetchScalarGridSpec(
            num_scalar_prefetch=0,
            grid=(nm,),
            in_specs=[
                pl.BlockSpec((TM, Kp), lambda i: (i, 0)),   # activations
                pl.BlockSpec((Kp, Np), lambda i: (0, 0)),   # weight (resident)
                pl.BlockSpec((1, Np), lambda i: (0, 0)),    # bias row
            ],
            out_specs=pl.BlockSpec((TM, Np), lambda i: (i, 0)),
        ),
        compiler_params=pltpu.CompilerParams(
            dimension_semantics=("parallel",)),
    )(a, wmat_p, bias_p)
    return out[:M]


# ----------------------------------------------------------------------------
# im2col (plain JAX glue; activations are bf16 so this traffic is halved).
# The lane (K) zero-padding to the kernel's Kp is fused into the concat so the
# im2col matrix is materialized exactly once per layer.
# ----------------------------------------------------------------------------
def _im2col(x, kh, kw, stride, pad, kp):
    """x: NHWC -> (B*Ho*Wo, kp), patch layout (kh, kw, C), zero-padded to kp."""
    xp = jnp.pad(x, ((0, 0), (pad, pad), (pad, pad), (0, 0)))
    B, H, W, C = xp.shape
    Ho = (H - kh) // stride + 1
    Wo = (W - kw) // stride + 1
    patches = []
    for i in range(kh):
        for j in range(kw):
            patches.append(
                xp[:, i:i + (Ho - 1) * stride + 1:stride,
                      j:j + (Wo - 1) * stride + 1:stride, :])
    K = kh * kw * C
    assert kp >= K, (kp, K)
    if kp > K:
        patches.append(jnp.zeros((B, Ho, Wo, kp - K), x.dtype))
    cols = jnp.concatenate(patches, axis=-1)          # (B,Ho,Wo,kp)
    return cols.reshape(B * Ho * Wo, kp), Ho, Wo


# ----------------------------------------------------------------------------
# Static per-layer configuration (kept out of the jitted pytree).
# ----------------------------------------------------------------------------
BN_EPS = 1e-5
BN_SCALE = 1.0 / math.sqrt(1.0 + BN_EPS)   # eval BatchNorm with default stats
# TODO(synk): BN_SCALE assumes default eval running stats (mean=0, var=1,
# affine identity); for trained weights fold the real gamma/beta/mean/var
# into wmat / bias in prepare_params.

LAYER_CFG = {
    "conv1":         dict(kind="conv", k=7, stride=2, pad=3, alpha=0.1, bn=True,  cout=16),
    "conv2":         dict(kind="conv", k=5, stride=2, pad=2, alpha=0.1, bn=True,  cout=32),
    "conv3":         dict(kind="conv", k=5, stride=2, pad=2, alpha=0.1, bn=True,  cout=64),
    "conv3_1":       dict(kind="conv", k=3, stride=1, pad=1, alpha=0.1, bn=True,  cout=64),
    "conv4":         dict(kind="conv", k=3, stride=2, pad=1, alpha=0.1, bn=True,  cout=128),
    "conv4_1":       dict(kind="conv", k=3, stride=1, pad=1, alpha=0.1, bn=True,  cout=128),
    "predict_flow4": dict(kind="conv", k=3, stride=1, pad=1, alpha=1.0, bn=False, cout=2),
    "predict_flow3": dict(kind="conv", k=3, stride=1, pad=1, alpha=1.0, bn=False, cout=2),
    "predict_flow2": dict(kind="conv", k=3, stride=1, pad=1, alpha=1.0, bn=False, cout=2),
    "deconv3":       dict(kind="deconv", alpha=0.1, cout=32),
    "deconv2":       dict(kind="deconv", alpha=0.1, cout=16),
    "up_flow4_to_3": dict(kind="deconv", alpha=1.0, cout=2),
    "up_flow3_to_2": dict(kind="deconv", alpha=1.0, cout=2),
}


# ----------------------------------------------------------------------------
# Parameter construction (deterministic xavier-uniform, matching shapes of
# FlowNetS.__init__ with batchNorm=True) and one-time preparation.
# ----------------------------------------------------------------------------
def _xavier(key, shape, fan_in, fan_out):
    bound = math.sqrt(6.0 / (fan_in + fan_out))
    return jax.random.uniform(key, shape, jnp.float32, -bound, bound)


def _conv_w(key, cout, cin, k):
    return _xavier(key, (cout, cin, k, k), cin * k * k, cout * k * k)


def _deconv_w(key, cin, cout, k):
    # PyTorch ConvTranspose2d weight layout: (Cin, Cout, kh, kw)
    return _xavier(key, (cin, cout, k, k), cout * k * k, cin * k * k)


def init_params(key, input_channels=12):
    ks = jax.random.split(key, 16)
    p = {}
    p["conv1"]         = _conv_w(ks[0], 16, input_channels, 7)
    p["conv2"]         = _conv_w(ks[1], 32, 16, 5)
    p["conv3"]         = _conv_w(ks[2], 64, 32, 5)
    p["conv3_1"]       = _conv_w(ks[3], 64, 64, 3)
    p["conv4"]         = _conv_w(ks[4], 128, 64, 3)
    p["conv4_1"]       = _conv_w(ks[5], 128, 128, 3)
    p["deconv3"]       = _deconv_w(ks[6], 128, 32, 4)
    p["deconv2"]       = _deconv_w(ks[7], 32 + 64 + 2, 16, 4)
    p["predict_flow4"] = _conv_w(ks[8], 2, 128, 3)
    p["predict_flow3"] = _conv_w(ks[9], 2, 32 + 64 + 2, 3)
    p["predict_flow2"] = _conv_w(ks[10], 2, 16 + 32 + 2, 3)
    p["up_flow4_to_3"] = _deconv_w(ks[11], 2, 2, 4)
    p["up_flow3_to_2"] = _deconv_w(ks[12], 2, 2, 4)
    return p


def _prepare_conv(w, scale):
    """PyTorch (Cout,Cin,kh,kw) -> pre-padded bf16 (Kp,128) with BN scale folded."""
    Cout, Cin, kh, kw = w.shape
    K = kh * kw * Cin
    Kp = _round_up(K, 128)
    wmat = jnp.transpose(w, (2, 3, 1, 0)).reshape(K, Cout) * scale
    wmat_p = jnp.zeros((Kp, TN), jnp.bfloat16).at[:K, :Cout].set(
        wmat.astype(jnp.bfloat16))
    bias_p = jnp.zeros((1, TN), jnp.float32)   # all biases are zero in this model
    return {"wmat": wmat_p, "bias": bias_p}


def _prepare_deconv(w):
    """ConvTranspose2d(k=4,s=2,p=1) as a sub-pixel 3x3-window matmul.

    Each of the 4 output phases (row/col parity) only touches a 2x2 subset of
    the 4x4 kernel and a 2x2 window of the *un-dilated* input; all 4 phases are
    packed into one (9*Cin, 4*Cout) weight matrix consumed by a single matmul.
    """
    Cin, Cout, kh, kw = w.shape
    assert kh == 4 and kw == 4
    wc = jnp.transpose(jnp.flip(w, axis=(2, 3)), (1, 0, 2, 3))  # (Cout,Cin,4,4)
    big = jnp.zeros((3, 3, Cin, 2, 2, Cout), jnp.float32)
    # parity -> [(window offset di, flipped-kernel tap a), ...]
    taps = {0: ((0, 0), (1, 2)), 1: ((1, 1), (2, 3))}
    for pr in (0, 1):
        for pc in (0, 1):
            for di, a in taps[pr]:
                for dj, b in taps[pc]:
                    big = big.at[di, dj, :, pr, pc, :].set(wc[:, :, a, b].T)
    K = 9 * Cin
    N = 4 * Cout
    Kp = _round_up(K, 128)
    wmat = big.reshape(K, N)
    wmat_p = jnp.zeros((Kp, TN), jnp.bfloat16).at[:K, :N].set(
        wmat.astype(jnp.bfloat16))
    bias_p = jnp.zeros((1, TN), jnp.float32)
    return {"wmat": wmat_p, "bias": bias_p}


def prepare_params(raw):
    prepared = {}
    for name, cfg in LAYER_CFG.items():
        if cfg["kind"] == "conv":
            scale = BN_SCALE if cfg["bn"] else 1.0
            prepared[name] = _prepare_conv(raw[name], scale)
        else:
            prepared[name] = _prepare_deconv(raw[name])
    return prepared


# ----------------------------------------------------------------------------
# Layer wrappers.
# ----------------------------------------------------------------------------
def _layer_conv(params, name, x, out_dtype=jnp.bfloat16):
    cfg = LAYER_CFG[name]
    B = x.shape[0]
    Kp = params[name]["wmat"].shape[0]
    cols, Ho, Wo = _im2col(x, cfg["k"], cfg["k"], cfg["stride"], cfg["pad"], Kp)
    y = matmul_fused(cols, params[name]["wmat"], params[name]["bias"],
                     cfg["alpha"], out_dtype)
    return y[:, :cfg["cout"]].reshape(B, Ho, Wo, cfg["cout"])


def _layer_deconv(params, name, x, out_dtype=jnp.bfloat16):
    """ConvTranspose2d(k=4, s=2, p=1) [+ LeakyReLU], sub-pixel formulation."""
    cfg = LAYER_CFG[name]
    B, H, W, _ = x.shape
    Kp = params[name]["wmat"].shape[0]
    cols, _, _ = _im2col(x, 3, 3, 1, 1, Kp)
    y = matmul_fused(cols, params[name]["wmat"], params[name]["bias"],
                     cfg["alpha"], out_dtype)
    C = cfg["cout"]
    y = y[:, :4 * C].reshape(B, H, W, 2, 2, C)          # (..., pr, pc, C)
    return jnp.transpose(y, (0, 1, 3, 2, 4, 5)).reshape(B, 2 * H, 2 * W, C)


# ----------------------------------------------------------------------------
# FlowNetS forward (eval mode: dropout = identity, returns (flow2,)).
# ----------------------------------------------------------------------------
def flownets_forward(params, x_nhwc):
    # TODO(synk): reference forward uses `out_conv2d`/`out_conv3d` before
    # assignment, reassigns `out_conv4.weight = out_conv3.weight.t()` and calls
    # undefined `self.predict_flow`; we implement the intended dataflow.
    x = x_nhwc.astype(jnp.bfloat16)

    out_conv1 = _layer_conv(params, "conv1", x)            # Dropout(0.8), eval -> id
    out_conv2 = _layer_conv(params, "conv2", out_conv1)    # Dropout, eval -> id
    out_conv3 = _layer_conv(params, "conv3_1",
                            _layer_conv(params, "conv3", out_conv2))
    out_conv4 = _layer_conv(params, "conv4_1",
                            _layer_conv(params, "conv4", out_conv3))

    flow4 = _layer_conv(params, "predict_flow4", out_conv4)
    flow4_up = _layer_deconv(params, "up_flow4_to_3", flow4)
    out_deconv3 = _layer_deconv(params, "deconv3", out_conv4)

    concat3 = jnp.concatenate((out_conv3, out_deconv3, flow4_up), axis=-1)
    flow3 = _layer_conv(params, "predict_flow3", concat3)
    flow3_up = _layer_deconv(params, "up_flow3_to_2", flow3)
    out_deconv2 = _layer_deconv(params, "deconv2", concat3)

    concat2 = jnp.concatenate((out_conv2, out_deconv2, flow3_up), axis=-1)
    flow2 = _layer_conv(params, "predict_flow2", concat2, out_dtype=jnp.float32)

    return (flow2,)   # eval mode


# ----------------------------------------------------------------------------
if __name__ == "__main__":
    key = jax.random.PRNGKey(0)
    kx, kp = jax.random.split(key)

    # PyTorch-style NCHW input: batch=2, channels=12 (FlowNetS default), 32x32.
    x_nchw = jax.random.normal(kx, (2, 12, 32, 32), jnp.float32)
    x_nhwc = jnp.transpose(x_nchw, (0, 2, 3, 1))

    raw_params = init_params(kp, input_channels=12)
    params = prepare_params(raw_params)   # fold BN, pad, transpose, cast -> once

    (flow2_nhwc,) = jax.jit(flownets_forward)(params, x_nhwc)
    flow2 = jnp.transpose(flow2_nhwc, (0, 3, 1, 2))   # back to NCHW
    jax.block_until_ready(flow2)

    assert flow2.shape == (2, 2, 8, 8), flow2.shape
    assert bool(jnp.all(jnp.isfinite(flow2)))
    print("KERNEL_OK")
</pallas_src>

<mosaic_0001>
module attributes {stable_mosaic.version = 11 : i64} {
  func.func @_mm_fused_kernel(%arg0: i32, %arg1: memref<256x640xbf16, #tpu.memory_space<vmem>>, %arg2: memref<640x128xbf16, #tpu.memory_space<vmem>>, %arg3: memref<1x128xf32, #tpu.memory_space<vmem>>, %arg4: memref<256x128xbf16, #tpu.memory_space<vmem>>) attributes {dimension_semantics = [#tpu.dimension_semantics<parallel>], iteration_bounds = array<i64: 2>, scalar_prefetch = 0 : i64, scratch_operands = 0 : i64, tpu.core_type = #tpu.core_type<tc>, window_params = [{transform_indices = @transform_0, window_bounds = array<i64: 256, 640>}, {pipeline_mode = #tpu.pipeline_mode<synchronous>, transform_indices = @transform_1, window_bounds = array<i64: 640, 128>}, {pipeline_mode = #tpu.pipeline_mode<synchronous>, transform_indices = @transform_2, window_bounds = array<i64: 1, 128>}, {transform_indices = @transform_3, window_bounds = array<i64: 256, 128>}]} {
    %c0 = arith.constant 0 : index
    %c0_0 = arith.constant 0 : index
    %0 = vector.load %arg1[%c0, %c0_0] : memref<256x640xbf16, #tpu.memory_space<vmem>>, vector<256x640xbf16>
    %c0_1 = arith.constant 0 : index
    %c0_2 = arith.constant 0 : index
    %1 = vector.load %arg2[%c0_1, %c0_2] : memref<640x128xbf16, #tpu.memory_space<vmem>>, vector<640x128xbf16>
    %cst = arith.constant dense<0.000000e+00> : vector<256x128xf32>
    %2 = tpu.matmul %0, %1, %cst {dimension_numbers = #tpu.dot_dimension_numbers<[1], [0], [0], [1], [0, 0, 1, 1], [], []>} : vector<256x640xbf16>, vector<640x128xbf16>, vector<256x128xf32> -> vector<256x128xf32>
    %c0_3 = arith.constant 0 : index
    %c0_4 = arith.constant 0 : index
    %3 = vector.load %arg3[%c0_3, %c0_4] : memref<1x128xf32, #tpu.memory_space<vmem>>, vector<1x128xf32>
    %4 = vector.broadcast %3 : vector<1x128xf32> to vector<256x128xf32>
    %5 = arith.addf %2, %4 : vector<256x128xf32>
    %cst_5 = arith.constant 0.000000e+00 : f32
    %6 = vector.broadcast %cst_5 : f32 to vector<256x128xf32>
    %7 = arith.cmpf ogt, %5, %6 : vector<256x128xf32>
    %cst_6 = arith.constant 1.000000e-01 : f32
    %8 = vector.broadcast %cst_6 : f32 to vector<256x128xf32>
    %9 = arith.mulf %8, %5 : vector<256x128xf32>
    %10 = arith.select %7, %5, %9 : vector<256x128xi1>, vector<256x128xf32>
    %11 = arith.truncf %10 : vector<256x128xf32> to vector<256x128xbf16>
    %c0_7 = arith.constant 0 : index
    %c0_8 = arith.constant 0 : index
    %12 = vector.load %arg4[%c0_7, %c0_8] : memref<256x128xbf16, #tpu.memory_space<vmem>>, vector<256x128xbf16>
    tpu.vector_store %arg4[%c0_7, %c0_8], %11 {strides = array<i32>} : memref<256x128xbf16, #tpu.memory_space<vmem>>, vector<256x128xbf16>,
    return
  }
  func.func @transform_0(%arg0: i32) -> (i32, i32) {
    %c0_i32 = arith.constant 0 : i32
    %c0_i32_0 = arith.constant 0 : i32
    return %arg0, %c0_i32 : i32, i32
  }
  func.func @transform_1(%arg0: i32) -> (i32, i32) {
    %c0_i32 = arith.constant 0 : i32
    %c0_i32_0 = arith.constant 0 : i32
    %c0_i32_1 = arith.constant 0 : i32
    return %c0_i32, %c0_i32_0 : i32, i32
  }
  func.func @transform_2(%arg0: i32) -> (i32, i32) {
    %c0_i32 = arith.constant 0 : i32
    %c0_i32_0 = arith.constant 0 : i32
    %c0_i32_1 = arith.constant 0 : i32
    return %c0_i32, %c0_i32_0 : i32, i32
  }
  func.func @transform_3(%arg0: i32) -> (i32, i32) {
    %c0_i32 = arith.constant 0 : i32
    %c0_i32_0 = arith.constant 0 : i32
    return %arg0, %c0_i32 : i32, i32
  }
}

module attributes {stable_mosaic.version = 11 : i64} {
  func.func @_mm_fused_kernel(%arg0: i32, %arg1: memref<128x512xbf16, #tpu.memory_space<vmem>>, %arg2: memref<512x128xbf16, #tpu.memory_space<vmem>>, %arg3: memref<1x128xf32, #tpu.memory_space<vmem>>, %arg4: memref<128x128xbf16, #tpu.memory_space<vmem>>) attributes {dimension_semantics = [#tpu.dimension_semantics<parallel>], iteration_bounds = array<i64: 1>, scalar_prefetch = 0 : i64, scratch_operands = 0 : i64, tpu.core_type = #tpu.core_type<tc>, window_params = [{transform_indices = @transform_0, window_bounds = array<i64: 128, 512>}, {pipeline_mode = #tpu.pipeline_mode<synchronous>, transform_indices = @transform_1, window_bounds = array<i64: 512, 128>}, {pipeline_mode = #tpu.pipeline_mode<synchronous>, transform_indices = @transform_2, window_bounds = array<i64: 1, 128>}, {transform_indices = @transform_3, window_bounds = array<i64: 128, 128>}]} {
    %c0 = arith.constant 0 : index
    %c0_0 = arith.constant 0 : index
    %0 = vector.load %arg1[%c0, %c0_0] : memref<128x512xbf16, #tpu.memory_space<vmem>>, vector<128x512xbf16>
    %c0_1 = arith.constant 0 : index
    %c0_2 = arith.constant 0 : index
    %1 = vector.load %arg2[%c0_1, %c0_2] : memref<512x128xbf16, #tpu.memory_space<vmem>>, vector<512x128xbf16>
    %cst = arith.constant dense<0.000000e+00> : vector<128x128xf32>
    %2 = tpu.matmul %0, %1, %cst {dimension_numbers = #tpu.dot_dimension_numbers<[1], [0], [0], [1], [0, 0, 1, 1], [], []>} : vector<128x512xbf16>, vector<512x128xbf16>, vector<128x128xf32> -> vector<128x128xf32>
    %c0_3 = arith.constant 0 : index
    %c0_4 = arith.constant 0 : index
    %3 = vector.load %arg3[%c0_3, %c0_4] : memref<1x128xf32, #tpu.memory_space<vmem>>, vector<1x128xf32>
    %4 = vector.broadcast %3 : vector<1x128xf32> to vector<128x128xf32>
    %5 = arith.addf %2, %4 : vector<128x128xf32>
    %cst_5 = arith.constant 0.000000e+00 : f32
    %6 = vector.broadcast %cst_5 : f32 to vector<128x128xf32>
    %7 = arith.cmpf ogt, %5, %6 : vector<128x128xf32>
    %cst_6 = arith.constant 1.000000e-01 : f32
    %8 = vector.broadcast %cst_6 : f32 to vector<128x128xf32>
    %9 = arith.mulf %8, %5 : vector<128x128xf32>
    %10 = arith.select %7, %5, %9 : vector<128x128xi1>, vector<128x128xf32>
    %11 = arith.truncf %10 : vector<128x128xf32> to vector<128x128xbf16>
    %c0_7 = arith.constant 0 : index
    %c0_8 = arith.constant 0 : index
    %12 = vector.load %arg4[%c0_7, %c0_8] : memref<128x128xbf16, #tpu.memory_space<vmem>>, vector<128x128xbf16>
    tpu.vector_store %arg4[%c0_7, %c0_8], %11 {strides = array<i32>} : memref<128x128xbf16, #tpu.memory_space<vmem>>, vector<128x128xbf16>,
    return
  }
  func.func @transform_0(%arg0: i32) -> (i32, i32) {
    %c0_i32 = arith.constant 0 : i32
    %c0_i32_0 = arith.constant 0 : i32
    return %arg0, %c0_i32 : i32, i32
  }
  func.func @transform_1(%arg0: i32) -> (i32, i32) {
    %c0_i32 = arith.constant 0 : i32
    %c0_i32_0 = arith.constant 0 : i32
    %c0_i32_1 = arith.constant 0 : i32
    return %c0_i32, %c0_i32_0 : i32, i32
  }
  func.func @transform_2(%arg0: i32) -> (i32, i32) {
    %c0_i32 = arith.constant 0 : i32
    %c0_i32_0 = arith.constant 0 : i32
    %c0_i32_1 = arith.constant 0 : i32
    return %c0_i32, %c0_i32_0 : i32, i32
  }
  func.func @transform_3(%arg0: i32) -> (i32, i32) {
    %c0_i32 = arith.constant 0 : i32
    %c0_i32_0 = arith.constant 0 : i32
    return %arg0, %c0_i32 : i32, i32
  }
}

module attributes {stable_mosaic.version = 11 : i64} {
  func.func @_mm_fused_kernel(%arg0: i32, %arg1: memref<32x896xbf16, #tpu.memory_space<vmem>>, %arg2: memref<896x128xbf16, #tpu.memory_space<vmem>>, %arg3: memref<1x128xf32, #tpu.memory_space<vmem>>, %arg4: memref<32x128xbf16, #tpu.memory_space<vmem>>) attributes {dimension_semantics = [#tpu.dimension_semantics<parallel>], iteration_bounds = array<i64: 1>, scalar_prefetch = 0 : i64, scratch_operands = 0 : i64, tpu.core_type = #tpu.core_type<tc>, window_params = [{transform_indices = @transform_0, window_bounds = array<i64: 32, 896>}, {pipeline_mode = #tpu.pipeline_mode<synchronous>, transform_indices = @transform_1, window_bounds = array<i64: 896, 128>}, {pipeline_mode = #tpu.pipeline_mode<synchronous>, transform_indices = @transform_2, window_bounds = array<i64: 1, 128>}, {transform_indices = @transform_3, window_bounds = array<i64: 32, 128>}]} {
    %c0 = arith.constant 0 : index
    %c0_0 = arith.constant 0 : index
    %0 = vector.load %arg1[%c0, %c0_0] : memref<32x896xbf16, #tpu.memory_space<vmem>>, vector<32x896xbf16>
    %c0_1 = arith.constant 0 : index
    %c0_2 = arith.constant 0 : index
    %1 = vector.load %arg2[%c0_1, %c0_2] : memref<896x128xbf16, #tpu.memory_space<vmem>>, vector<896x128xbf16>
    %cst = arith.constant dense<0.000000e+00> : vector<32x128xf32>
    %2 = tpu.matmul %0, %1, %cst {dimension_numbers = #tpu.dot_dimension_numbers<[1], [0], [0], [1], [0, 0, 1, 1], [], []>} : vector<32x896xbf16>, vector<896x128xbf16>, vector<32x128xf32> -> vector<32x128xf32>
    %c0_3 = arith.constant 0 : index
    %c0_4 = arith.constant 0 : index
    %3 = vector.load %arg3[%c0_3, %c0_4] : memref<1x128xf32, #tpu.memory_space<vmem>>, vector<1x128xf32>
    %4 = vector.broadcast %3 : vector<1x128xf32> to vector<32x128xf32>
    %5 = arith.addf %2, %4 : vector<32x128xf32>
    %cst_5 = arith.constant 0.000000e+00 : f32
    %6 = vector.broadcast %cst_5 : f32 to vector<32x128xf32>
    %7 = arith.cmpf ogt, %5, %6 : vector<32x128xf32>
    %cst_6 = arith.constant 1.000000e-01 : f32
    %8 = vector.broadcast %cst_6 : f32 to vector<32x128xf32>
    %9 = arith.mulf %8, %5 : vector<32x128xf32>
    %10 = arith.select %7, %5, %9 : vector<32x128xi1>, vector<32x128xf32>
    %11 = arith.truncf %10 : vector<32x128xf32> to vector<32x128xbf16>
    %c0_7 = arith.constant 0 : index
    %c0_8 = arith.constant 0 : index
    %12 = vector.load %arg4[%c0_7, %c0_8] : memref<32x128xbf16, #tpu.memory_space<vmem>>, vector<32x128xbf16>
    tpu.vector_store %arg4[%c0_7, %c0_8], %11 {strides = array<i32>} : memref<32x128xbf16, #tpu.memory_space<vmem>>, vector<32x128xbf16>,
    return
  }
  func.func @transform_0(%arg0: i32) -> (i32, i32) {
    %c0_i32 = arith.constant 0 : i32
    %c0_i32_0 = arith.constant 0 : i32
    return %arg0, %c0_i32 : i32, i32
  }
  func.func @transform_1(%arg0: i32) -> (i32, i32) {
    %c0_i32 = arith.constant 0 : i32
    %c0_i32_0 = arith.constant 0 : i32
    %c0_i32_1 = arith.constant 0 : i32
    return %c0_i32, %c0_i32_0 : i32, i32
  }
  func.func @transform_2(%arg0: i32) -> (i32, i32) {
    %c0_i32 = arith.constant 0 : i32
    %c0_i32_0 = arith.constant 0 : i32
    %c0_i32_1 = arith.constant 0 : i32
    return %c0_i32, %c0_i32_0 : i32, i32
  }
  func.func @transform_3(%arg0: i32) -> (i32, i32) {
    %c0_i32 = arith.constant 0 : i32
    %c0_i32_0 = arith.constant 0 : i32
    return %arg0, %c0_i32 : i32, i32
  }
}

module attributes {stable_mosaic.version = 11 : i64} {
  func.func @_mm_fused_kernel(%arg0: i32, %arg1: memref<32x640xbf16, #tpu.memory_space<vmem>>, %arg2: memref<640x128xbf16, #tpu.memory_space<vmem>>, %arg3: memref<1x128xf32, #tpu.memory_space<vmem>>, %arg4: memref<32x128xbf16, #tpu.memory_space<vmem>>) attributes {dimension_semantics = [#tpu.dimension_semantics<parallel>], iteration_bounds = array<i64: 1>, scalar_prefetch = 0 : i64, scratch_operands = 0 : i64, tpu.core_type = #tpu.core_type<tc>, window_params = [{transform_indices = @transform_0, window_bounds = array<i64: 32, 640>}, {pipeline_mode = #tpu.pipeline_mode<synchronous>, transform_indices = @transform_1, window_bounds = array<i64: 640, 128>}, {pipeline_mode = #tpu.pipeline_mode<synchronous>, transform_indices = @transform_2, window_bounds = array<i64: 1, 128>}, {transform_indices = @transform_3, window_bounds = array<i64: 32, 128>}]} {
    %c0 = arith.constant 0 : index
    %c0_0 = arith.constant 0 : index
    %0 = vector.load %arg1[%c0, %c0_0] : memref<32x640xbf16, #tpu.memory_space<vmem>>, vector<32x640xbf16>
    %c0_1 = arith.constant 0 : index
    %c0_2 = arith.constant 0 : index
    %1 = vector.load %arg2[%c0_1, %c0_2] : memref<640x128xbf16, #tpu.memory_space<vmem>>, vector<640x128xbf16>
    %cst = arith.constant dense<0.000000e+00> : vector<32x128xf32>
    %2 = tpu.matmul %0, %1, %cst {dimension_numbers = #tpu.dot_dimension_numbers<[1], [0], [0], [1], [0, 0, 1, 1], [], []>} : vector<32x640xbf16>, vector<640x128xbf16>, vector<32x128xf32> -> vector<32x128xf32>
    %c0_3 = arith.constant 0 : index
    %c0_4 = arith.constant 0 : index
    %3 = vector.load %arg3[%c0_3, %c0_4] : memref<1x128xf32, #tpu.memory_space<vmem>>, vector<1x128xf32>
    %4 = vector.broadcast %3 : vector<1x128xf32> to vector<32x128xf32>
    %5 = arith.addf %2, %4 : vector<32x128xf32>
    %cst_5 = arith.constant 0.000000e+00 : f32
    %6 = vector.broadcast %cst_5 : f32 to vector<32x128xf32>
    %7 = arith.cmpf ogt, %5, %6 : vector<32x128xf32>
    %cst_6 = arith.constant 1.000000e-01 : f32
    %8 = vector.broadcast %cst_6 : f32 to vector<32x128xf32>
    %9 = arith.mulf %8, %5 : vector<32x128xf32>
    %10 = arith.select %7, %5, %9 : vector<32x128xi1>, vector<32x128xf32>
    %11 = arith.truncf %10 : vector<32x128xf32> to vector<32x128xbf16>
    %c0_7 = arith.constant 0 : index
    %c0_8 = arith.constant 0 : index
    %12 = vector.load %arg4[%c0_7, %c0_8] : memref<32x128xbf16, #tpu.memory_space<vmem>>, vector<32x128xbf16>
    tpu.vector_store %arg4[%c0_7, %c0_8], %11 {strides = array<i32>} : memref<32x128xbf16, #tpu.memory_space<vmem>>, vector<32x128xbf16>,
    return
  }
  func.func @transform_0(%arg0: i32) -> (i32, i32) {
    %c0_i32 = arith.constant 0 : i32
    %c0_i32_0 = arith.constant 0 : i32
    return %arg0, %c0_i32 : i32, i32
  }
  func.func @transform_1(%arg0: i32) -> (i32, i32) {
    %c0_i32 = arith.constant 0 : i32
    %c0_i32_0 = arith.constant 0 : i32
    %c0_i32_1 = arith.constant 0 : i32
    return %c0_i32, %c0_i32_0 : i32, i32
  }
  func.func @transform_2(%arg0: i32) -> (i32, i32) {
    %c0_i32 = arith.constant 0 : i32
    %c0_i32_0 = arith.constant 0 : i32
    %c0_i32_1 = arith.constant 0 : i32
    return %c0_i32, %c0_i32_0 : i32, i32
  }
  func.func @transform_3(%arg0: i32) -> (i32, i32) {
    %c0_i32 = arith.constant 0 : i32
    %c0_i32_0 = arith.constant 0 : i32
    return %arg0, %c0_i32 : i32, i32
  }
}

module attributes {stable_mosaic.version = 11 : i64} {
  func.func @_mm_fused_kernel(%arg0: i32, %arg1: memref<16x640xbf16, #tpu.memory_space<vmem>>, %arg2: memref<640x128xbf16, #tpu.memory_space<vmem>>, %arg3: memref<1x128xf32, #tpu.memory_space<vmem>>, %arg4: memref<16x128xbf16, #tpu.memory_space<vmem>>) attributes {dimension_semantics = [#tpu.dimension_semantics<parallel>], iteration_bounds = array<i64: 1>, scalar_prefetch = 0 : i64, scratch_operands = 0 : i64, tpu.core_type = #tpu.core_type<tc>, window_params = [{transform_indices = @transform_0, window_bounds = array<i64: 16, 640>}, {pipeline_mode = #tpu.pipeline_mode<synchronous>, transform_indices = @transform_1, window_bounds = array<i64: 640, 128>}, {pipeline_mode = #tpu.pipeline_mode<synchronous>, transform_indices = @transform_2, window_bounds = array<i64: 1, 128>}, {transform_indices = @transform_3, window_bounds = array<i64: 16, 128>}]} {
    %c0 = arith.constant 0 : index
    %c0_0 = arith.constant 0 : index
    %0 = vector.load %arg1[%c0, %c0_0] : memref<16x640xbf16, #tpu.memory_space<vmem>>, vector<16x640xbf16>
    %c0_1 = arith.constant 0 : index
    %c0_2 = arith.constant 0 : index
    %1 = vector.load %arg2[%c0_1, %c0_2] : memref<640x128xbf16, #tpu.memory_space<vmem>>, vector<640x128xbf16>
    %cst = arith.constant dense<0.000000e+00> : vector<16x128xf32>
    %2 = tpu.matmul %0, %1, %cst {dimension_numbers = #tpu.dot_dimension_numbers<[1], [0], [0], [1], [0, 0, 1, 1], [], []>} : vector<16x640xbf16>, vector<640x128xbf16>, vector<16x128xf32> -> vector<16x128xf32>
    %c0_3 = arith.constant 0 : index
    %c0_4 = arith.constant 0 : index
    %3 = vector.load %arg3[%c0_3, %c0_4] : memref<1x128xf32, #tpu.memory_space<vmem>>, vector<1x128xf32>
    %4 = vector.broadcast %3 : vector<1x128xf32> to vector<16x128xf32>
    %5 = arith.addf %2, %4 : vector<16x128xf32>
    %cst_5 = arith.constant 0.000000e+00 : f32
    %6 = vector.broadcast %cst_5 : f32 to vector<16x128xf32>
    %7 = arith.cmpf ogt, %5, %6 : vector<16x128xf32>
    %cst_6 = arith.constant 1.000000e-01 : f32
    %8 = vector.broadcast %cst_6 : f32 to vector<16x128xf32>
    %9 = arith.mulf %8, %5 : vector<16x128xf32>
    %10 = arith.select %7, %5, %9 : vector<16x128xi1>, vector<16x128xf32>
    %11 = arith.truncf %10 : vector<16x128xf32> to vector<16x128xbf16>
    %c0_7 = arith.constant 0 : index
    %c0_8 = arith.constant 0 : index
    %12 = vector.load %arg4[%c0_7, %c0_8] : memref<16x128xbf16, #tpu.memory_space<vmem>>, vector<16x128xbf16>
    tpu.vector_store %arg4[%c0_7, %c0_8], %11 {strides = array<i32>} : memref<16x128xbf16, #tpu.memory_space<vmem>>, vector<16x128xbf16>,
    return
  }
  func.func @transform_0(%arg0: i32) -> (i32, i32) {
    %c0_i32 = arith.constant 0 : i32
    %c0_i32_0 = arith.constant 0 : i32
    return %arg0, %c0_i32 : i32, i32
  }
  func.func @transform_1(%arg0: i32) -> (i32, i32) {
    %c0_i32 = arith.constant 0 : i32
    %c0_i32_0 = arith.constant 0 : i32
    %c0_i32_1 = arith.constant 0 : i32
    return %c0_i32, %c0_i32_0 : i32, i32
  }
  func.func @transform_2(%arg0: i32) -> (i32, i32) {
    %c0_i32 = arith.constant 0 : i32
    %c0_i32_0 = arith.constant 0 : i32
    %c0_i32_1 = arith.constant 0 : i32
    return %c0_i32, %c0_i32_0 : i32, i32
  }
  func.func @transform_3(%arg0: i32) -> (i32, i32) {
    %c0_i32 = arith.constant 0 : i32
    %c0_i32_0 = arith.constant 0 : i32
    return %arg0, %c0_i32 : i32, i32
  }
}

module attributes {stable_mosaic.version = 11 : i64} {
  func.func @_mm_fused_kernel(%arg0: i32, %arg1: memref<16x1152xbf16, #tpu.memory_space<vmem>>, %arg2: memref<1152x128xbf16, #tpu.memory_space<vmem>>, %arg3: memref<1x128xf32, #tpu.memory_space<vmem>>, %arg4: memref<16x128xbf16, #tpu.memory_space<vmem>>) attributes {dimension_semantics = [#tpu.dimension_semantics<parallel>], iteration_bounds = array<i64: 1>, scalar_prefetch = 0 : i64, scratch_operands = 0 : i64, tpu.core_type = #tpu.core_type<tc>, window_params = [{transform_indices = @transform_0, window_bounds = array<i64: 16, 1152>}, {pipeline_mode = #tpu.pipeline_mode<synchronous>, transform_indices = @transform_1, window_bounds = array<i64: 1152, 128>}, {pipeline_mode = #tpu.pipeline_mode<synchronous>, transform_indices = @transform_2, window_bounds = array<i64: 1, 128>}, {transform_indices = @transform_3, window_bounds = array<i64: 16, 128>}]} {
    %c0 = arith.constant 0 : index
    %c0_0 = arith.constant 0 : index
    %0 = vector.load %arg1[%c0, %c0_0] : memref<16x1152xbf16, #tpu.memory_space<vmem>>, vector<16x1152xbf16>
    %c0_1 = arith.constant 0 : index
    %c0_2 = arith.constant 0 : index
    %1 = vector.load %arg2[%c0_1, %c0_2] : memref<1152x128xbf16, #tpu.memory_space<vmem>>, vector<1152x128xbf16>
    %cst = arith.constant dense<0.000000e+00> : vector<16x128xf32>
    %2 = tpu.matmul %0, %1, %cst {dimension_numbers = #tpu.dot_dimension_numbers<[1], [0], [0], [1], [0, 0, 1, 1], [], []>} : vector<16x1152xbf16>, vector<1152x128xbf16>, vector<16x128xf32> -> vector<16x128xf32>
    %c0_3 = arith.constant 0 : index
    %c0_4 = arith.constant 0 : index
    %3 = vector.load %arg3[%c0_3, %c0_4] : memref<1x128xf32, #tpu.memory_space<vmem>>, vector<1x128xf32>
    %4 = vector.broadcast %3 : vector<1x128xf32> to vector<16x128xf32>
    %5 = arith.addf %2, %4 : vector<16x128xf32>
    %6 = arith.truncf %5 : vector<16x128xf32> to vector<16x128xbf16>
    %c0_5 = arith.constant 0 : index
    %c0_6 = arith.constant 0 : index
    %7 = vector.load %arg4[%c0_5, %c0_6] : memref<16x128xbf16, #tpu.memory_space<vmem>>, vector<16x128xbf16>
    tpu.vector_store %arg4[%c0_5, %c0_6], %6 {strides = array<i32>} : memref<16x128xbf16, #tpu.memory_space<vmem>>, vector<16x128xbf16>,
    return
  }
  func.func @transform_0(%arg0: i32) -> (i32, i32) {
    %c0_i32 = arith.constant 0 : i32
    %c0_i32_0 = arith.constant 0 : i32
    return %arg0, %c0_i32 : i32, i32
  }
  func.func @transform_1(%arg0: i32) -> (i32, i32) {
    %c0_i32 = arith.constant 0 : i32
    %c0_i32_0 = arith.constant 0 : i32
    %c0_i32_1 = arith.constant 0 : i32
    return %c0_i32, %c0_i32_0 : i32, i32
  }
  func.func @transform_2(%arg0: i32) -> (i32, i32) {
    %c0_i32 = arith.constant 0 : i32
    %c0_i32_0 = arith.constant 0 : i32
    %c0_i32_1 = arith.constant 0 : i32
    return %c0_i32, %c0_i32_0 : i32, i32
  }
  func.func @transform_3(%arg0: i32) -> (i32, i32) {
    %c0_i32 = arith.constant 0 : i32
    %c0_i32_0 = arith.constant 0 : i32
    return %arg0, %c0_i32 : i32, i32
  }
}

module attributes {stable_mosaic.version = 11 : i64} {
  func.func @_mm_fused_kernel(%arg0: i32, %arg1: memref<16x1152xbf16, #tpu.memory_space<vmem>>, %arg2: memref<1152x128xbf16, #tpu.memory_space<vmem>>, %arg3: memref<1x128xf32, #tpu.memory_space<vmem>>, %arg4: memref<16x128xbf16, #tpu.memory_space<vmem>>) attributes {dimension_semantics = [#tpu.dimension_semantics<parallel>], iteration_bounds = array<i64: 1>, scalar_prefetch = 0 : i64, scratch_operands = 0 : i64, tpu.core_type = #tpu.core_type<tc>, window_params = [{transform_indices = @transform_0, window_bounds = array<i64: 16, 1152>}, {pipeline_mode = #tpu.pipeline_mode<synchronous>, transform_indices = @transform_1, window_bounds = array<i64: 1152, 128>}, {pipeline_mode = #tpu.pipeline_mode<synchronous>, transform_indices = @transform_2, window_bounds = array<i64: 1, 128>}, {transform_indices = @transform_3, window_bounds = array<i64: 16, 128>}]} {
    %c0 = arith.constant 0 : index
    %c0_0 = arith.constant 0 : index
    %0 = vector.load %arg1[%c0, %c0_0] : memref<16x1152xbf16, #tpu.memory_space<vmem>>, vector<16x1152xbf16>
    %c0_1 = arith.constant 0 : index
    %c0_2 = arith.constant 0 : index
    %1 = vector.load %arg2[%c0_1, %c0_2] : memref<1152x128xbf16, #tpu.memory_space<vmem>>, vector<1152x128xbf16>
    %cst = arith.constant dense<0.000000e+00> : vector<16x128xf32>
    %2 = tpu.matmul %0, %1, %cst {dimension_numbers = #tpu.dot_dimension_numbers<[1], [0], [0], [1], [0, 0, 1, 1], [], []>} : vector<16x1152xbf16>, vector<1152x128xbf16>, vector<16x128xf32> -> vector<16x128xf32>
    %c0_3 = arith.constant 0 : index
    %c0_4 = arith.constant 0 : index
    %3 = vector.load %arg3[%c0_3, %c0_4] : memref<1x128xf32, #tpu.memory_space<vmem>>, vector<1x128xf32>
    %4 = vector.broadcast %3 : vector<1x128xf32> to vector<16x128xf32>
    %5 = arith.addf %2, %4 : vector<16x128xf32>
    %cst_5 = arith.constant 0.000000e+00 : f32
    %6 = vector.broadcast %cst_5 : f32 to vector<16x128xf32>
    %7 = arith.cmpf ogt, %5, %6 : vector<16x128xf32>
    %cst_6 = arith.constant 1.000000e-01 : f32
    %8 = vector.broadcast %cst_6 : f32 to vector<16x128xf32>
    %9 = arith.mulf %8, %5 : vector<16x128xf32>
    %10 = arith.select %7, %5, %9 : vector<16x128xi1>, vector<16x128xf32>
    %11 = arith.truncf %10 : vector<16x128xf32> to vector<16x128xbf16>
    %c0_7 = arith.constant 0 : index
    %c0_8 = arith.constant 0 : index
    %12 = vector.load %arg4[%c0_7, %c0_8] : memref<16x128xbf16, #tpu.memory_space<vmem>>, vector<16x128xbf16>
    tpu.vector_store %arg4[%c0_7, %c0_8], %11 {strides = array<i32>} : memref<16x128xbf16, #tpu.memory_space<vmem>>, vector<16x128xbf16>,
    return
  }
  func.func @transform_0(%arg0: i32) -> (i32, i32) {
    %c0_i32 = arith.constant 0 : i32
    %c0_i32_0 = arith.constant 0 : i32
    return %arg0, %c0_i32 : i32, i32
  }
  func.func @transform_1(%arg0: i32) -> (i32, i32) {
    %c0_i32 = arith.constant 0 : i32
    %c0_i32_0 = arith.constant 0 : i32
    %c0_i32_1 = arith.constant 0 : i32
    return %c0_i32, %c0_i32_0 : i32, i32
  }
  func.func @transform_2(%arg0: i32) -> (i32, i32) {
    %c0_i32 = arith.constant 0 : i32
    %c0_i32_0 = arith.constant 0 : i32
    %c0_i32_1 = arith.constant 0 : i32
    return %c0_i32, %c0_i32_0 : i32, i32
  }
  func.func @transform_3(%arg0: i32) -> (i32, i32) {
    %c0_i32 = arith.constant 0 : i32
    %c0_i32_0 = arith.constant 0 : i32
    return %arg0, %c0_i32 : i32, i32
  }
}

module attributes {stable_mosaic.version = 11 : i64} {
  func.func @_mm_fused_kernel(%arg0: i32, %arg1: memref<16x128xbf16, #tpu.memory_space<vmem>>, %arg2: memref<128x128xbf16, #tpu.memory_space<vmem>>, %arg3: memref<1x128xf32, #tpu.memory_space<vmem>>, %arg4: memref<16x128xbf16, #tpu.memory_space<vmem>>) attributes {dimension_semantics = [#tpu.dimension_semantics<parallel>], iteration_bounds = array<i64: 1>, scalar_prefetch = 0 : i64, scratch_operands = 0 : i64, tpu.core_type = #tpu.core_type<tc>, window_params = [{transform_indices = @transform_0, window_bounds = array<i64: 16, 128>}, {pipeline_mode = #tpu.pipeline_mode<synchronous>, transform_indices = @transform_1, window_bounds = array<i64: 128, 128>}, {pipeline_mode = #tpu.pipeline_mode<synchronous>, transform_indices = @transform_2, window_bounds = array<i64: 1, 128>}, {transform_indices = @transform_3, window_bounds = array<i64: 16, 128>}]} {
    %c0 = arith.constant 0 : index
    %c0_0 = arith.constant 0 : index
    %0 = vector.load %arg1[%c0, %c0_0] : memref<16x128xbf16, #tpu.memory_space<vmem>>, vector<16x128xbf16>
    %c0_1 = arith.constant 0 : index
    %c0_2 = arith.constant 0 : index
    %1 = vector.load %arg2[%c0_1, %c0_2] : memref<128x128xbf16, #tpu.memory_space<vmem>>, vector<128x128xbf16>
    %cst = arith.constant dense<0.000000e+00> : vector<16x128xf32>
    %2 = tpu.matmul %0, %1, %cst {dimension_numbers = #tpu.dot_dimension_numbers<[1], [0], [0], [1], [0, 0, 1, 1], [], []>} : vector<16x128xbf16>, vector<128x128xbf16>, vector<16x128xf32> -> vector<16x128xf32>
    %c0_3 = arith.constant 0 : index
    %c0_4 = arith.constant 0 : index
    %3 = vector.load %arg3[%c0_3, %c0_4] : memref<1x128xf32, #tpu.memory_space<vmem>>, vector<1x128xf32>
    %4 = vector.broadcast %3 : vector<1x128xf32> to vector<16x128xf32>
    %5 = arith.addf %2, %4 : vector<16x128xf32>
    %6 = arith.truncf %5 : vector<16x128xf32> to vector<16x128xbf16>
    %c0_5 = arith.constant 0 : index
    %c0_6 = arith.constant 0 : index
    %7 = vector.load %arg4[%c0_5, %c0_6] : memref<16x128xbf16, #tpu.memory_space<vmem>>, vector<16x128xbf16>
    tpu.vector_store %arg4[%c0_5, %c0_6], %6 {strides = array<i32>} : memref<16x128xbf16, #tpu.memory_space<vmem>>, vector<16x128xbf16>,
    return
  }
  func.func @transform_0(%arg0: i32) -> (i32, i32) {
    %c0_i32 = arith.constant 0 : i32
    %c0_i32_0 = arith.constant 0 : i32
    return %arg0, %c0_i32 : i32, i32
  }
  func.func @transform_1(%arg0: i32) -> (i32, i32) {
    %c0_i32 = arith.constant 0 : i32
    %c0_i32_0 = arith.constant 0 : i32
    %c0_i32_1 = arith.constant 0 : i32
    return %c0_i32, %c0_i32_0 : i32, i32
  }
  func.func @transform_2(%arg0: i32) -> (i32, i32) {
    %c0_i32 = arith.constant 0 : i32
    %c0_i32_0 = arith.constant 0 : i32
    %c0_i32_1 = arith.constant 0 : i32
    return %c0_i32, %c0_i32_0 : i32, i32
  }
  func.func @transform_3(%arg0: i32) -> (i32, i32) {
    %c0_i32 = arith.constant 0 : i32
    %c0_i32_0 = arith.constant 0 : i32
    return %arg0, %c0_i32 : i32, i32
  }
}

module attributes {stable_mosaic.version = 11 : i64} {
  func.func @_mm_fused_kernel(%arg0: i32, %arg1: memref<32x896xbf16, #tpu.memory_space<vmem>>, %arg2: memref<896x128xbf16, #tpu.memory_space<vmem>>, %arg3: memref<1x128xf32, #tpu.memory_space<vmem>>, %arg4: memref<32x128xbf16, #tpu.memory_space<vmem>>) attributes {dimension_semantics = [#tpu.dimension_semantics<parallel>], iteration_bounds = array<i64: 1>, scalar_prefetch = 0 : i64, scratch_operands = 0 : i64, tpu.core_type = #tpu.core_type<tc>, window_params = [{transform_indices = @transform_0, window_bounds = array<i64: 32, 896>}, {pipeline_mode = #tpu.pipeline_mode<synchronous>, transform_indices = @transform_1, window_bounds = array<i64: 896, 128>}, {pipeline_mode = #tpu.pipeline_mode<synchronous>, transform_indices = @transform_2, window_bounds = array<i64: 1, 128>}, {transform_indices = @transform_3, window_bounds = array<i64: 32, 128>}]} {
    %c0 = arith.constant 0 : index
    %c0_0 = arith.constant 0 : index
    %0 = vector.load %arg1[%c0, %c0_0] : memref<32x896xbf16, #tpu.memory_space<vmem>>, vector<32x896xbf16>
    %c0_1 = arith.constant 0 : index
    %c0_2 = arith.constant 0 : index
    %1 = vector.load %arg2[%c0_1, %c0_2] : memref<896x128xbf16, #tpu.memory_space<vmem>>, vector<896x128xbf16>
    %cst = arith.constant dense<0.000000e+00> : vector<32x128xf32>
    %2 = tpu.matmul %0, %1, %cst {dimension_numbers = #tpu.dot_dimension_numbers<[1], [0], [0], [1], [0, 0, 1, 1], [], []>} : vector<32x896xbf16>, vector<896x128xbf16>, vector<32x128xf32> -> vector<32x128xf32>
    %c0_3 = arith.constant 0 : index
    %c0_4 = arith.constant 0 : index
    %3 = vector.load %arg3[%c0_3, %c0_4] : memref<1x128xf32, #tpu.memory_space<vmem>>, vector<1x128xf32>
    %4 = vector.broadcast %3 : vector<1x128xf32> to vector<32x128xf32>
    %5 = arith.addf %2, %4 : vector<32x128xf32>
    %6 = arith.truncf %5 : vector<32x128xf32> to vector<32x128xbf16>
    %c0_5 = arith.constant 0 : index
    %c0_6 = arith.constant 0 : index
    %7 = vector.load %arg4[%c0_5, %c0_6] : memref<32x128xbf16, #tpu.memory_space<vmem>>, vector<32x128xbf16>
    tpu.vector_store %arg4[%c0_5, %c0_6], %6 {strides = array<i32>} : memref<32x128xbf16, #tpu.memory_space<vmem>>, vector<32x128xbf16>,
    return
  }
  func.func @transform_0(%arg0: i32) -> (i32, i32) {
    %c0_i32 = arith.constant 0 : i32
    %c0_i32_0 = arith.constant 0 : i32
    return %arg0, %c0_i32 : i32, i32
  }
  func.func @transform_1(%arg0: i32) -> (i32, i32) {
    %c0_i32 = arith.constant 0 : i32
    %c0_i32_0 = arith.constant 0 : i32
    %c0_i32_1 = arith.constant 0 : i32
    return %c0_i32, %c0_i32_0 : i32, i32
  }
  func.func @transform_2(%arg0: i32) -> (i32, i32) {
    %c0_i32 = arith.constant 0 : i32
    %c0_i32_0 = arith.constant 0 : i32
    %c0_i32_1 = arith.constant 0 : i32
    return %c0_i32, %c0_i32_0 : i32, i32
  }
  func.func @transform_3(%arg0: i32) -> (i32, i32) {
    %c0_i32 = arith.constant 0 : i32
    %c0_i32_0 = arith.constant 0 : i32
    return %arg0, %c0_i32 : i32, i32
  }
}

module attributes {stable_mosaic.version = 11 : i64} {
  func.func @_mm_fused_kernel(%arg0: i32, %arg1: memref<32x128xbf16, #tpu.memory_space<vmem>>, %arg2: memref<128x128xbf16, #tpu.memory_space<vmem>>, %arg3: memref<1x128xf32, #tpu.memory_space<vmem>>, %arg4: memref<32x128xbf16, #tpu.memory_space<vmem>>) attributes {dimension_semantics = [#tpu.dimension_semantics<parallel>], iteration_bounds = array<i64: 1>, scalar_prefetch = 0 : i64, scratch_operands = 0 : i64, tpu.core_type = #tpu.core_type<tc>, window_params = [{transform_indices = @transform_0, window_bounds = array<i64: 32, 128>}, {pipeline_mode = #tpu.pipeline_mode<synchronous>, transform_indices = @transform_1, window_bounds = array<i64: 128, 128>}, {pipeline_mode = #tpu.pipeline_mode<synchronous>, transform_indices = @transform_2, window_bounds = array<i64: 1, 128>}, {transform_indices = @transform_3, window_bounds = array<i64: 32, 128>}]} {
    %c0 = arith.constant 0 : index
    %c0_0 = arith.constant 0 : index
    %0 = vector.load %arg1[%c0, %c0_0] : memref<32x128xbf16, #tpu.memory_space<vmem>>, vector<32x128xbf16>
    %c0_1 = arith.constant 0 : index
    %c0_2 = arith.constant 0 : index
    %1 = vector.load %arg2[%c0_1, %c0_2] : memref<128x128xbf16, #tpu.memory_space<vmem>>, vector<128x128xbf16>
    %cst = arith.constant dense<0.000000e+00> : vector<32x128xf32>
    %2 = tpu.matmul %0, %1, %cst {dimension_numbers = #tpu.dot_dimension_numbers<[1], [0], [0], [1], [0, 0, 1, 1], [], []>} : vector<32x128xbf16>, vector<128x128xbf16>, vector<32x128xf32> -> vector<32x128xf32>
    %c0_3 = arith.constant 0 : index
    %c0_4 = arith.constant 0 : index
    %3 = vector.load %arg3[%c0_3, %c0_4] : memref<1x128xf32, #tpu.memory_space<vmem>>, vector<1x128xf32>
    %4 = vector.broadcast %3 : vector<1x128xf32> to vector<32x128xf32>
    %5 = arith.addf %2, %4 : vector<32x128xf32>
    %6 = arith.truncf %5 : vector<32x128xf32> to vector<32x128xbf16>
    %c0_5 = arith.constant 0 : index
    %c0_6 = arith.constant 0 : index
    %7 = vector.load %arg4[%c0_5, %c0_6] : memref<32x128xbf16, #tpu.memory_space<vmem>>, vector<32x128xbf16>
    tpu.vector_store %arg4[%c0_5, %c0_6], %6 {strides = array<i32>} : memref<32x128xbf16, #tpu.memory_space<vmem>>, vector<32x128xbf16>,
    return
  }
  func.func @transform_0(%arg0: i32) -> (i32, i32) {
    %c0_i32 = arith.constant 0 : i32
    %c0_i32_0 = arith.constant 0 : i32
    return %arg0, %c0_i32 : i32, i32
  }
  func.func @transform_1(%arg0: i32) -> (i32, i32) {
    %c0_i32 = arith.constant 0 : i32
    %c0_i32_0 = arith.constant 0 : i32
    %c0_i32_1 = arith.constant 0 : i32
    return %c0_i32, %c0_i32_0 : i32, i32
  }
  func.func @transform_2(%arg0: i32) -> (i32, i32) {
    %c0_i32 = arith.constant 0 : i32
    %c0_i32_0 = arith.constant 0 : i32
    %c0_i32_1 = arith.constant 0 : i32
    return %c0_i32, %c0_i32_0 : i32, i32
  }
  func.func @transform_3(%arg0: i32) -> (i32, i32) {
    %c0_i32 = arith.constant 0 : i32
    %c0_i32_0 = arith.constant 0 : i32
    return %arg0, %c0_i32 : i32, i32
  }
}

module attributes {stable_mosaic.version = 11 : i64} {
  func.func @_mm_fused_kernel(%arg0: i32, %arg1: memref<128x512xbf16, #tpu.memory_space<vmem>>, %arg2: memref<512x128xbf16, #tpu.memory_space<vmem>>, %arg3: memref<1x128xf32, #tpu.memory_space<vmem>>, %arg4: memref<128x128xf32, #tpu.memory_space<vmem>>) attributes {dimension_semantics = [#tpu.dimension_semantics<parallel>], iteration_bounds = array<i64: 1>, scalar_prefetch = 0 : i64, scratch_operands = 0 : i64, tpu.core_type = #tpu.core_type<tc>, window_params = [{transform_indices = @transform_0, window_bounds = array<i64: 128, 512>}, {pipeline_mode = #tpu.pipeline_mode<synchronous>, transform_indices = @transform_1, window_bounds = array<i64: 512, 128>}, {pipeline_mode = #tpu.pipeline_mode<synchronous>, transform_indices = @transform_2, window_bounds = array<i64: 1, 128>}, {transform_indices = @transform_3, window_bounds = array<i64: 128, 128>}]} {
    %c0 = arith.constant 0 : index
    %c0_0 = arith.constant 0 : index
    %0 = vector.load %arg1[%c0, %c0_0] : memref<128x512xbf16, #tpu.memory_space<vmem>>, vector<128x512xbf16>
    %c0_1 = arith.constant 0 : index
    %c0_2 = arith.constant 0 : index
    %1 = vector.load %arg2[%c0_1, %c0_2] : memref<512x128xbf16, #tpu.memory_space<vmem>>, vector<512x128xbf16>
    %cst = arith.constant dense<0.000000e+00> : vector<128x128xf32>
    %2 = tpu.matmul %0, %1, %cst {dimension_numbers = #tpu.dot_dimension_numbers<[1], [0], [0], [1], [0, 0, 1, 1], [], []>} : vector<128x512xbf16>, vector<512x128xbf16>, vector<128x128xf32> -> vector<128x128xf32>
    %c0_3 = arith.constant 0 : index
    %c0_4 = arith.constant 0 : index
    %3 = vector.load %arg3[%c0_3, %c0_4] : memref<1x128xf32, #tpu.memory_space<vmem>>, vector<1x128xf32>
    %4 = vector.broadcast %3 : vector<1x128xf32> to vector<128x128xf32>
    %5 = arith.addf %2, %4 : vector<128x128xf32>
    %c0_5 = arith.constant 0 : index
    %c0_6 = arith.constant 0 : index
    %6 = vector.load %arg4[%c0_5, %c0_6] : memref<128x128xf32, #tpu.memory_space<vmem>>, vector<128x128xf32>
    tpu.vector_store %arg4[%c0_5, %c0_6], %5 {strides = array<i32>} : memref<128x128xf32, #tpu.memory_space<vmem>>, vector<128x128xf32>,
    return
  }
  func.func @transform_0(%arg0: i32) -> (i32, i32) {
    %c0_i32 = arith.constant 0 : i32
    %c0_i32_0 = arith.constant 0 : i32
    return %arg0, %c0_i32 : i32, i32
  }
  func.func @transform_1(%arg0: i32) -> (i32, i32) {
    %c0_i32 = arith.constant 0 : i32
    %c0_i32_0 = arith.constant 0 : i32
    %c0_i32_1 = arith.constant 0 : i32
    return %c0_i32, %c0_i32_0 : i32, i32
  }
  func.func @transform_2(%arg0: i32) -> (i32, i32) {
    %c0_i32 = arith.constant 0 : i32
    %c0_i32_0 = arith.constant 0 : i32
    %c0_i32_1 = arith.constant 0 : i32
    return %c0_i32, %c0_i32_0 : i32, i32
  }
  func.func @transform_3(%arg0: i32) -> (i32, i32) {
    %c0_i32 = arith.constant 0 : i32
    %c0_i32_0 = arith.constant 0 : i32
    return %arg0, %c0_i32 : i32, i32
  }
}

</mosaic_0001>

<bundles_post_ra>
// kernel: flownets_forward.13
= control target key start
LH: loop header
LB: loop body
LE: loop exit
PB: predicated region body
PF: predicated region fallthrough
CT: control target
= control target key end

     0   :  { %s2604_s12 = smov 0   ;;  %s2993_s0 = inlined_call_operand.vmem [shape: bf16[512,640], index: 0, kind: input, shape index: {}]   ;;  %s2994_s1 = inlined_call_operand.vmem [shape: bf16[640,128], index: 1, kind: input, shape index: {}]   ;;  %s2995_s2 = inlined_call_operand.vmem [shape: f32[1,128], index: 2, kind: input, shape index: {}]   ;;  %s2996_s3 = inlined_call_operand.vmem [shape: bf16[512,128], index: 3, kind: output, shape index: {}]  }
   0x1 LB: > { %s1812_s13 = sadd.s32 4294967295, %s2582_s12   ;;  %p1816_p0 = scmp.ge.s32.totalorder %s2582_s12, 1  ;;  %s2582_s12 = sphi %s2604_s12, %s13_s12  }
   0x2   : > { %p139_p1 = scmp.lt.s32.totalorder %s2582_s12, 3 }
   0x4   : > { %p140_p2 = pnand %p1816_p0, %p139_p1 }
   0x5   : > { %v2424_v0 = vld [vmem:[%s2994_s1 + $0x40] sm:$0xff] (!%p140_p2)   ;;  %s1817_s16 = sshll.u32 (!%p140_p2), %s1812_s13, 5  ;;  %v2426_v2 = vld [vmem:[%s2994_s1 + $0x48] sm:$0xff] (!%p140_p2)   ;;  %v2428_v4 = vld [vmem:[%s2994_s1 + $0x50] sm:$0xff] (!%p140_p2)  }
   0x6   : > { %143 = sbr.rel (%p140_p2) target bundleno = 417 (0x1a1), region = 32  ;;  %v2425_v1 = vld [vmem:[%s2994_s1] sm:$0xff] (!%p140_p2)   ;;  %2103 = vmatprep.subr.bf16.mxu0 (!%p140_p2), %v2424_v0  ;;  %2399 = vmatprep.subr.bf16.mxu1 (!%p140_p2), %v2424_v0  ;;  %p165_p3 = scmp.lt.s32.totalorder (!%p140_p2), %s1817_s16, 63  ;;  %v2427_v3 = vld [vmem:[%s2994_s1 + $0x8] sm:$0xff] (!%p140_p2)   ;;  %v2429_v5 = vld [vmem:[%s2994_s1 + $0x10] sm:$0xff] (!%p140_p2)  }
   0x7   : > { %2104 = vmatpush3.bf16.msra.mxu0 (!%p140_p2), %v2425_v1  ;;  %2407 = vmatpush3.bf16.msra.mxu1 (!%p140_p2), %v2425_v1  ;;  %v2430_v6 = vld [vmem:[%s2994_s1 + $0x58] sm:$0xff] (!%p140_p2)   ;;  %v2432_v8 = vld [vmem:[%s2994_s1 + $0x60] sm:$0xff] (!%p140_p2)   ;;  %v2434_v10 = vld [vmem:[%s2994_s1 + $0x68] sm:$0xff] (!%p140_p2)  }
   0x8   : > { %2105 = vmatprep.subr.bf16.mxu0 (!%p140_p2), %v2426_v2  ;;  %2400 = vmatprep.subr.bf16.mxu1 (!%p140_p2), %v2426_v2  ;;  %v2431_v7 = vld [vmem:[%s2994_s1 + $0x18] sm:$0xff] (!%p140_p2)   ;;  %v2433_v9 = vld [vmem:[%s2994_s1 + $0x20] sm:$0xff] (!%p140_p2)   ;;  %v2435_v13 = vld [vmem:[%s2994_s1 + $0x28] sm:$0xff] (!%p140_p2)  }
   0x9   : > { %v2436_v14 = vld [vmem:[%s2994_s1 + $0x70] sm:$0xff] (!%p140_p2)   ;;  %v2438_v16 = vld [vmem:[%s2994_s1 + $0x78] sm:$0xff] (!%p140_p2)   ;;  %v2446_v18 = vld [vmem:[%s2994_s1 + $0xc0] sm:$0xff] (!%p140_p2)  }
   0xa   : > { %v2437_v15 = vld [vmem:[%s2994_s1 + $0x30] sm:$0xff] (!%p140_p2)   ;;  %v2439_v17 = vld [vmem:[%s2994_s1 + $0x38] sm:$0xff] (!%p140_p2)   ;;  %v2449_v19 = vld [vmem:[%s2994_s1 + $0x100] sm:$0xff] (!%p140_p2)  }
   0xb   : > { %2106 = vmatpush3.bf16.msra.mxu0 (!%p140_p2), %v2427_v3  ;;  %2408 = vmatpush3.bf16.msra.mxu1 (!%p140_p2), %v2427_v3  ;;  %v2447_v22 = vld [vmem:[%s2994_s1 + $0x80] sm:$0xff] (!%p140_p2)   ;;  %v2448_v23 = vld [vmem:[%s2994_s1 + $0xc8] sm:$0xff] (!%p140_p2)   ;;  %v2457_v29 = vld [vmem:[%s2994_s1 + $0xd0] sm:$0xff] (!%p140_p2)  }
   0xc   : > { %2107 = vmatprep.subr.bf16.mxu0 (!%p140_p2), %v2428_v4  ;;  %2401 = vmatprep.subr.bf16.mxu1 (!%p140_p2), %v2428_v4  ;;  %v2468_v26 = vld [vmem:[%s2994_s1 + $0x108] sm:$0xff] (!%p140_p2)   ;;  %v2458_v31 = vld [vmem:[%s2994_s1 + $0x90] sm:$0xff] (!%p140_p2)   ;;  %v2459_v33 = vld [vmem:[%s2994_s1 + $0xd8] sm:$0xff] (!%p140_p2)  }
   0xd   : > { %s2998_s16 = smov (!%p165_p3, %s1817_s16), 63  ;;  %v2450_v27 = vld [vmem:[%s2994_s1 + $0x88] sm:$0xff]   ;;  %v2460_v35 = vld [vmem:[%s2994_s1 + $0x98] sm:$0xff]   ;;  %v2467_v36 = vld [vmem:[%s2994_s1 + $0xe0] sm:$0xff]  }
   0xe   : > { %s2415_s29 = smul.u32 20, %s2998_s16  ;;  %v2481_v38 = vld [vmem:[%s2994_s1 + $0x110] sm:$0xff]   ;;  %v2469_v40 = vld [vmem:[%s2994_s1 + $0xa0] sm:$0xff]   ;;  %v2470_v41 = vld [vmem:[%s2994_s1 + $0xe8] sm:$0xff]   ;;  %s1820_s27 = sshll.u32 %s2998_s16, 2 }
   0xf   : > { %2108 = vmatpush3.bf16.msra.mxu0 %v2429_v5  ;;  %2409 = vmatpush3.bf16.msra.mxu1 %v2429_v5  ;;  %v2471_v44 = vld [vmem:[%s2994_s1 + $0xa8] sm:$0xff]   ;;  %v2495_v45 = vld [vmem:[%s2994_s1 + $0x118] sm:$0xff]   ;;  %v2478_v48 = vld [vmem:[%s2994_s1 + $0xf0] sm:$0xff]   ;;  %s2918_s30 = scalar_lea.vmem %s2996_s3, %s1820_s27 }
  0x10   : > { %2109 = vmatprep.subr.bf16.mxu0 %v2430_v6  ;;  %2402 = vmatprep.subr.bf16.mxu1 %v2430_v6  ;;  %s2645_s9 = scalar_lea.vmem %s2993_s0, %s2415_s29  ;;  %v2479_v49 = vld [vmem:[%s2994_s1 + $0xb0] sm:$0xff]   ;;  %v2480_v50 = vld [vmem:[%s2994_s1 + $0xf8] sm:$0xff]   ;;  %v2502_v52 = vld [vmem:[%s2994_s1 + $0x120] sm:$0xff]  }
  0x11   : > { %v2442_v11 = vld [vmem:[%s2645_s9 + $0x4] ss:$20 sps:$4 sm:$0xff]   ;;  %v2440_v20 = vld [vmem:[%s2645_s9] ss:$20 sps:$4 sm:$0xff]   ;;  %v2455_v28 = vld [vmem:[%s2645_s9 + $0x28] ss:$20 sps:$4 sm:$0xff]  }
  0x12   : > { %v2445_v12 = vld [vmem:[%s2645_s9 + $0x1e4] ss:$20 sps:$4 sm:$0xff]   ;;  %1049 = vmatprep.mubr.bf16.mxu0 %v2442_v11  ;;  %v2443_v21 = vld [vmem:[%s2645_s9 + $0x1e0] ss:$20 sps:$4 sm:$0xff]   ;;  %v2456_v30 = vld [vmem:[%s2645_s9 + $0x208] ss:$20 sps:$4 sm:$0xff]  }
  0x13   : > { %2110 = vmatpush3.bf16.msra.mxu0 %v2431_v7  ;;  %2410 = vmatpush3.bf16.msra.mxu1 %v2431_v7  ;;  %v2451_v24 = vld [vmem:[%s2645_s9 + $0x2c] ss:$20 sps:$4 sm:$0xff]   ;;  %v2461_v32 = vld [vmem:[%s2645_s9 + $0x54] ss:$20 sps:$4 sm:$0xff]   ;;  %v2465_v37 = vld [vmem:[%s2645_s9 + $0x50] ss:$20 sps:$4 sm:$0xff]  }
  0x14   : > { %2111 = vmatprep.subr.bf16.mxu0 %v2432_v8  ;;  %2403 = vmatprep.subr.bf16.mxu1 %v2432_v8  ;;  %v2453_v25 = vld [vmem:[%s2645_s9 + $0x20c] ss:$20 sps:$4 sm:$0xff]   ;;  %v2463_v34 = vld [vmem:[%s2645_s9 + $0x234] ss:$20 sps:$4 sm:$0xff]   ;;  %v2466_v39 = vld [vmem:[%s2645_s9 + $0x230] ss:$20 sps:$4 sm:$0xff]  }
  0x15   : > { %1145 = vmatprep.mubr.bf16.mxu1 %v2445_v12  ;;  %v2472_v42 = vld [vmem:[%s2645_s9 + $0x7c] ss:$20 sps:$4 sm:$0xff]   ;;  %v2476_v46 = vld [vmem:[%s2645_s9 + $0x78] ss:$20 sps:$4 sm:$0xff]   ;;  %v2488_v56 = vld [vmem:[%s2645_s9 + $0xa0] ss:$20 sps:$4 sm:$0xff]  }
  0x16   : > { %v2474_v43 = vld [vmem:[%s2645_s9 + $0x25c] ss:$20 sps:$4 sm:$0xff]   ;;  %v2477_v47 = vld [vmem:[%s2645_s9 + $0x258] ss:$20 sps:$4 sm:$0xff]   ;;  %v2491_v59 = vld [vmem:[%s2645_s9 + $0x34] ss:$20 sps:$4 sm:$0xff]  }
  0x17   : > { %2112 = vmatpush3.bf16.msra.mxu0 %v2433_v9  ;;  %2411 = vmatpush3.bf16.msra.mxu1 %v2433_v9  ;;  %v2483_v51 = vld [vmem:[%s2645_s9 + $0xa4] ss:$20 sps:$4 sm:$0xff]   ;;  %v2487_v53 = vld [vmem:[%s2645_s9 + $0xc] ss:$20 sps:$4 sm:$0xff]   ;;  %v2485_v55 = vld [vmem:[%s2645_s9 + $0x8] ss:$20 sps:$4 sm:$0xff]  }
  0x18   : > { %2113 = vmatprep.subr.bf16.mxu0 %v2434_v10  ;;  %2404 = vmatprep.subr.bf16.mxu1 %v2434_v10  ;;  %v2482_v54 = vld [vmem:[%s2994_s1 + $0xb8] sm:$0xff]   ;;  %v2515_v57 = vld [vmem:[%s2994_s1 + $0x128] sm:$0xff]   ;;  %v2522_v60 = vld [vmem:[%s2994_s1 + $0x130] sm:$0xff]  }
  0x19   : > { %v2489_v58 = vld [vmem:[%s2645_s9 + $0xcc] ss:$20 sps:$4 sm:$0xff]   ;;  %v2493_v61 = vld [vmem:[%s2645_s9 + $0xc8] ss:$20 sps:$4 sm:$0xff]   ;;  %v2494_v62 = vld [vmem:[%s2645_s9 + $0x30] ss:$20 sps:$4 sm:$0xff]  }
  0x1a   : > { %v2496_v63 = vld [vmem:[%s2645_s9 + $0xf4] ss:$20 sps:$4 sm:$0xff]   ;;  %v2498_v0 = vld [vmem:[%s2645_s9 + $0x5c] ss:$20 sps:$4 sm:$0xff]   ;;  %v2501_v3 = vld [vmem:[%s2645_s9 + $0x58] ss:$20 sps:$4 sm:$0xff]  }
  0x1b   : > { %2114 = vmatpush3.bf16.msra.mxu0 %v2435_v13  ;;  %2412 = vmatpush3.bf16.msra.mxu1 %v2435_v13  ;;  %v2535_v1 = vld [vmem:[%s2994_s1 + $0x138] sm:$0xff]   ;;  %v2500_v2 = vld [vmem:[%s2645_s9 + $0xf0] ss:$20 sps:$4 sm:$0xff]   ;;  %v2508_v7 = vld [vmem:[%s2645_s9 + $0x80] ss:$20 sps:$4 sm:$0xff]  }
  0x1c   : > { %2115 = vmatprep.subr.bf16.mxu0 %v2436_v14  ;;  %2405 = vmatprep.subr.bf16.mxu1 %v2436_v14  ;;  %v2503_v4 = vld [vmem:[%s2645_s9 + $0x11c] ss:$20 sps:$4 sm:$0xff]   ;;  %v2505_v5 = vld [vmem:[%s2645_s9 + $0x84] ss:$20 sps:$4 sm:$0xff]   ;;  %v2511_v9 = vld [vmem:[%s2645_s9 + $0xac] ss:$20 sps:$4 sm:$0xff]  }
  0x1d   : > { %v2507_v6 = vld [vmem:[%s2645_s9 + $0x118] ss:$20 sps:$4 sm:$0xff]   ;;  %v2513_v10 = vld [vmem:[%s2645_s9 + $0x140] ss:$20 sps:$4 sm:$0xff]   ;;  %v2514_v11 = vld [vmem:[%s2645_s9 + $0xa8] ss:$20 sps:$4 sm:$0xff]  }
  0x1e   : > { %v2509_v8 = vld [vmem:[%s2645_s9 + $0x144] ss:$20 sps:$4 sm:$0xff]   ;;  %v2516_v12 = vld [vmem:[%s2645_s9 + $0x16c] ss:$20 sps:$4 sm:$0xff]   ;;  %v2518_v13 = vld [vmem:[%s2645_s9 + $0xd4] ss:$20 sps:$4 sm:$0xff]  }
  0x1f   : > { %2116 = vmatpush3.bf16.msra.mxu0 %v2437_v15  ;;  %2413 = vmatpush3.bf16.msra.mxu1 %v2437_v15  ;;  %v2520_v14 = vld [vmem:[%s2645_s9 + $0x168] ss:$20 sps:$4 sm:$0xff]   ;;  %v2521_v15 = vld [vmem:[%s2645_s9 + $0xd0] ss:$20 sps:$4 sm:$0xff]  }
  0x20   : > { %2117 = vmatprep.subr.bf16.mxu0 %v2438_v16  ;;  %2406 = vmatprep.subr.bf16.mxu1 %v2438_v16  ;;  %v2523_v16 = vld [vmem:[%s2645_s9 + $0x194] ss:$20 sps:$4 sm:$0xff]  }
  0x23   : > { %2118 = vmatpush3.bf16.msra.mxu0 %v2439_v17  ;;  %2414 = vmatpush3.bf16.msra.mxu1 %v2439_v17  ;;  %v2525_v17 = vld [vmem:[%s2645_s9 + $0xfc] ss:$20 sps:$4 sm:$0xff]  }
  0x24   : > { %2215 = vmatprep.subr.bf16.mxu1 %v2446_v18  ;;  %2351 = vmatprep.subr.bf16.mxu0 %v2449_v19  ;;  %v2527_v18 = vld [vmem:[%s2645_s9 + $0x190] ss:$20 sps:$4 sm:$0xff]  }
  0x26   : > { %1050 = vmatmul.mubr.bf16.vlgmr.msra.gmra.mrb[0].mxu0 %v2440_v20  ;;  %1146 = vmatmul.mubr.bf16.vlgmr.msra.gmra.mrb[0].mxu1 %v2443_v21  ;;  %v2529_v20 = vld [vmem:[%s2645_s9 + $0x1bc] ss:$20 sps:$4 sm:$0xff]   ;;  %v2531_v21 = vld [vmem:[%s2645_s9 + $0x124] ss:$20 sps:$4 sm:$0xff]  }
  0x27   : > { %2216 = vmatpush3.bf16.msra.mxu1 %v2447_v22  ;;  %2352 = vmatpush3.bf16.msra.mxu0 %v2449_v19  ;;  %v2528_v19 = vld [vmem:[%s2645_s9 + $0xf8] ss:$20 sps:$4 sm:$0xff]  }
  0x28   : > { %2217 = vmatprep.subr.bf16.mxu1 %v2448_v23  ;;  %1057 = vmatprep.mubr.bf16.mxu0 %v2451_v24  ;;  %v2533_v22 = vld [vmem:[%s2645_s9 + $0x1b8] ss:$20 sps:$4 sm:$0xff]   ;;  %v2534_v23 = vld [vmem:[%s2645_s9 + $0x120] ss:$20 sps:$4 sm:$0xff]  }
  0x29   : > { %1153 = vmatprep.mubr.bf16.mxu1 %v2453_v25  ;;  %2353 = vmatprep.subr.bf16.mxu0 %v2468_v26  ;;  %v2536_v24 = vld [vmem:[%s2645_s9 + $0x14c] ss:$20 sps:$4 sm:$0xff]   ;;  %v2538_v25 = vld [vmem:[%s2645_s9 + $0x10] ss:$20 sps:$4 sm:$0xff]  }
  0x2b   : > { %2218 = vmatpush3.bf16.msra.mxu1 %v2450_v27  ;;  %2354 = vmatpush3.bf16.msra.mxu0 %v2468_v26  ;;  %v2539_v26 = vld [vmem:[%s2645_s9 + $0x148] ss:$20 sps:$4 sm:$0xff]   ;;  %v2540_v27 = vld [vmem:[%s2645_s9 + $0x38] ss:$20 sps:$4 sm:$0xff]  }
  0x2c   : > { %2219 = vmatprep.subr.bf16.mxu1 %v2457_v29  ;;  %2355 = vmatprep.subr.bf16.mxu0 %v2481_v38  ;;  %v2543_v29 = vld [vmem:[%s2645_s9 + $0x60] ss:$20 sps:$4 sm:$0xff]  }
  0x2e   : > { %1058 = vmatmul.mubr.bf16.gmra.mrb[4].mxu0 %v2455_v28  ;;  %1154 = vmatmul.mubr.bf16.gmra.mrb[4].mxu1 %v2456_v30  ;;  %v2541_v28 = vld [vmem:[%s2645_s9 + $0x174] ss:$20 sps:$4 sm:$0xff]   ;;  %v2544_v30 = vld [vmem:[%s2645_s9 + $0x170] ss:$20 sps:$4 sm:$0xff]  }
  0x2f   : > { %2220 = vmatpush3.bf16.msra.mxu1 %v2458_v31  ;;  %1065 = vmatprep.mubr.bf16.mxu0 %v2461_v32  ;;  %v2545_v31 = vld [vmem:[%s2645_s9 + $0x88] ss:$20 sps:$4 sm:$0xff]  }
  0x30   : > { %2221 = vmatprep.subr.bf16.mxu1 %v2459_v33  ;;  %1161 = vmatprep.mubr.bf16.mxu1 %v2463_v34  ;;  %v2546_v32 = vld [vmem:[%s2645_s9 + $0x19c] ss:$20 sps:$4 sm:$0xff]   ;;  %v2549_v34 = vld [vmem:[%s2645_s9 + $0x198] ss:$20 sps:$4 sm:$0xff]  }
  0x31   : > { %2356 = vmatpush3.bf16.msra.mxu0 %v2481_v38  ;;  %v2548_v33 = vld [vmem:[%s2645_s9 + $0xb0] ss:$20 sps:$4 sm:$0xff]   ;;  %v2554_v38 = vld [vmem:[%s2645_s9 + $0x1c0] ss:$20 sps:$4 sm:$0xff]  }
  0x32   : > { %2357 = vmatprep.subr.bf16.mxu0 %v2495_v45 }
  0x33   : > { %2222 = vmatpush3.bf16.msra.mxu1 %v2460_v35  ;;  %v2550_v35 = vld [vmem:[%s2645_s9 + $0xd8] ss:$20 sps:$4 sm:$0xff]  }
  0x34   : > { %2223 = vmatprep.subr.bf16.mxu1 %v2467_v36  ;;  %v2551_v36 = vld [vmem:[%s2645_s9 + $0x1c4] ss:$20 sps:$4 sm:$0xff]  }
  0x35   : > { %2358 = vmatpush3.bf16.msra.mxu0 %v2495_v45  ;;  %v2563_v45 = vld [vmem:[%s2645_s9 + $0x1a0] ss:$20 sps:$4 sm:$0xff]  }
  0x36   : > { %1066 = vmatmul.mubr.bf16.gmra.mrb[8].mxu0 %v2465_v37  ;;  %1162 = vmatmul.mubr.bf16.gmra.mrb[8].mxu1 %v2466_v39  ;;  %v2553_v37 = vld [vmem:[%s2645_s9 + $0x100] ss:$20 sps:$4 sm:$0xff]   ;;  %v2555_v39 = vld [vmem:[%s2645_s9 + $0x128] ss:$20 sps:$4 sm:$0xff]  }
  0x37   : > { %2224 = vmatpush3.bf16.msra.mxu1 %v2469_v40  ;;  %1073 = vmatprep.mubr.bf16.mxu0 %v2472_v42  ;;  %v2556_v40 = vld [vmem:[%s2645_s9 + $0x1ec] ss:$20 sps:$4 sm:$0xff]   ;;  %v2559_v42 = vld [vmem:[%s2645_s9 + $0x1e8] ss:$20 sps:$4 sm:$0xff]  }
  0x38   : > { %2225 = vmatprep.subr.bf16.mxu1 %v2470_v41  ;;  %1169 = vmatprep.mubr.bf16.mxu1 %v2474_v43  ;;  %v2558_v41 = vld [vmem:[%s2645_s9 + $0x150] ss:$20 sps:$4 sm:$0xff]   ;;  %v2560_v43 = vld [vmem:[%s2645_s9 + $0x178] ss:$20 sps:$4 sm:$0xff]  }
  0x39   : > { %2359 = vmatprep.subr.bf16.mxu0 %v2502_v52 }
  0x3a   : > { %2360 = vmatpush3.bf16.msra.mxu0 %v2502_v52  ;;  %v2571_v52 = vld [vmem:[%s2645_s9 + $0x264] ss:$20 sps:$4 sm:$0xff]  }
  0x3b   : > { %2226 = vmatpush3.bf16.msra.mxu1 %v2471_v44  ;;  %2361 = vmatprep.subr.bf16.mxu0 %v2515_v57  ;;  %v2561_v44 = vld [vmem:[%s2645_s9 + $0x214] ss:$20 sps:$4 sm:$0xff]  }
  0x3c   : > { %2227 = vmatprep.subr.bf16.mxu1 %v2478_v48  ;;  %v2566_v48 = vld [vmem:[%s2645_s9 + $0x23c] ss:$20 sps:$4 sm:$0xff]  }
  0x3e   : > { %1074 = vmatmul.mubr.bf16.gmra.mrb[12].mxu0 %v2476_v46  ;;  %1170 = vmatmul.mubr.bf16.gmra.mrb[12].mxu1 %v2477_v47  ;;  %v2564_v46 = vld [vmem:[%s2645_s9 + $0x210] ss:$20 sps:$4 sm:$0xff]   ;;  %v2565_v47 = vld [vmem:[%s2645_s9 + $0x1c8] ss:$20 sps:$4 sm:$0xff]  }
  0x3f   : > { %2228 = vmatpush3.bf16.msra.mxu1 %v2479_v49  ;;  %1081 = vmatprep.mubr.bf16.mxu0 %v2483_v51  ;;  %v2568_v49 = vld [vmem:[%s2645_s9 + $0x1f0] ss:$20 sps:$4 sm:$0xff]   ;;  %v2570_v51 = vld [vmem:[%s2645_s9 + $0x218] ss:$20 sps:$4 sm:$0xff]  }
  0x40   : > { %2229 = vmatprep.subr.bf16.mxu1 %v2480_v50  ;;  %1210 = vmatprep.mubr.bf16.mxu1 %v2487_v53  ;;  %v2569_v50 = vld [vmem:[%s2645_s9 + $0x238] ss:$20 sps:$4 sm:$0xff]   ;;  %v2573_v53 = vld [vmem:[%s2645_s9 + $0x240] ss:$20 sps:$4 sm:$0xff]  }
  0x41   : > { %2362 = vmatpush3.bf16.msra.mxu0 %v2515_v57 }
  0x42   : > { %2363 = vmatprep.subr.bf16.mxu0 %v2522_v60 }
  0x43   : > { %2230 = vmatpush3.bf16.msra.mxu1 %v2482_v54  ;;  %v2574_v54 = vld [vmem:[%s2645_s9 + $0x260] ss:$20 sps:$4 sm:$0xff]  }
  0x45   : > { %2364 = vmatpush3.bf16.msra.mxu0 %v2522_v60 }
  0x46   : > { %1082 = vmatmul.mubr.bf16.gmra.mrb[16].mxu0 %v2488_v56  ;;  %1211 = vmatmul.mubr.bf16.vlgmr.msra.gmra.mrb[16].mxu1 %v2485_v55  ;;  %v2575_v55 = vld [vmem:[%s2645_s9 + $0x268] ss:$20 sps:$4 sm:$0xff]  }
  0x47   : > { %1089 = vmatprep.mubr.bf16.mxu0 %v2489_v58  ;;  %1218 = vmatprep.mubr.bf16.mxu1 %v2491_v59 }
  0x48   : > { %2365 = vmatprep.subr.bf16.mxu0 %v2535_v1 }
  0x49   : > { %2366 = vmatpush3.bf16.msra.mxu0 %v2535_v1 }
  0x4e   : > { %1090 = vmatmul.mubr.bf16.gmra.mrb[20].mxu0 %v2493_v61  ;;  %1219 = vmatmul.mubr.bf16.gmra.mrb[20].mxu1 %v2494_v62 }
  0x4f   : > { %1097 = vmatprep.mubr.bf16.mxu0 %v2496_v63  ;;  %1226 = vmatprep.mubr.bf16.mxu1 %v2498_v0 }
  0x56   : > { %1098 = vmatmul.mubr.bf16.gmra.mrb[24].mxu0 %v2500_v2  ;;  %1227 = vmatmul.mubr.bf16.gmra.mrb[24].mxu1 %v2501_v3 }
  0x57   : > { %1105 = vmatprep.mubr.bf16.mxu0 %v2503_v4  ;;  %1234 = vmatprep.mubr.bf16.mxu1 %v2505_v5 }
  0x5e   : > { %1106 = vmatmul.mubr.bf16.gmra.mrb[28].mxu0 %v2507_v6  ;;  %1235 = vmatmul.mubr.bf16.gmra.mrb[28].mxu1 %v2508_v7 }
  0x5f   : > { %1113 = vmatprep.mubr.bf16.mxu0 %v2509_v8  ;;  %1242 = vmatprep.mubr.bf16.mxu1 %v2511_v9 }
  0x66   : > { %1114 = vmatmul.mubr.bf16.gmra.mrb[32].mxu0 %v2513_v10  ;;  %1243 = vmatmul.mubr.bf16.gmra.mrb[32].mxu1 %v2514_v11 }
  0x67   : > { %1121 = vmatprep.mubr.bf16.mxu0 %v2516_v12  ;;  %1250 = vmatprep.mubr.bf16.mxu1 %v2518_v13 }
  0x6e   : > { %1122 = vmatmul.mubr.bf16.gmra.mrb[36].mxu0 %v2520_v14  ;;  %1251 = vmatmul.mubr.bf16.gmra.mrb[36].mxu1 %v2521_v15 }
  0x6f   : > { %1129 = vmatprep.mubr.bf16.mxu0 %v2523_v16  ;;  %1258 = vmatprep.mubr.bf16.mxu1 %v2525_v17 }
  0x76   : > { %1130 = vmatmul.mubr.bf16.gmra.mrb[40].mxu0 %v2527_v18  ;;  %1259 = vmatmul.mubr.bf16.gmra.mrb[40].mxu1 %v2528_v19 }
  0x77   : > { %1137 = vmatprep.mubr.bf16.mxu0 %v2529_v20  ;;  %1266 = vmatprep.mubr.bf16.mxu1 %v2531_v21 }
  0x7e   : > { %1138 = vmatmul.mubr.bf16.gmra.mrb[44].mxu0 %v2533_v22  ;;  %1267 = vmatmul.mubr.bf16.gmra.mrb[44].mxu1 %v2534_v23 }
  0x7f   : > { %1274 = vmatprep.mubr.bf16.mxu1 %v2536_v24  ;;  %2367 = vmatprep.mubr.bf16.mxu0 %v2538_v25 }
  0x86   : > { %1275 = vmatmul.mubr.bf16.gmra.mrb[48].mxu1 %v2539_v26  ;;  %2368 = vmatmul.mubr.bf16.vlgmr.msra.gmra.mrb[48].mxu0 %v2540_v27 }
  0x87   : > { %1282 = vmatprep.mubr.bf16.mxu1 %v2541_v28  ;;  %2371 = vmatprep.mubr.bf16.mxu0 %v2543_v29 }
  0x8e   : > { %1283 = vmatmul.mubr.bf16.gmra.mrb[52].mxu1 %v2544_v30  ;;  %2372 = vmatmul.mubr.bf16.gmra.mrb[52].mxu0 %v2545_v31 }
  0x8f   : > { %1290 = vmatprep.mubr.bf16.mxu1 %v2546_v32  ;;  %2375 = vmatprep.mubr.bf16.mxu0 %v2548_v33 }
  0x96   : > { %1291 = vmatmul.mubr.bf16.gmra.mrb[56].mxu1 %v2549_v34  ;;  %2376 = vmatmul.mubr.bf16.gmra.mrb[56].mxu0 %v2550_v35 }
  0x97   : > { %1298 = vmatprep.mubr.bf16.mxu1 %v2551_v36  ;;  %2379 = vmatprep.mubr.bf16.mxu0 %v2553_v37 }
  0x9e   : > { %1299 = vmatmul.mubr.bf16.gmra.mrb[60].mxu1 %v2554_v38  ;;  %2380 = vmatmul.mubr.bf16.gmra.mrb[60].mxu0 %v2555_v39 }
  0x9f   : > { %1306 = vmatprep.mubr.bf16.mxu1 %v2556_v40  ;;  %2383 = vmatprep.mubr.bf16.mxu0 %v2558_v41 }
  0xa6   : > { %1307 = vmatmul.mubr.bf16.gmra.mrb[64].mxu1 %v2559_v42  ;;  %2384 = vmatmul.mubr.bf16.gmra.mrb[64].mxu0 %v2560_v43  ;;  %v2839_v42 = vld [vmem:[%s2995_s2] ss:$0 sm:$0xff] }
  0xa7   : > { %1314 = vmatprep.mubr.bf16.mxu1 %v2561_v44  ;;  %2387 = vmatprep.mubr.bf16.mxu0 %v2563_v45 }
  0xae   : > { %1315 = vmatmul.mubr.bf16.gmra.mrb[68].mxu1 %v2564_v46  ;;  %2388 = vmatmul.mubr.bf16.gmra.mrb[68].mxu0 %v2565_v47 }
  0xaf   : > { %1322 = vmatprep.mubr.bf16.mxu1 %v2566_v48  ;;  %2391 = vmatprep.mubr.bf16.mxu0 %v2568_v49 }
  0xb6   : > { %1323 = vmatmul.mubr.bf16.gmra.mrb[72].mxu1 %v2569_v50  ;;  %2392 = vmatmul.mubr.bf16.gmra.mrb[72].mxu0 %v2570_v51 }
  0xb7   : > { %1330 = vmatprep.mubr.bf16.mxu1 %v2571_v52  ;;  %2395 = vmatprep.mubr.bf16.mxu0 %v2573_v53 }
  0xbe   : > { %1331 = vmatmul.mubr.bf16.gmra.mrb[76].mxu1 %v2574_v54  ;;  %2396 = vmatmul.mubr.bf16.gmra.mrb[76].mxu0 %v2575_v55 }
  0xf9   : > { %v2191_v56 = vpop.f32.mrb[0].mxu1  ;;  %v2119_v57 = vpop.f32.mrb[0].mxu0 }
  0xfa   : > { %v2192_v58 = vpop.f32.mrb[1].mxu1  ;;  %v2120_v59 = vpop.f32.mrb[1].mxu0 }
  0xfb   : > { %v2820_v60 = vadd.f32 %v2192_v58, %v2191_v56  ;;  %v2194_v61 = vpop.f32.mrb[2].mxu1  ;;  %v2121_v62 = vadd.f32 %v2120_v59, %v2119_v57  ;;  %v2122_v63 = vpop.f32.mrb[2].mxu0 }
  0xfc   : > { %v2195_v0 = vpop.f32.mrb[3].mxu1  ;;  %v2123_v1 = vpop.f32.mrb[3].mxu0 }
  0xfd   : > { %v2822_v2 = vadd.f32 %v2195_v0, %v2194_v61  ;;  %v2124_v3 = vadd.f32 %v2123_v1, %v2122_v63  ;;  %v1052_v45 = vadd.f32 %v2121_v62, %v2839_v42 }
  0xff   : > { %v1055_v52 = vadd.f32 %v2124_v3, %v2839_v42 }
 0x101   : > { %v2197_v4 = vpop.f32.mrb[4].mxu1  ;;  %v2125_v5 = vpop.f32.mrb[4].mxu0 }
 0x102   : > { %v2198_v6 = vpop.f32.mrb[5].mxu1  ;;  %v2126_v7 = vpop.f32.mrb[5].mxu0 }
 0x103   : > { %v2824_v8 = vadd.f32 %v2198_v6, %v2197_v4  ;;  %v2200_v9 = vpop.f32.mrb[6].mxu1  ;;  %v2127_v10 = vadd.f32 %v2126_v7, %v2125_v5  ;;  %v2128_v11 = vpop.f32.mrb[6].mxu0 }
 0x104   : > { %v2201_v12 = vpop.f32.mrb[7].mxu1  ;;  %v2129_v13 = vpop.f32.mrb[7].mxu0 }
 0x105   : > { %v2826_v14 = vadd.f32 %v2201_v12, %v2200_v9  ;;  %v2130_v15 = vadd.f32 %v2129_v13, %v2128_v11  ;;  %v1060_v62 = vadd.f32 %v2127_v10, %v2839_v42 }
 0x107   : > { %v1063_v3 = vadd.f32 %v2130_v15, %v2839_v42 }
 0x109   : > { %v2203_v16 = vpop.f32.mrb[8].mxu1  ;;  %v2131_v17 = vpop.f32.mrb[8].mxu0 }
 0x10a   : > { %v2204_v18 = vpop.f32.mrb[9].mxu1  ;;  %v2132_v19 = vpop.f32.mrb[9].mxu0 }
 0x10b   : > { %v2828_v20 = vadd.f32 %v2204_v18, %v2203_v16  ;;  %v2206_v21 = vpop.f32.mrb[10].mxu1  ;;  %v2133_v22 = vadd.f32 %v2132_v19, %v2131_v17  ;;  %v2134_v23 = vpop.f32.mrb[10].mxu0 }
 0x10c   : > { %v2207_v24 = vpop.f32.mrb[11].mxu1  ;;  %v2135_v25 = vpop.f32.mrb[11].mxu0 }
 0x10d   : > { %v2830_v26 = vadd.f32 %v2207_v24, %v2206_v21  ;;  %v2136_v27 = vadd.f32 %v2135_v25, %v2134_v23  ;;  %v1068_v10 = vadd.f32 %v2133_v22, %v2839_v42 }
 0x10f   : > { %v1071_v15 = vadd.f32 %v2136_v27, %v2839_v42 }
 0x111   : > { %v2209_v28 = vpop.f32.mrb[12].mxu1  ;;  %v2137_v29 = vpop.f32.mrb[12].mxu0 }
 0x112   : > { %v2210_v30 = vpop.f32.mrb[13].mxu1  ;;  %v2138_v31 = vpop.f32.mrb[13].mxu0 }
 0x113   : > { %v2832_v32 = vadd.f32 %v2210_v30, %v2209_v28  ;;  %v2212_v33 = vpop.f32.mrb[14].mxu1  ;;  %v2139_v34 = vadd.f32 %v2138_v31, %v2137_v29  ;;  %v2140_v35 = vpop.f32.mrb[14].mxu0 }
 0x114   : > { %v2213_v36 = vpop.f32.mrb[15].mxu1  ;;  %v2141_v37 = vpop.f32.mrb[15].mxu0 }
 0x115   : > { %v2834_v38 = vadd.f32 %v2213_v36, %v2212_v33  ;;  %v2142_v39 = vadd.f32 %v2141_v37, %v2140_v35  ;;  %v1076_v22 = vadd.f32 %v2139_v34, %v2839_v42 }
 0x117   : > { %v1079_v27 = vadd.f32 %v2142_v39, %v2839_v42 }
 0x119   : > { %v2231_v40 = vpop.f32.mrb[16].mxu1  ;;  %v2143_v41 = vpop.f32.mrb[16].mxu0 }
 0x11a   : > { %v2232_v43 = vpop.f32.mrb[17].mxu1  ;;  %v2144_v44 = vpop.f32.mrb[17].mxu0 }
 0x11b   : > { %v2233_v46 = vadd.f32 %v2232_v43, %v2231_v40  ;;  %v2234_v47 = vpop.f32.mrb[18].mxu1  ;;  %v2145_v48 = vadd.f32 %v2144_v44, %v2143_v41  ;;  %v2146_v49 = vpop.f32.mrb[18].mxu0 }
 0x11c   : > { %v2235_v50 = vpop.f32.mrb[19].mxu1  ;;  %v2147_v51 = vpop.f32.mrb[19].mxu0 }
 0x11d   : > { %v2236_v53 = vadd.f32 %v2235_v50, %v2234_v47  ;;  %v2148_v54 = vadd.f32 %v2147_v51, %v2146_v49  ;;  %v2843_v55 = vadd.f32 %v2233_v46, %v1052_v45  ;;  %v1084_v34 = vadd.f32 %v2145_v48, %v2839_v42 }
 0x11f   : > { %v2845_v56 = vadd.f32 %v2236_v53, %v1055_v52  ;;  %v1087_v39 = vadd.f32 %v2148_v54, %v2839_v42 }
 0x121   : > { %v2237_v57 = vpop.f32.mrb[20].mxu1  ;;  %v2149_v58 = vpop.f32.mrb[20].mxu0 }
 0x122   : > { %v2238_v59 = vpop.f32.mrb[21].mxu1  ;;  %v2150_v61 = vpop.f32.mrb[21].mxu0 }
 0x123   : > { %v2239_v63 = vadd.f32 %v2238_v59, %v2237_v57  ;;  %v2240_v0 = vpop.f32.mrb[22].mxu1  ;;  %v2151_v1 = vadd.f32 %v2150_v61, %v2149_v58  ;;  %v2152_v4 = vpop.f32.mrb[22].mxu0 }
 0x124   : > { %v2241_v5 = vpop.f32.mrb[23].mxu1  ;;  %v2153_v6 = vpop.f32.mrb[23].mxu0 }
 0x125   : > { %v2242_v7 = vadd.f32 %v2241_v5, %v2240_v0  ;;  %v2154_v9 = vadd.f32 %v2153_v6, %v2152_v4  ;;  %v2849_v11 = vadd.f32 %v2239_v63, %v1060_v62  ;;  %v1092_v48 = vadd.f32 %v2151_v1, %v2839_v42 }
 0x127   : > { %v2851_v12 = vadd.f32 %v2242_v7, %v1063_v3  ;;  %v1095_v54 = vadd.f32 %v2154_v9, %v2839_v42 }
 0x129   : > { %v2243_v13 = vpop.f32.mrb[24].mxu1  ;;  %v2155_v16 = vpop.f32.mrb[24].mxu0 }
 0x12a   : > { %v2244_v17 = vpop.f32.mrb[25].mxu1  ;;  %v2156_v18 = vpop.f32.mrb[25].mxu0 }
 0x12b   : > { %v2245_v19 = vadd.f32 %v2244_v17, %v2243_v13  ;;  %v2246_v21 = vpop.f32.mrb[26].mxu1  ;;  %v2157_v23 = vadd.f32 %v2156_v18, %v2155_v16  ;;  %v2158_v24 = vpop.f32.mrb[26].mxu0 }
 0x12c   : > { %v2247_v25 = vpop.f32.mrb[27].mxu1  ;;  %v2159_v28 = vpop.f32.mrb[27].mxu0 }
 0x12d   : > { %v2248_v29 = vadd.f32 %v2247_v25, %v2246_v21  ;;  %v2160_v30 = vadd.f32 %v2159_v28, %v2158_v24  ;;  %v2855_v31 = vadd.f32 %v2245_v19, %v1068_v10 }
 0x12f   : > { %v2857_v33 = vadd.f32 %v2248_v29, %v1071_v15 }
 0x131   : > { %v2249_v35 = vpop.f32.mrb[28].mxu1  ;;  %v2161_v36 = vpop.f32.mrb[28].mxu0 }
 0x132   : > { %v2250_v37 = vpop.f32.mrb[29].mxu1  ;;  %v2162_v40 = vpop.f32.mrb[29].mxu0 }
 0x133   : > { %v2251_v41 = vadd.f32 %v2250_v37, %v2249_v35  ;;  %v2252_v43 = vpop.f32.mrb[30].mxu1  ;;  %v2163_v44 = vadd.f32 %v2162_v40, %v2161_v36  ;;  %v2164_v45 = vpop.f32.mrb[30].mxu0 }
 0x134   : > { %v2253_v46 = vpop.f32.mrb[31].mxu1  ;;  %v2165_v47 = vpop.f32.mrb[31].mxu0 }
 0x135   : > { %v2254_v49 = vadd.f32 %v2253_v46, %v2252_v43  ;;  %v2166_v50 = vadd.f32 %v2165_v47, %v2164_v45  ;;  %v2861_v51 = vadd.f32 %v2251_v41, %v1076_v22  ;;  %v1100_v43 = vadd.f32 %v2157_v23, %v2839_v42 }
 0x137   : > { %v2863_v52 = vadd.f32 %v2254_v49, %v1079_v27 }
 0x139   : > { %v2255_v53 = vpop.f32.mrb[32].mxu1  ;;  %v2167_v57 = vpop.f32.mrb[32].mxu0 }
 0x13a   : > { %v2256_v58 = vpop.f32.mrb[33].mxu1  ;;  %v2168_v59 = vpop.f32.mrb[33].mxu0 }
 0x13b   : > { %v2257_v61 = vadd.f32 %v2256_v58, %v2255_v53  ;;  %v2258_v62 = vpop.f32.mrb[34].mxu1  ;;  %v2866_v63 = vadd.f32 %v2168_v59, %v2167_v57  ;;  %v2170_v0 = vpop.f32.mrb[34].mxu0  ;;  %v1103_v53 = vadd.f32 %v2160_v30, %v2839_v42 }
 0x13c   : > { %v2259_v4 = vpop.f32.mrb[35].mxu1  ;;  %v2171_v5 = vpop.f32.mrb[35].mxu0 }
 0x13d   : > { %v2260_v6 = vadd.f32 %v2259_v4, %v2258_v62  ;;  %v2172_v3 = vadd.f32 %v2171_v5, %v2170_v0  ;;  %v2869_v7 = vadd.f32 %v2257_v61, %v1084_v34  ;;  %v1108_v4 = vadd.f32 %v2163_v44, %v2839_v42 }
 0x13f   : > { %v2871_v13 = vadd.f32 %v2260_v6, %v1087_v39 }
 0x141   : > { %v2261_v16 = vpop.f32.mrb[36].mxu1  ;;  %v2173_v17 = vpop.f32.mrb[36].mxu0 }
 0x142   : > { %v2262_v18 = vpop.f32.mrb[37].mxu1  ;;  %v2174_v10 = vpop.f32.mrb[37].mxu0 }
 0x143   : > { %v2263_v19 = vadd.f32 %v2262_v18, %v2261_v16  ;;  %v2264_v21 = vpop.f32.mrb[38].mxu1  ;;  %v2874_v24 = vadd.f32 %v2174_v10, %v2173_v17  ;;  %v2176_v25 = vpop.f32.mrb[38].mxu0  ;;  %v1111_v18 = vadd.f32 %v2166_v50, %v2839_v42  ;;  %v1116_v50 = vadd.f32 %v2866_v63, %v2839_v42 }
 0x144   : > { %v2265_v28 = vpop.f32.mrb[39].mxu1  ;;  %v2177_v15 = vpop.f32.mrb[39].mxu0 }
 0x145   : > { %v2266_v29 = vadd.f32 %v2265_v28, %v2264_v21  ;;  %v2877_v35 = vadd.f32 %v2177_v15, %v2176_v25  ;;  %v2879_v36 = vadd.f32 %v2263_v19, %v1092_v48 }
 0x147   : > { %v2881_v37 = vadd.f32 %v2266_v29, %v1095_v54 }
 0x149   : > { %v2267_v40 = vpop.f32.mrb[40].mxu1  ;;  %v2179_v22 = vpop.f32.mrb[40].mxu0 }
 0x14a   : > { %v2268_v41 = vpop.f32.mrb[41].mxu1  ;;  %v2180_v1 = vpop.f32.mrb[41].mxu0 }
 0x14b   : > { %v2269_v45 = vadd.f32 %v2268_v41, %v2267_v40  ;;  %v2270_v46 = vpop.f32.mrb[42].mxu1  ;;  %v2884_v47 = vadd.f32 %v2180_v1, %v2179_v22  ;;  %v2182_v27 = vpop.f32.mrb[42].mxu0  ;;  %v1119_v1 = vadd.f32 %v2172_v3, %v2839_v42 }
 0x14c   : > { %v2271_v49 = vpop.f32.mrb[43].mxu1  ;;  %v2183_v9 = vpop.f32.mrb[43].mxu0 }
 0x14d   : > { %v2272_v57 = vadd.f32 %v2271_v49, %v2270_v46  ;;  %v2887_v58 = vadd.f32 %v2183_v9, %v2182_v27  ;;  %v2889_v59 = vadd.f32 %v2269_v45, %v1100_v43 }
 0x14f   : > { %v2891_v34 = vadd.f32 %v2272_v57, %v1103_v53 }
 0x151   : > { %v2273_v61 = vpop.f32.mrb[44].mxu1  ;;  %v2185_v62 = vpop.f32.mrb[44].mxu0 }
 0x152   : > { %v2274_v0 = vpop.f32.mrb[45].mxu1  ;;  %v2186_v23 = vpop.f32.mrb[45].mxu0 }
 0x153   : > { %v2275_v5 = vadd.f32 %v2274_v0, %v2273_v61  ;;  %v2276_v39 = vpop.f32.mrb[46].mxu1  ;;  %v2894_v6 = vadd.f32 %v2186_v23, %v2185_v62  ;;  %v2188_v16 = vpop.f32.mrb[46].mxu0 }
 0x154   : > { %v2277_v17 = vpop.f32.mrb[47].mxu1  ;;  %v2189_v30 = vpop.f32.mrb[47].mxu0 }
 0x155   : > { %v2278_v10 = vadd.f32 %v2277_v17, %v2276_v39  ;;  %v2897_v48 = vadd.f32 %v2189_v30, %v2188_v16  ;;  %v2899_v19 = vadd.f32 %v2275_v5, %v1108_v4 }
 0x157   : > { %v2901_v21 = vadd.f32 %v2278_v10, %v1111_v18 }
 0x159   : > { %v2279_v25 = vpop.f32.mrb[48].mxu1  ;;  %v2369_v28 = vpop.f32.mrb[48].mxu0 }
 0x15a   : > { %v1382_v44 = vadd.f32 %v2369_v28, %v2849_v11  ;;  %v2280_v15 = vpop.f32.mrb[49].mxu1  ;;  %v1373_v54 = vpop.f32.mrb[49].mxu0  ;;  %v1127_v28 = vadd.f32 %v2877_v35, %v2839_v42 }
 0x15b   : > { %v2281_v29 = vadd.f32 %v2280_v15, %v2279_v25  ;;  %v1374_v40 = vadd.f32 %v1373_v54, %v2843_v55  ;;  %v2282_v22 = vpop.f32.mrb[50].mxu1  ;;  %v2370_v41 = vpop.f32.mrb[50].mxu0  ;;  %v1124_v25 = vadd.f32 %v2874_v24, %v2839_v42 }
 0x15c   : > { %v1534_v43 = vmul.f32 0.1, %v1382_v44  ;;  %v1385_v45 = vadd.f32 %v2370_v41, %v2851_v12  ;;  %v2283_v46 = vpop.f32.mrb[51].mxu1  ;;  %v1376_v27 = vpop.f32.mrb[51].mxu0  ;;  %vm1502_vm0 = vcmp.gt.f32.partialorder %v1382_v44, 0.0 }
 0x15d   : > { %v1532_v49 = vmul.f32 0.1, %v1374_v40  ;;  %v2284_v11 = vadd.f32 %v2283_v46, %v2282_v22  ;;  %v1377_v9 = vadd.f32 %v1376_v27, %v2845_v56  ;;  %vm1500_vm1 = vcmp.gt.f32.partialorder %v1374_v40, 0.0 }
 0x15e   : > { %vm1503_vm2 = vcmp.gt.f32.partialorder %v1385_v45, 0.0  ;;  %v1535_v55 = vmul.f32 0.1, %v1385_v45  ;;  %v2911_v53 = vadd.f32 %v2281_v29, %v1116_v50  ;;  %v1566_v3 = vsel %vm1502_vm0, %v1382_v44, %v1534_v43 }
 0x15f   : > { %vm1501_vm3 = vcmp.gt.f32.partialorder %v1377_v9, 0.0  ;;  %v1533_v63 = vmul.f32 0.1, %v1377_v9  ;;  %v2913_v57 = vadd.f32 %v2284_v11, %v1119_v1  ;;  %v1564_v61 = vsel %vm1500_vm1, %v1374_v40, %v1532_v49 }
 0x160   : > { %v1567_v12 = vsel %vm1503_vm2, %v1385_v45, %v1535_v55 }
 0x161   : > { %v2016_v56 = vpack.c.bf16 %v1567_v12, %v1566_v3  ;;  %v1565_v62 = vsel %vm1501_vm3, %v1377_v9, %v1533_v63  ;;  %v2285_v0 = vpop.f32.mrb[52].mxu1  ;;  %v2373_v23 = vpop.f32.mrb[52].mxu0 }
 0x162   : > { %v2011_v4 = vpack.c.bf16 %v1565_v62, %v1564_v61  ;;  %v1398_v5 = vadd.f32 %v2373_v23, %v2861_v51  ;;  %v2286_v39 = vpop.f32.mrb[53].mxu1  ;;  %v1389_v16 = vpop.f32.mrb[53].mxu0  ;;  %v1132_v61 = vadd.f32 %v2884_v47, %v2839_v42 }
 0x163   : > { %2088 = vst [vmem:[%s2918_s30 + $0x8] sm:$0xff] %v2016_v56   ;;  %v2287_v17 = vadd.f32 %v2286_v39, %v2285_v0  ;;  %v1390_v30 = vadd.f32 %v1389_v16, %v2855_v31  ;;  %v2288_v18 = vpop.f32.mrb[54].mxu1  ;;  %v2374_v10 = vpop.f32.mrb[54].mxu0  ;;  %v1135_v56 = vadd.f32 %v2887_v58, %v2839_v42 }
 0x164   : > { %2012 = vst [vmem:[%s2918_s30] sm:$0xff] %v2011_v4   ;;  %v1538_v44 = vmul.f32 0.1, %v1398_v5  ;;  %v1401_v15 = vadd.f32 %v2374_v10, %v2863_v52  ;;  %v2289_v54 = vpop.f32.mrb[55].mxu1  ;;  %v1392_v51 = vpop.f32.mrb[55].mxu0  ;;  %vm1506_vm4 = vcmp.gt.f32.partialorder %v1398_v5, 0.0 }
 0x165   : > { %v1536_v29 = vmul.f32 0.1, %v1390_v30  ;;  %v2290_v40 = vadd.f32 %v2289_v54, %v2288_v18  ;;  %v1393_v22 = vadd.f32 %v1392_v51, %v2857_v33  ;;  %vm1504_vm5 = vcmp.gt.f32.partialorder %v1390_v30, 0.0 }
 0x166   : > { %vm1507_vm6 = vcmp.gt.f32.partialorder %v1401_v15, 0.0  ;;  %v1539_v31 = vmul.f32 0.1, %v1401_v15  ;;  %v2930_v41 = vadd.f32 %v2287_v17, %v1124_v25  ;;  %v1570_v50 = vsel %vm1506_vm4, %v1398_v5, %v1538_v44 }
 0x167   : > { %vm1505_vm7 = vcmp.gt.f32.partialorder %v1393_v22, 0.0  ;;  %v1537_v24 = vmul.f32 0.1, %v1393_v22  ;;  %v2932_v35 = vadd.f32 %v2290_v40, %v1127_v28  ;;  %v1568_v52 = vsel %vm1504_vm5, %v1390_v30, %v1536_v29 }
 0x168   : > { %v1571_v1 = vsel %vm1507_vm6, %v1401_v15, %v1539_v31  ;;  %v1140_v31 = vadd.f32 %v2894_v6, %v2839_v42 }
 0x169   : > { %v2026_v43 = vpack.c.bf16 %v1571_v1, %v1570_v50  ;;  %v1569_v45 = vsel %vm1505_vm7, %v1393_v22, %v1537_v24  ;;  %v2291_v46 = vpop.f32.mrb[56].mxu1  ;;  %v2377_v27 = vpop.f32.mrb[56].mxu0  ;;  %v1143_v24 = vadd.f32 %v2897_v48, %v2839_v42 }
 0x16a   : > { %v2021_v49 = vpack.c.bf16 %v1569_v45, %v1568_v52  ;;  %v1414_v33 = vadd.f32 %v2377_v27, %v2879_v36  ;;  %v2292_v11 = vpop.f32.mrb[57].mxu1  ;;  %v1405_v9 = vpop.f32.mrb[57].mxu0 }
 0x16b   : > { %2090 = vst [vmem:[%s2918_s30 + $0x18] sm:$0xff] %v2026_v43   ;;  %v2293_v55 = vadd.f32 %v2292_v11, %v2291_v46  ;;  %v1406_v63 = vadd.f32 %v1405_v9, %v2869_v7  ;;  %v2294_v3 = vpop.f32.mrb[58].mxu1  ;;  %v2378_v12 = vpop.f32.mrb[58].mxu0 }
 0x16c   : > { %2089 = vst [vmem:[%s2918_s30 + $0x10] sm:$0xff] %v2021_v49   ;;  %v1542_v62 = vmul.f32 0.1, %v1414_v33  ;;  %v1417_v0 = vadd.f32 %v2378_v12, %v2881_v37  ;;  %v2295_v23 = vpop.f32.mrb[59].mxu1  ;;  %v1408_v36 = vpop.f32.mrb[59].mxu0  ;;  %vm1510_vm8 = vcmp.gt.f32.partialorder %v1414_v33, 0.0 }
 0x16d   : > { %v1540_v4 = vmul.f32 0.1, %v1406_v63  ;;  %v2296_v5 = vadd.f32 %v2295_v23, %v2294_v3  ;;  %v1409_v39 = vadd.f32 %v1408_v36, %v2871_v13  ;;  %vm1508_vm9 = vcmp.gt.f32.partialorder %v1406_v63, 0.0 }
 0x16e   : > { %vm1511_vm10 = vcmp.gt.f32.partialorder %v1417_v0, 0.0  ;;  %v1543_v7 = vmul.f32 0.1, %v1417_v0  ;;  %v2944_v16 = vadd.f32 %v2293_v55, %v1132_v61  ;;  %v1574_v17 = vsel %vm1510_vm8, %v1414_v33, %v1542_v62 }
 0x16f   : > { %vm1509_vm11 = vcmp.gt.f32.partialorder %v1409_v39, 0.0  ;;  %v1541_v47 = vmul.f32 0.1, %v1409_v39  ;;  %v2946_v58 = vadd.f32 %v2296_v5, %v1135_v56  ;;  %v1572_v37 = vsel %vm1508_vm9, %v1406_v63, %v1540_v4 }
 0x170   : > { %v1575_v30 = vsel %vm1511_vm10, %v1417_v0, %v1543_v7  ;;  %v1148_v36 = vadd.f32 %v2820_v60, %v2839_v42  ;;  %v1151_v4 = vadd.f32 %v2822_v2, %v2839_v42 }
 0x171   : > { %v2036_v18 = vpack.c.bf16 %v1575_v30, %v1574_v17  ;;  %v1573_v10 = vsel %vm1509_vm11, %v1409_v39, %v1541_v47  ;;  %v2297_v25 = vpop.f32.mrb[60].mxu1  ;;  %v2381_v28 = vpop.f32.mrb[60].mxu0 }
 0x172   : > { %v2031_v44 = vpack.c.bf16 %v1573_v10, %v1572_v37  ;;  %v1430_v13 = vadd.f32 %v2381_v28, %v2899_v19  ;;  %v2298_v15 = vpop.f32.mrb[61].mxu1  ;;  %v1421_v54 = vpop.f32.mrb[61].mxu0 }
 0x173   : > { %2092 = vst [vmem:[%s2918_s30 + $0x28] sm:$0xff] %v2036_v18   ;;  %v2299_v51 = vadd.f32 %v2298_v15, %v2297_v25  ;;  %v1422_v29 = vadd.f32 %v1421_v54, %v2889_v59  ;;  %v2300_v40 = vpop.f32.mrb[62].mxu1  ;;  %v2382_v22 = vpop.f32.mrb[62].mxu0 }
 0x174   : > { %2091 = vst [vmem:[%s2918_s30 + $0x20] sm:$0xff] %v2031_v44   ;;  %v1546_v50 = vmul.f32 0.1, %v1430_v13  ;;  %v1433_v1 = vadd.f32 %v2382_v22, %v2901_v21  ;;  %v2301_v52 = vpop.f32.mrb[63].mxu1  ;;  %v1424_v19 = vpop.f32.mrb[63].mxu0  ;;  %vm1514_vm12 = vcmp.gt.f32.partialorder %v1430_v13, 0.0 }
 0x175   : > { %v1544_v43 = vmul.f32 0.1, %v1422_v29  ;;  %v2302_v45 = vadd.f32 %v2301_v52, %v2300_v40  ;;  %v1425_v46 = vadd.f32 %v1424_v19, %v2891_v34  ;;  %vm1512_vm13 = vcmp.gt.f32.partialorder %v1422_v29, 0.0 }
 0x176   : > { %vm1515_vm14 = vcmp.gt.f32.partialorder %v1433_v1, 0.0  ;;  %v1547_v59 = vmul.f32 0.1, %v1433_v1  ;;  %v1301_v27 = vadd.f32 %v2299_v51, %v1140_v31  ;;  %v1578_v48 = vsel %vm1514_vm12, %v1430_v13, %v1546_v50 }
 0x177   : > { %vm1513_vm15 = vcmp.gt.f32.partialorder %v1425_v46, 0.0  ;;  %v1545_v6 = vmul.f32 0.1, %v1425_v46  ;;  %v1304_v49 = vadd.f32 %v2302_v45, %v1143_v24  ;;  %v1576_v11 = vsel %vm1512_vm13, %v1422_v29, %v1544_v43 }
 0x178   : > { %v1579_v33 = vsel %vm1515_vm14, %v1433_v1, %v1547_v59  ;;  %v1156_v24 = vadd.f32 %v2824_v8, %v2839_v42  ;;  %v1159_v50 = vadd.f32 %v2826_v14, %v2839_v42 }
 0x179   : > { %v2046_v21 = vpack.c.bf16 %v1579_v33, %v1578_v48  ;;  %v1577_v9 = vsel %vm1513_vm15, %v1425_v46, %v1545_v6  ;;  %v2303_v55 = vpop.f32.mrb[64].mxu1  ;;  %v2385_v63 = vpop.f32.mrb[64].mxu0 }
 0x17a   : > { %v2041_v3 = vpack.c.bf16 %v1577_v9, %v1576_v11  ;;  %v1446_v12 = vadd.f32 %v2385_v63, %v2930_v41  ;;  %v2304_v34 = vpop.f32.mrb[65].mxu1  ;;  %v1437_v61 = vpop.f32.mrb[65].mxu0 }
 0x17b   : > { %2094 = vst [vmem:[%s2918_s30 + $0x38] sm:$0xff] %v2046_v21   ;;  %v2305_v56 = vadd.f32 %v2304_v34, %v2303_v55  ;;  %v1438_v62 = vadd.f32 %v1437_v61, %v2911_v53  ;;  %v2306_v0 = vpop.f32.mrb[66].mxu1  ;;  %v2386_v23 = vpop.f32.mrb[66].mxu0 }
 0x17c   : > { %2093 = vst [vmem:[%s2918_s30 + $0x30] sm:$0xff] %v2041_v3   ;;  %v1550_v5 = vmul.f32 0.1, %v1446_v12  ;;  %v1449_v39 = vadd.f32 %v2386_v23, %v2932_v35  ;;  %v2307_v7 = vpop.f32.mrb[67].mxu1  ;;  %v1440_v41 = vpop.f32.mrb[67].mxu0  ;;  %vm1518_vm0 = vcmp.gt.f32.partialorder %v1446_v12, 0.0 }
 0x17d   : > { %v1548_v47 = vmul.f32 0.1, %v1438_v62  ;;  %v2308_v17 = vadd.f32 %v2307_v7, %v2306_v0  ;;  %v1441_v30 = vadd.f32 %v1440_v41, %v2913_v57  ;;  %vm1516_vm1 = vcmp.gt.f32.partialorder %v1438_v62, 0.0 }
 0x17e   : > { %vm1519_vm2 = vcmp.gt.f32.partialorder %v1449_v39, 0.0  ;;  %v1551_v53 = vmul.f32 0.1, %v1449_v39  ;;  %v1309_v37 = vadd.f32 %v2305_v56, %v1148_v36  ;;  %v1582_v2 = vsel %vm1518_vm0, %v1446_v12, %v1550_v5 }
 0x17f   : > { %vm1517_vm3 = vcmp.gt.f32.partialorder %v1441_v30, 0.0  ;;  %v1549_v60 = vmul.f32 0.1, %v1441_v30  ;;  %v1312_v18 = vadd.f32 %v2308_v17, %v1151_v4  ;;  %v1580_v25 = vsel %vm1516_vm1, %v1438_v62, %v1548_v47 }
 0x180   : > { %v1583_v10 = vsel %vm1519_vm2, %v1449_v39, %v1551_v53  ;;  %v1164_v62 = vadd.f32 %v2828_v20, %v2839_v42  ;;  %v1167_v0 = vadd.f32 %v2830_v26, %v2839_v42 }
 0x181   : > { %v2056_v35 = vpack.c.bf16 %v1583_v10, %v1582_v2  ;;  %v1581_v28 = vsel %vm1517_vm3, %v1441_v30, %v1549_v60  ;;  %v2309_v44 = vpop.f32.mrb[68].mxu1  ;;  %v2389_v13 = vpop.f32.mrb[68].mxu0 }
 0x182   : > { %v2051_v15 = vpack.c.bf16 %v1581_v28, %v1580_v25  ;;  %v1462_v54 = vadd.f32 %v2389_v13, %v1301_v27  ;;  %v2310_v51 = vpop.f32.mrb[69].mxu1  ;;  %v1453_v57 = vpop.f32.mrb[69].mxu0 }
 0x183   : > { %2096 = vst [vmem:[%s2918_s30 + $0x48] sm:$0xff] %v2056_v35   ;;  %v2311_v29 = vadd.f32 %v2310_v51, %v2309_v44  ;;  %v1454_v40 = vadd.f32 %v1453_v57, %v2944_v16  ;;  %v2312_v22 = vpop.f32.mrb[70].mxu1  ;;  %v2390_v31 = vpop.f32.mrb[70].mxu0 }
 0x184   : > { %2095 = vst [vmem:[%s2918_s30 + $0x40] sm:$0xff] %v2051_v15   ;;  %v1554_v1 = vmul.f32 0.1, %v1462_v54  ;;  %v1465_v52 = vadd.f32 %v2390_v31, %v1304_v49  ;;  %v2313_v19 = vpop.f32.mrb[71].mxu1  ;;  %v1456_v43 = vpop.f32.mrb[71].mxu0  ;;  %vm1522_vm4 = vcmp.gt.f32.partialorder %v1462_v54, 0.0 }
 0x185   : > { %v1552_v45 = vmul.f32 0.1, %v1454_v40  ;;  %v2314_v46 = vadd.f32 %v2313_v19, %v2312_v22  ;;  %v1457_v59 = vadd.f32 %v1456_v43, %v2946_v58  ;;  %vm1520_vm5 = vcmp.gt.f32.partialorder %v1454_v40, 0.0 }
 0x186   : > { %vm1523_vm6 = vcmp.gt.f32.partialorder %v1465_v52, 0.0  ;;  %v1555_v16 = vmul.f32 0.1, %v1465_v52  ;;  %v1317_v27 = vadd.f32 %v2311_v29, %v1156_v24  ;;  %v1586_v48 = vsel %vm1522_vm4, %v1462_v54, %v1554_v1 }
 0x187   : > { %vm1521_vm7 = vcmp.gt.f32.partialorder %v1457_v59, 0.0  ;;  %v1553_v8 = vmul.f32 0.1, %v1457_v59  ;;  %v1320_v6 = vadd.f32 %v2314_v46, %v1159_v50  ;;  %v1584_v33 = vsel %vm1520_vm5, %v1454_v40, %v1552_v45 }
 0x188   : > { %v1587_v14 = vsel %vm1523_vm6, %v1465_v52, %v1555_v16  ;;  %v1175_v40 = vadd.f32 %v2834_v38, %v2839_v42 }
 0x189   : > { %v2066_v49 = vpack.c.bf16 %v1587_v14, %v1586_v48  ;;  %v1585_v11 = vsel %vm1521_vm7, %v1457_v59, %v1553_v8  ;;  %v2315_v21 = vpop.f32.mrb[72].mxu1  ;;  %v2393_v9 = vpop.f32.mrb[72].mxu0 }
 0x18a   : > { %v2061_v55 = vpack.c.bf16 %v1585_v11, %v1584_v33  ;;  %v1478_v63 = vadd.f32 %v2393_v9, %v1317_v27  ;;  %v2316_v3 = vpop.f32.mrb[73].mxu1  ;;  %v1469_v58 = vpop.f32.mrb[73].mxu0 }
 0x18b   : > { %2098 = vst [vmem:[%s2918_s30 + $0x58] sm:$0xff] %v2066_v49   ;;  %v2317_v12 = vadd.f32 %v2316_v3, %v2315_v21  ;;  %v1470_v34 = vadd.f32 %v1469_v58, %v1309_v37  ;;  %v2318_v61 = vpop.f32.mrb[74].mxu1  ;;  %v2394_v56 = vpop.f32.mrb[74].mxu0 }
 0x18c   : > { %2097 = vst [vmem:[%s2918_s30 + $0x50] sm:$0xff] %v2061_v55   ;;  %v1558_v23 = vmul.f32 0.1, %v1478_v63  ;;  %v1481_v36 = vadd.f32 %v2394_v56, %v1320_v6  ;;  %v2319_v4 = vpop.f32.mrb[75].mxu1  ;;  %v1472_v5 = vpop.f32.mrb[75].mxu0  ;;  %vm1526_vm8 = vcmp.gt.f32.partialorder %v1478_v63, 0.0 }
 0x18d   : > { %v1556_v39 = vmul.f32 0.1, %v1470_v34  ;;  %v2320_v7 = vadd.f32 %v2319_v4, %v2318_v61  ;;  %v1473_v41 = vadd.f32 %v1472_v5, %v1312_v18  ;;  %vm1524_vm9 = vcmp.gt.f32.partialorder %v1470_v34, 0.0 }
 0x18e   : > { %vm1527_vm10 = vcmp.gt.f32.partialorder %v1481_v36, 0.0  ;;  %v1559_v47 = vmul.f32 0.1, %v1481_v36  ;;  %v1325_v17 = vadd.f32 %v2317_v12, %v1164_v62  ;;  %v1590_v53 = vsel %vm1526_vm8, %v1478_v63, %v1558_v23 }
 0x18f   : > { %vm1525_vm11 = vcmp.gt.f32.partialorder %v1473_v41, 0.0  ;;  %v1557_v30 = vmul.f32 0.1, %v1473_v41  ;;  %v1328_v20 = vadd.f32 %v2320_v7, %v1167_v0  ;;  %v1588_v37 = vsel %vm1524_vm9, %v1470_v34, %v1556_v39 }
 0x190   : > { %v1591_v26 = vsel %vm1527_vm10, %v1481_v36, %v1559_v47  ;;  %v1172_v18 = vadd.f32 %v2832_v32, %v2839_v42 }
 0x191   : > { %v2076_v60 = vpack.c.bf16 %v1591_v26, %v1590_v53  ;;  %v1589_v2 = vsel %vm1525_vm11, %v1473_v41, %v1557_v30  ;;  %v2321_v10 = vpop.f32.mrb[76].mxu1  ;;  %v2397_v25 = vpop.f32.mrb[76].mxu0 }
 0x192   : > { %v2071_v35 = vpack.c.bf16 %v1589_v2, %v1588_v37  ;;  %v2322_v28 = vpop.f32.mrb[77].mxu1  ;;  %v1485_v44 = vpop.f32.mrb[77].mxu0 }
 0x193   : > { %2100 = vst [vmem:[%s2918_s30 + $0x68] sm:$0xff] %v2076_v60   ;;  %v2323_v13 = vadd.f32 %v2322_v28, %v2321_v10  ;;  %v1486_v15 = vadd.f32 %v1485_v44, %v1325_v17  ;;  %v2324_v54 = vpop.f32.mrb[78].mxu1  ;;  %v2398_v51 = vpop.f32.mrb[78].mxu0 }
 0x194   : > { %2099 = vst [vmem:[%s2918_s30 + $0x60] sm:$0xff] %v2071_v35   ;;  %v2325_v57 = vpop.f32.mrb[79].mxu1  ;;  %v1488_v29 = vpop.f32.mrb[79].mxu0 }
 0x195   : > { %v1333_v22 = vadd.f32 %v2323_v13, %v1172_v18  ;;  %v2326_v31 = vadd.f32 %v2325_v57, %v2324_v54  ;;  %v1560_v24 = vmul.f32 0.1, %v1486_v15  ;;  %v1489_v50 = vadd.f32 %v1488_v29, %v1328_v20 }
 0x196   : > { %vm1528_vm12 = vcmp.gt.f32.partialorder %v1486_v15, 0.0 }
 0x197   : > { %v1494_v1 = vadd.f32 %v2397_v25, %v1333_v22  ;;  %v1336_v32 = vadd.f32 %v2326_v31, %v1175_v40  ;;  %vm1529_vm13 = vcmp.gt.f32.partialorder %v1489_v50, 0.0  ;;  %v1561_v52 = vmul.f32 0.1, %v1489_v50 }
 0x198   : > { %v1592_v45 = vsel %vm1528_vm12, %v1486_v15, %v1560_v24 }
 0x199   : > { %v1562_v19 = vmul.f32 0.1, %v1494_v1  ;;  %v1497_v43 = vadd.f32 %v2398_v51, %v1336_v32  ;;  %vm1530_vm14 = vcmp.gt.f32.partialorder %v1494_v1, 0.0  ;;  %v1593_v46 = vsel %vm1529_vm13, %v1489_v50, %v1561_v52 }
 0x19a   : > { %v2081_v16 = vpack.c.bf16 %v1593_v46, %v1592_v45 }
 0x19b   : > { %vm1531_vm15 = vcmp.gt.f32.partialorder %v1497_v43, 0.0  ;;  %v1563_v59 = vmul.f32 0.1, %v1497_v43  ;;  %v1594_v38 = vsel %vm1530_vm14, %v1494_v1, %v1562_v19 }
 0x19c   : > { %2101 = vst [vmem:[%s2918_s30 + $0x70] sm:$0xff] %v2081_v16  }
 0x19d   : > { %v1595_v42 = vsel %vm1531_vm15, %v1497_v43, %v1563_v59 }
 0x19e   : > { %v2086_v27 = vpack.c.bf16 %v1595_v42, %v1594_v38 }
 0x1a0   : > { %2102 = vst [vmem:[%s2918_s30 + $0x78] sm:$0xff] %v2086_v27  }
 0x1a1 PF: > { %s13_s12 = sadd.s32 1, %s2582_s12  }
 0x1a2   : > { %p10_p4 = scmp.ge.s32.totalorder %s13_s12, 4  }
 0x1a4   :  { %12 = sbr.rel (!%p10_p4) target bundleno = 1 (0x1), region = 62 }

// kernel: flownets_forward.14
= control target key start
LH: loop header
LB: loop body
LE: loop exit
PB: predicated region body
PF: predicated region fallthrough
CT: control target
= control target key end

     0   :  { %s1405_s1 = inlined_call_operand.vmem [shape: bf16[512,128], index: 1, kind: input, shape index: {}]   ;;  %s1406_s0 = inlined_call_operand.vmem [shape: bf16[128,512], index: 0, kind: input, shape index: {}]   ;;  %s1407_s2 = inlined_call_operand.vmem [shape: f32[1,128], index: 2, kind: input, shape index: {}]   ;;  %s1408_s3 = inlined_call_operand.vmem [shape: bf16[128,128], index: 3, kind: output, shape index: {}]  }
   0x1   :  { %v1068_v0 = vld [vmem:[%s1405_s1 + $0x40] sm:$0xff]   ;;  %v1072_v4 = vld [vmem:[%s1405_s1 + $0x48] sm:$0xff]   ;;  %v1076_v8 = vld [vmem:[%s1405_s1 + $0x50] sm:$0xff]  }
   0x2   :  { %v1069_v1 = vld [vmem:[%s1405_s1 + $0xc0] sm:$0xff]   ;;  %940 = vmatprep.subr.bf16.mxu0 %v1068_v0  ;;  %v1073_v5 = vld [vmem:[%s1405_s1 + $0xc8] sm:$0xff]   ;;  %v1077_v9 = vld [vmem:[%s1405_s1 + $0xd0] sm:$0xff]  }
   0x3   :  { %v1070_v2 = vld [vmem:[%s1405_s1] sm:$0xff]   ;;  %1004 = vmatprep.subr.bf16.mxu1 %v1069_v1  ;;  %v1074_v6 = vld [vmem:[%s1405_s1 + $0x8] sm:$0xff]   ;;  %v1078_v10 = vld [vmem:[%s1405_s1 + $0x10] sm:$0xff]  }
   0x4   :  { %v1071_v3 = vld [vmem:[%s1405_s1 + $0x80] sm:$0xff]   ;;  %941 = vmatpush3.bf16.msra.mxu0 %v1070_v2  ;;  %v1075_v7 = vld [vmem:[%s1405_s1 + $0x88] sm:$0xff]   ;;  %v1079_v11 = vld [vmem:[%s1405_s1 + $0x90] sm:$0xff]  }
   0x5   :  { %1005 = vmatpush3.bf16.msra.mxu1 %v1071_v3  ;;  %942 = vmatprep.subr.bf16.mxu0 %v1072_v4  ;;  %v1080_v12 = vld [vmem:[%s1405_s1 + $0x58] sm:$0xff]   ;;  %v1084_v16 = vld [vmem:[%s1405_s1 + $0x60] sm:$0xff]   ;;  %v1088_v20 = vld [vmem:[%s1405_s1 + $0x68] sm:$0xff]  }
   0x6   :  { %1006 = vmatprep.subr.bf16.mxu1 %v1073_v5  ;;  %v1081_v13 = vld [vmem:[%s1405_s1 + $0xd8] sm:$0xff]   ;;  %v1085_v17 = vld [vmem:[%s1405_s1 + $0xe0] sm:$0xff]   ;;  %v1089_v21 = vld [vmem:[%s1405_s1 + $0xe8] sm:$0xff]  }
   0x7   :  { %v1082_v14 = vld [vmem:[%s1405_s1 + $0x18] sm:$0xff]   ;;  %v1086_v18 = vld [vmem:[%s1405_s1 + $0x20] sm:$0xff]   ;;  %v1090_v22 = vld [vmem:[%s1405_s1 + $0x28] sm:$0xff]  }
   0x8   :  { %943 = vmatpush3.bf16.msra.mxu0 %v1074_v6  ;;  %v1083_v15 = vld [vmem:[%s1405_s1 + $0x98] sm:$0xff]   ;;  %v1087_v19 = vld [vmem:[%s1405_s1 + $0xa0] sm:$0xff]   ;;  %v1091_v23 = vld [vmem:[%s1405_s1 + $0xa8] sm:$0xff]  }
   0x9   :  { %1007 = vmatpush3.bf16.msra.mxu1 %v1075_v7  ;;  %944 = vmatprep.subr.bf16.mxu0 %v1076_v8  ;;  %v1092_v24 = vld [vmem:[%s1405_s1 + $0x70] sm:$0xff]   ;;  %v1096_v28 = vld [vmem:[%s1405_s1 + $0x78] sm:$0xff]   ;;  %v1363_v2 = vld [vmem:[%s1407_s2] ss:$0 sm:$0xff] }
   0xa   :  { %1008 = vmatprep.subr.bf16.mxu1 %v1077_v9  ;;  %v1093_v25 = vld [vmem:[%s1405_s1 + $0xf0] sm:$0xff]   ;;  %v1097_v29 = vld [vmem:[%s1405_s1 + $0xf8] sm:$0xff]  }
   0xb   :  { %v1094_v26 = vld [vmem:[%s1405_s1 + $0x30] sm:$0xff]   ;;  %v1098_v30 = vld [vmem:[%s1405_s1 + $0x38] sm:$0xff]  }
   0xc   :  { %945 = vmatpush3.bf16.msra.mxu0 %v1078_v10  ;;  %v1095_v27 = vld [vmem:[%s1405_s1 + $0xb0] sm:$0xff]   ;;  %v1099_v31 = vld [vmem:[%s1405_s1 + $0xb8] sm:$0xff]  }
   0xd   :  { %1009 = vmatpush3.bf16.msra.mxu1 %v1079_v11  ;;  %946 = vmatprep.subr.bf16.mxu0 %v1080_v12  ;;  %v1100_v32 = vld [vmem:[%s1406_s0] ss:$16 sps:$4 sm:$0xff]   ;;  %v1102_v33 = vld [vmem:[%s1406_s0 + $0x4] ss:$16 sps:$4 sm:$0xff]   ;;  %v1103_v34 = vld [vmem:[%s1406_s0 + $0x8] ss:$16 sps:$4 sm:$0xff]  }
   0xe   :  { %1010 = vmatprep.subr.bf16.mxu1 %v1081_v13  ;;  %v1105_v35 = vld [vmem:[%s1406_s0 + $0xc] ss:$16 sps:$4 sm:$0xff]   ;;  %502 = vmatprep.mubr.bf16.mxu0 %v1102_v33  ;;  %v1106_v36 = vld [vmem:[%s1406_s0 + $0x24] ss:$16 sps:$4 sm:$0xff]   ;;  %v1110_v38 = vld [vmem:[%s1406_s0 + $0x20] ss:$16 sps:$4 sm:$0xff]  }
   0xf   :  { %599 = vmatprep.mubr.bf16.mxu1 %v1105_v35  ;;  %v1108_v37 = vld [vmem:[%s1406_s0 + $0x2c] ss:$16 sps:$4 sm:$0xff]   ;;  %v1111_v39 = vld [vmem:[%s1406_s0 + $0x28] ss:$16 sps:$4 sm:$0xff]   ;;  %v1112_v40 = vld [vmem:[%s1406_s0 + $0x44] ss:$16 sps:$4 sm:$0xff]  }
  0x10   :  { %947 = vmatpush3.bf16.msra.mxu0 %v1082_v14  ;;  %v1114_v41 = vld [vmem:[%s1406_s0 + $0x4c] ss:$16 sps:$4 sm:$0xff]   ;;  %v1116_v42 = vld [vmem:[%s1406_s0 + $0x40] ss:$16 sps:$4 sm:$0xff]   ;;  %v1117_v43 = vld [vmem:[%s1406_s0 + $0x48] ss:$16 sps:$4 sm:$0xff]  }
  0x11   :  { %1011 = vmatpush3.bf16.msra.mxu1 %v1083_v15  ;;  %948 = vmatprep.subr.bf16.mxu0 %v1084_v16  ;;  %v1118_v44 = vld [vmem:[%s1406_s0 + $0x64] ss:$16 sps:$4 sm:$0xff]   ;;  %v1120_v45 = vld [vmem:[%s1406_s0 + $0x6c] ss:$16 sps:$4 sm:$0xff]   ;;  %v1122_v46 = vld [vmem:[%s1406_s0 + $0x60] ss:$16 sps:$4 sm:$0xff]  }
  0x12   :  { %1012 = vmatprep.subr.bf16.mxu1 %v1085_v17  ;;  %v1123_v47 = vld [vmem:[%s1406_s0 + $0x68] ss:$16 sps:$4 sm:$0xff]   ;;  %v1124_v48 = vld [vmem:[%s1406_s0 + $0x84] ss:$16 sps:$4 sm:$0xff]   ;;  %v1126_v49 = vld [vmem:[%s1406_s0 + $0x8c] ss:$16 sps:$4 sm:$0xff]  }
  0x13   :  { %v1128_v50 = vld [vmem:[%s1406_s0 + $0x80] ss:$16 sps:$4 sm:$0xff]   ;;  %v1129_v51 = vld [vmem:[%s1406_s0 + $0x88] ss:$16 sps:$4 sm:$0xff]   ;;  %v1130_v52 = vld [vmem:[%s1406_s0 + $0xa4] ss:$16 sps:$4 sm:$0xff]  }
  0x14   :  { %949 = vmatpush3.bf16.msra.mxu0 %v1086_v18  ;;  %v1132_v53 = vld [vmem:[%s1406_s0 + $0xac] ss:$16 sps:$4 sm:$0xff]   ;;  %v1134_v54 = vld [vmem:[%s1406_s0 + $0xa0] ss:$16 sps:$4 sm:$0xff]   ;;  %v1135_v55 = vld [vmem:[%s1406_s0 + $0xa8] ss:$16 sps:$4 sm:$0xff]  }
  0x15   :  { %1013 = vmatpush3.bf16.msra.mxu1 %v1087_v19  ;;  %950 = vmatprep.subr.bf16.mxu0 %v1088_v20  ;;  %v1136_v56 = vld [vmem:[%s1406_s0 + $0xc4] ss:$16 sps:$4 sm:$0xff]   ;;  %v1138_v57 = vld [vmem:[%s1406_s0 + $0xcc] ss:$16 sps:$4 sm:$0xff]   ;;  %v1140_v58 = vld [vmem:[%s1406_s0 + $0xc0] ss:$16 sps:$4 sm:$0xff]  }
  0x16   :  { %1014 = vmatprep.subr.bf16.mxu1 %v1089_v21  ;;  %v1141_v59 = vld [vmem:[%s1406_s0 + $0xc8] ss:$16 sps:$4 sm:$0xff]   ;;  %v1142_v60 = vld [vmem:[%s1406_s0 + $0xe4] ss:$16 sps:$4 sm:$0xff]   ;;  %v1144_v61 = vld [vmem:[%s1406_s0 + $0xec] ss:$16 sps:$4 sm:$0xff]  }
  0x17   :  { %v1146_v62 = vld [vmem:[%s1406_s0 + $0xe0] ss:$16 sps:$4 sm:$0xff]   ;;  %v1147_v63 = vld [vmem:[%s1406_s0 + $0xe8] ss:$16 sps:$4 sm:$0xff]  }
  0x18   :  { %951 = vmatpush3.bf16.msra.mxu0 %v1090_v22 }
  0x19   :  { %1015 = vmatpush3.bf16.msra.mxu1 %v1091_v23  ;;  %952 = vmatprep.subr.bf16.mxu0 %v1092_v24 }
  0x1a   :  { %1016 = vmatprep.subr.bf16.mxu1 %v1093_v25 }
  0x1c   :  { %953 = vmatpush3.bf16.msra.mxu0 %v1094_v26 }
  0x1d   :  { %1017 = vmatpush3.bf16.msra.mxu1 %v1095_v27  ;;  %954 = vmatprep.subr.bf16.mxu0 %v1096_v28 }
  0x1e   :  { %1018 = vmatprep.subr.bf16.mxu1 %v1097_v29 }
  0x20   :  { %955 = vmatpush3.bf16.msra.mxu0 %v1098_v30 }
  0x21   :  { %1019 = vmatpush3.bf16.msra.mxu1 %v1099_v31 }
  0x23   :  { %503 = vmatmul.mubr.bf16.vlgmr.msra.gmra.mrb[0].mxu0 %v1100_v32 }
  0x24   :  { %600 = vmatmul.mubr.bf16.vlgmr.msra.gmra.mrb[0].mxu1 %v1103_v34  ;;  %510 = vmatprep.mubr.bf16.mxu0 %v1106_v36 }
  0x25   :  { %607 = vmatprep.mubr.bf16.mxu1 %v1108_v37 }
  0x2b   :  { %511 = vmatmul.mubr.bf16.gmra.mrb[4].mxu0 %v1110_v38 }
  0x2c   :  { %608 = vmatmul.mubr.bf16.gmra.mrb[4].mxu1 %v1111_v39  ;;  %518 = vmatprep.mubr.bf16.mxu0 %v1112_v40 }
  0x2d   :  { %615 = vmatprep.mubr.bf16.mxu1 %v1114_v41 }
  0x33   :  { %519 = vmatmul.mubr.bf16.gmra.mrb[8].mxu0 %v1116_v42 }
  0x34   :  { %616 = vmatmul.mubr.bf16.gmra.mrb[8].mxu1 %v1117_v43  ;;  %526 = vmatprep.mubr.bf16.mxu0 %v1118_v44 }
  0x35   :  { %623 = vmatprep.mubr.bf16.mxu1 %v1120_v45 }
  0x3b   :  { %527 = vmatmul.mubr.bf16.gmra.mrb[12].mxu0 %v1122_v46 }
  0x3c   :  { %624 = vmatmul.mubr.bf16.gmra.mrb[12].mxu1 %v1123_v47  ;;  %534 = vmatprep.mubr.bf16.mxu0 %v1124_v48 }
  0x3d   :  { %631 = vmatprep.mubr.bf16.mxu1 %v1126_v49 }
  0x43   :  { %535 = vmatmul.mubr.bf16.gmra.mrb[16].mxu0 %v1128_v50 }
  0x44   :  { %632 = vmatmul.mubr.bf16.gmra.mrb[16].mxu1 %v1129_v51  ;;  %542 = vmatprep.mubr.bf16.mxu0 %v1130_v52 }
  0x45   :  { %639 = vmatprep.mubr.bf16.mxu1 %v1132_v53 }
  0x4b   :  { %543 = vmatmul.mubr.bf16.gmra.mrb[20].mxu0 %v1134_v54 }
  0x4c   :  { %640 = vmatmul.mubr.bf16.gmra.mrb[20].mxu1 %v1135_v55  ;;  %550 = vmatprep.mubr.bf16.mxu0 %v1136_v56 }
  0x4d   :  { %647 = vmatprep.mubr.bf16.mxu1 %v1138_v57 }
  0x53   :  { %551 = vmatmul.mubr.bf16.gmra.mrb[24].mxu0 %v1140_v58 }
  0x54   :  { %648 = vmatmul.mubr.bf16.gmra.mrb[24].mxu1 %v1141_v59  ;;  %558 = vmatprep.mubr.bf16.mxu0 %v1142_v60 }
  0x55   :  { %655 = vmatprep.mubr.bf16.mxu1 %v1144_v61 }
  0x5b   :  { %559 = vmatmul.mubr.bf16.gmra.mrb[28].mxu0 %v1146_v62 }
  0x5c   :  { %656 = vmatmul.mubr.bf16.gmra.mrb[28].mxu1 %v1147_v63 }
  0xf6   :  { %v956_v0 = vpop.f32.mrb[0].mxu0 }
  0xf7   :  { %v1020_v1 = vpop.f32.mrb[0].mxu1  ;;  %v957_v3 = vpop.f32.mrb[1].mxu0 }
  0xf8   :  { %v958_v4 = vadd.f32 %v957_v3, %v956_v0  ;;  %v1021_v5 = vpop.f32.mrb[1].mxu1  ;;  %v959_v6 = vpop.f32.mrb[2].mxu0 }
  0xf9   :  { %v1022_v7 = vadd.f32 %v1021_v5, %v1020_v1  ;;  %v1023_v8 = vpop.f32.mrb[2].mxu1  ;;  %v960_v9 = vpop.f32.mrb[3].mxu0 }
  0xfa   :  { %v505_v10 = vadd.f32 %v958_v4, %v1363_v2  ;;  %v961_v11 = vadd.f32 %v960_v9, %v959_v6  ;;  %v1024_v12 = vpop.f32.mrb[3].mxu1 }
  0xfb   :  { %v1025_v13 = vadd.f32 %v1024_v12, %v1023_v8 }
  0xfc   :  { %v602_v14 = vadd.f32 %v1022_v7, %v505_v10  ;;  %v508_v15 = vadd.f32 %v961_v11, %v1363_v2 }
  0xfe   :  { %v680_v16 = vmul.f32 0.1, %v602_v14  ;;  %v605_v17 = vadd.f32 %v1025_v13, %v508_v15  ;;  %v962_v18 = vpop.f32.mrb[4].mxu0  ;;  %vm664_vm0 = vcmp.gt.f32.partialorder %v602_v14, 0.0 }
  0xff   :  { %v1026_v19 = vpop.f32.mrb[4].mxu1  ;;  %v963_v20 = vpop.f32.mrb[5].mxu0 }
 0x100   :  { %vm665_vm1 = vcmp.gt.f32.partialorder %v605_v17, 0.0  ;;  %v681_v21 = vmul.f32 0.1, %v605_v17  ;;  %v964_v22 = vadd.f32 %v963_v20, %v962_v18  ;;  %v1027_v23 = vpop.f32.mrb[5].mxu1  ;;  %v965_v24 = vpop.f32.mrb[6].mxu0  ;;  %v696_v28 = vsel %vm664_vm0, %v602_v14, %v680_v16 }
 0x101   :  { %v1028_v25 = vadd.f32 %v1027_v23, %v1026_v19  ;;  %v1029_v26 = vpop.f32.mrb[6].mxu1  ;;  %v966_v27 = vpop.f32.mrb[7].mxu0 }
 0x102   :  { %v697_v29 = vsel %vm665_vm1, %v605_v17, %v681_v21  ;;  %v513_v30 = vadd.f32 %v964_v22, %v1363_v2  ;;  %v967_v31 = vadd.f32 %v966_v27, %v965_v24  ;;  %v1030_v32 = vpop.f32.mrb[7].mxu1 }
 0x103   :  { %v896_v33 = vpack.c.bf16 %v697_v29, %v696_v28  ;;  %v1031_v34 = vadd.f32 %v1030_v32, %v1029_v26 }
 0x104   :  { %v610_v35 = vadd.f32 %v1028_v25, %v513_v30  ;;  %v516_v36 = vadd.f32 %v967_v31, %v1363_v2 }
 0x105   :  { %897 = vst [vmem:[%s1408_s3] sm:$0xff] %v896_v33  }
 0x106   :  { %v682_v37 = vmul.f32 0.1, %v610_v35  ;;  %v613_v38 = vadd.f32 %v1031_v34, %v516_v36  ;;  %v968_v39 = vpop.f32.mrb[8].mxu0  ;;  %vm666_vm2 = vcmp.gt.f32.partialorder %v610_v35, 0.0 }
 0x107   :  { %v1032_v40 = vpop.f32.mrb[8].mxu1  ;;  %v969_v41 = vpop.f32.mrb[9].mxu0 }
 0x108   :  { %vm667_vm3 = vcmp.gt.f32.partialorder %v613_v38, 0.0  ;;  %v683_v42 = vmul.f32 0.1, %v613_v38  ;;  %v970_v43 = vadd.f32 %v969_v41, %v968_v39  ;;  %v1033_v44 = vpop.f32.mrb[9].mxu1  ;;  %v971_v45 = vpop.f32.mrb[10].mxu0  ;;  %v698_v49 = vsel %vm666_vm2, %v610_v35, %v682_v37 }
 0x109   :  { %v1034_v46 = vadd.f32 %v1033_v44, %v1032_v40  ;;  %v1035_v47 = vpop.f32.mrb[10].mxu1  ;;  %v972_v48 = vpop.f32.mrb[11].mxu0 }
 0x10a   :  { %v699_v50 = vsel %vm667_vm3, %v613_v38, %v683_v42  ;;  %v521_v51 = vadd.f32 %v970_v43, %v1363_v2  ;;  %v973_v52 = vadd.f32 %v972_v48, %v971_v45  ;;  %v1036_v53 = vpop.f32.mrb[11].mxu1 }
 0x10b   :  { %v901_v54 = vpack.c.bf16 %v699_v50, %v698_v49  ;;  %v1037_v55 = vadd.f32 %v1036_v53, %v1035_v47 }
 0x10c   :  { %v618_v56 = vadd.f32 %v1034_v46, %v521_v51  ;;  %v524_v57 = vadd.f32 %v973_v52, %v1363_v2 }
 0x10d   :  { %933 = vst [vmem:[%s1408_s3 + $0x8] sm:$0xff] %v901_v54  }
 0x10e   :  { %v684_v58 = vmul.f32 0.1, %v618_v56  ;;  %v621_v59 = vadd.f32 %v1037_v55, %v524_v57  ;;  %v974_v60 = vpop.f32.mrb[12].mxu0  ;;  %vm668_vm4 = vcmp.gt.f32.partialorder %v618_v56, 0.0 }
 0x10f   :  { %v1038_v61 = vpop.f32.mrb[12].mxu1  ;;  %v975_v62 = vpop.f32.mrb[13].mxu0 }
 0x110   :  { %vm669_vm5 = vcmp.gt.f32.partialorder %v621_v59, 0.0  ;;  %v685_v63 = vmul.f32 0.1, %v621_v59  ;;  %v976_v0 = vadd.f32 %v975_v62, %v974_v60  ;;  %v1039_v1 = vpop.f32.mrb[13].mxu1  ;;  %v977_v3 = vpop.f32.mrb[14].mxu0  ;;  %v700_v7 = vsel %vm668_vm4, %v618_v56, %v684_v58 }
 0x111   :  { %v1040_v4 = vadd.f32 %v1039_v1, %v1038_v61  ;;  %v1041_v5 = vpop.f32.mrb[14].mxu1  ;;  %v978_v6 = vpop.f32.mrb[15].mxu0 }
 0x112   :  { %v701_v8 = vsel %vm669_vm5, %v621_v59, %v685_v63  ;;  %v529_v9 = vadd.f32 %v976_v0, %v1363_v2  ;;  %v979_v10 = vadd.f32 %v978_v6, %v977_v3  ;;  %v1042_v11 = vpop.f32.mrb[15].mxu1 }
 0x113   :  { %v906_v12 = vpack.c.bf16 %v701_v8, %v700_v7  ;;  %v1043_v13 = vadd.f32 %v1042_v11, %v1041_v5 }
 0x114   :  { %v626_v14 = vadd.f32 %v1040_v4, %v529_v9  ;;  %v532_v15 = vadd.f32 %v979_v10, %v1363_v2 }
 0x115   :  { %934 = vst [vmem:[%s1408_s3 + $0x10] sm:$0xff] %v906_v12  }
 0x116   :  { %v686_v16 = vmul.f32 0.1, %v626_v14  ;;  %v629_v17 = vadd.f32 %v1043_v13, %v532_v15  ;;  %v980_v18 = vpop.f32.mrb[16].mxu0  ;;  %vm670_vm6 = vcmp.gt.f32.partialorder %v626_v14, 0.0 }
 0x117   :  { %v1044_v19 = vpop.f32.mrb[16].mxu1  ;;  %v981_v20 = vpop.f32.mrb[17].mxu0 }
 0x118   :  { %vm671_vm7 = vcmp.gt.f32.partialorder %v629_v17, 0.0  ;;  %v687_v21 = vmul.f32 0.1, %v629_v17  ;;  %v982_v22 = vadd.f32 %v981_v20, %v980_v18  ;;  %v1045_v23 = vpop.f32.mrb[17].mxu1  ;;  %v983_v24 = vpop.f32.mrb[18].mxu0  ;;  %v702_v28 = vsel %vm670_vm6, %v626_v14, %v686_v16 }
 0x119   :  { %v1046_v25 = vadd.f32 %v1045_v23, %v1044_v19  ;;  %v1047_v26 = vpop.f32.mrb[18].mxu1  ;;  %v984_v27 = vpop.f32.mrb[19].mxu0 }
 0x11a   :  { %v703_v29 = vsel %vm671_vm7, %v629_v17, %v687_v21  ;;  %v537_v30 = vadd.f32 %v982_v22, %v1363_v2  ;;  %v985_v31 = vadd.f32 %v984_v27, %v983_v24  ;;  %v1048_v32 = vpop.f32.mrb[19].mxu1 }
 0x11b   :  { %v911_v33 = vpack.c.bf16 %v703_v29, %v702_v28  ;;  %v1049_v34 = vadd.f32 %v1048_v32, %v1047_v26 }
 0x11c   :  { %v634_v35 = vadd.f32 %v1046_v25, %v537_v30  ;;  %v540_v36 = vadd.f32 %v985_v31, %v1363_v2 }
 0x11d   :  { %935 = vst [vmem:[%s1408_s3 + $0x18] sm:$0xff] %v911_v33  }
 0x11e   :  { %v688_v37 = vmul.f32 0.1, %v634_v35  ;;  %v637_v38 = vadd.f32 %v1049_v34, %v540_v36  ;;  %v986_v39 = vpop.f32.mrb[20].mxu0  ;;  %vm672_vm8 = vcmp.gt.f32.partialorder %v634_v35, 0.0 }
 0x11f   :  { %v1050_v40 = vpop.f32.mrb[20].mxu1  ;;  %v987_v41 = vpop.f32.mrb[21].mxu0 }
 0x120   :  { %vm673_vm9 = vcmp.gt.f32.partialorder %v637_v38, 0.0  ;;  %v689_v42 = vmul.f32 0.1, %v637_v38  ;;  %v988_v43 = vadd.f32 %v987_v41, %v986_v39  ;;  %v1051_v44 = vpop.f32.mrb[21].mxu1  ;;  %v989_v45 = vpop.f32.mrb[22].mxu0  ;;  %v704_v49 = vsel %vm672_vm8, %v634_v35, %v688_v37 }
 0x121   :  { %v1052_v46 = vadd.f32 %v1051_v44, %v1050_v40  ;;  %v1053_v47 = vpop.f32.mrb[22].mxu1  ;;  %v990_v48 = vpop.f32.mrb[23].mxu0 }
 0x122   :  { %v705_v50 = vsel %vm673_vm9, %v637_v38, %v689_v42  ;;  %v545_v51 = vadd.f32 %v988_v43, %v1363_v2  ;;  %v991_v52 = vadd.f32 %v990_v48, %v989_v45  ;;  %v1054_v53 = vpop.f32.mrb[23].mxu1 }
 0x123   :  { %v916_v54 = vpack.c.bf16 %v705_v50, %v704_v49  ;;  %v1055_v55 = vadd.f32 %v1054_v53, %v1053_v47 }
 0x124   :  { %v642_v56 = vadd.f32 %v1052_v46, %v545_v51  ;;  %v548_v57 = vadd.f32 %v991_v52, %v1363_v2 }
 0x125   :  { %936 = vst [vmem:[%s1408_s3 + $0x20] sm:$0xff] %v916_v54  }
 0x126   :  { %v690_v58 = vmul.f32 0.1, %v642_v56  ;;  %v645_v59 = vadd.f32 %v1055_v55, %v548_v57  ;;  %v992_v60 = vpop.f32.mrb[24].mxu0  ;;  %vm674_vm10 = vcmp.gt.f32.partialorder %v642_v56, 0.0 }
 0x127   :  { %v1056_v61 = vpop.f32.mrb[24].mxu1  ;;  %v993_v62 = vpop.f32.mrb[25].mxu0 }
 0x128   :  { %vm675_vm11 = vcmp.gt.f32.partialorder %v645_v59, 0.0  ;;  %v691_v63 = vmul.f32 0.1, %v645_v59  ;;  %v994_v0 = vadd.f32 %v993_v62, %v992_v60  ;;  %v1057_v1 = vpop.f32.mrb[25].mxu1  ;;  %v995_v3 = vpop.f32.mrb[26].mxu0  ;;  %v706_v7 = vsel %vm674_vm10, %v642_v56, %v690_v58 }
 0x129   :  { %v1058_v4 = vadd.f32 %v1057_v1, %v1056_v61  ;;  %v1059_v5 = vpop.f32.mrb[26].mxu1  ;;  %v996_v6 = vpop.f32.mrb[27].mxu0 }
 0x12a   :  { %v707_v8 = vsel %vm675_vm11, %v645_v59, %v691_v63  ;;  %v553_v9 = vadd.f32 %v994_v0, %v1363_v2  ;;  %v997_v10 = vadd.f32 %v996_v6, %v995_v3  ;;  %v1060_v11 = vpop.f32.mrb[27].mxu1 }
 0x12b   :  { %v921_v12 = vpack.c.bf16 %v707_v8, %v706_v7  ;;  %v1061_v13 = vadd.f32 %v1060_v11, %v1059_v5 }
 0x12c   :  { %v650_v14 = vadd.f32 %v1058_v4, %v553_v9  ;;  %v556_v15 = vadd.f32 %v997_v10, %v1363_v2 }
 0x12d   :  { %937 = vst [vmem:[%s1408_s3 + $0x28] sm:$0xff] %v921_v12  }
 0x12e   :  { %v692_v16 = vmul.f32 0.1, %v650_v14  ;;  %v653_v17 = vadd.f32 %v1061_v13, %v556_v15  ;;  %v998_v18 = vpop.f32.mrb[28].mxu0  ;;  %vm676_vm12 = vcmp.gt.f32.partialorder %v650_v14, 0.0 }
 0x12f   :  { %v1062_v19 = vpop.f32.mrb[28].mxu1  ;;  %v999_v20 = vpop.f32.mrb[29].mxu0 }
 0x130   :  { %vm677_vm13 = vcmp.gt.f32.partialorder %v653_v17, 0.0  ;;  %v693_v21 = vmul.f32 0.1, %v653_v17  ;;  %v1000_v22 = vadd.f32 %v999_v20, %v998_v18  ;;  %v1063_v23 = vpop.f32.mrb[29].mxu1  ;;  %v1001_v24 = vpop.f32.mrb[30].mxu0  ;;  %v708_v28 = vsel %vm676_vm12, %v650_v14, %v692_v16 }
 0x131   :  { %v1064_v25 = vadd.f32 %v1063_v23, %v1062_v19  ;;  %v1065_v26 = vpop.f32.mrb[30].mxu1  ;;  %v1002_v27 = vpop.f32.mrb[31].mxu0 }
 0x132   :  { %v709_v29 = vsel %vm677_vm13, %v653_v17, %v693_v21  ;;  %v561_v30 = vadd.f32 %v1000_v22, %v1363_v2  ;;  %v1003_v31 = vadd.f32 %v1002_v27, %v1001_v24  ;;  %v1066_v32 = vpop.f32.mrb[31].mxu1 }
 0x133   :  { %v926_v33 = vpack.c.bf16 %v709_v29, %v708_v28  ;;  %v1067_v34 = vadd.f32 %v1066_v32, %v1065_v26 }
 0x134   :  { %v658_v35 = vadd.f32 %v1064_v25, %v561_v30  ;;  %v564_v36 = vadd.f32 %v1003_v31, %v1363_v2 }
 0x135   :  { %938 = vst [vmem:[%s1408_s3 + $0x30] sm:$0xff] %v926_v33  }
 0x136   :  { %v694_v37 = vmul.f32 0.1, %v658_v35  ;;  %v661_v38 = vadd.f32 %v1067_v34, %v564_v36  ;;  %vm678_vm14 = vcmp.gt.f32.partialorder %v658_v35, 0.0 }
 0x138   :  { %vm679_vm15 = vcmp.gt.f32.partialorder %v661_v38, 0.0  ;;  %v695_v39 = vmul.f32 0.1, %v661_v38  ;;  %v710_v40 = vsel %vm678_vm14, %v658_v35, %v694_v37 }
 0x13a   :  { %v711_v41 = vsel %vm679_vm15, %v661_v38, %v695_v39 }
 0x13b   :  { %v931_v42 = vpack.c.bf16 %v711_v41, %v710_v40 }
 0x13d   :  { %939 = vst [vmem:[%s1408_s3 + $0x38] sm:$0xff] %v931_v42  }

// kernel: flownets_forward.15
= control target key start
LH: loop header
LB: loop body
LE: loop exit
PB: predicated region body
PF: predicated region fallthrough
CT: control target
= control target key end

     0   :  { %s1309_s1 = inlined_call_operand.vmem [shape: bf16[896,128], index: 1, kind: input, shape index: {}]   ;;  %s1310_s0 = inlined_call_operand.vmem [shape: bf16[32,896], index: 0, kind: input, shape index: {}]   ;;  %s1311_s2 = inlined_call_operand.vmem [shape: f32[1,128], index: 2, kind: input, shape index: {}]   ;;  %s1312_s3 = inlined_call_operand.vmem [shape: bf16[32,128], index: 3, kind: output, shape index: {}]  }
   0x1   :  { %v994_v0 = vld [vmem:[%s1309_s1 + $0x40] sm:$0xff]   ;;  %v998_v4 = vld [vmem:[%s1309_s1 + $0x48] sm:$0xff]   ;;  %v1002_v8 = vld [vmem:[%s1309_s1 + $0x50] sm:$0xff]  }
   0x2   :  { %v995_v1 = vld [vmem:[%s1309_s1] sm:$0xff]   ;;  %880 = vmatprep.subr.bf16.mxu0 %v994_v0  ;;  %v999_v5 = vld [vmem:[%s1309_s1 + $0x8] sm:$0xff]   ;;  %v1003_v9 = vld [vmem:[%s1309_s1 + $0x10] sm:$0xff]  }
   0x3   :  { %v996_v2 = vld [vmem:[%s1309_s1 + $0xc0] sm:$0xff]   ;;  %881 = vmatpush3.bf16.msra.mxu0 %v995_v1  ;;  %v1000_v6 = vld [vmem:[%s1309_s1 + $0xc8] sm:$0xff]   ;;  %v1004_v10 = vld [vmem:[%s1309_s1 + $0xd0] sm:$0xff]  }
   0x4   :  { %v997_v3 = vld [vmem:[%s1309_s1 + $0x80] sm:$0xff]   ;;  %908 = vmatprep.subr.bf16.mxu1 %v996_v2  ;;  %882 = vmatprep.subr.bf16.mxu0 %v998_v4  ;;  %v1001_v7 = vld [vmem:[%s1309_s1 + $0x88] sm:$0xff]   ;;  %v1005_v11 = vld [vmem:[%s1309_s1 + $0x90] sm:$0xff]  }
   0x5   :  { %909 = vmatpush3.bf16.msra.mxu1 %v997_v3  ;;  %v1006_v12 = vld [vmem:[%s1309_s1 + $0x58] sm:$0xff]   ;;  %v1010_v16 = vld [vmem:[%s1309_s1 + $0x60] sm:$0xff]   ;;  %v1014_v20 = vld [vmem:[%s1309_s1 + $0x68] sm:$0xff]  }
   0x6   :  { %910 = vmatprep.subr.bf16.mxu1 %v1000_v6  ;;  %v1007_v13 = vld [vmem:[%s1309_s1 + $0x18] sm:$0xff]   ;;  %v1011_v17 = vld [vmem:[%s1309_s1 + $0x20] sm:$0xff]   ;;  %v1015_v21 = vld [vmem:[%s1309_s1 + $0x28] sm:$0xff]  }
   0x7   :  { %883 = vmatpush3.bf16.msra.mxu0 %v999_v5  ;;  %v1008_v14 = vld [vmem:[%s1309_s1 + $0xd8] sm:$0xff]   ;;  %v1012_v18 = vld [vmem:[%s1309_s1 + $0xe0] sm:$0xff]   ;;  %v1016_v22 = vld [vmem:[%s1309_s1 + $0xe8] sm:$0xff]  }
   0x8   :  { %884 = vmatprep.subr.bf16.mxu0 %v1002_v8  ;;  %v1009_v15 = vld [vmem:[%s1309_s1 + $0x98] sm:$0xff]   ;;  %v1013_v19 = vld [vmem:[%s1309_s1 + $0xa0] sm:$0xff]   ;;  %v1017_v23 = vld [vmem:[%s1309_s1 + $0xa8] sm:$0xff]  }
   0x9   :  { %911 = vmatpush3.bf16.msra.mxu1 %v1001_v7  ;;  %v1018_v24 = vld [vmem:[%s1309_s1 + $0x70] sm:$0xff]   ;;  %v1022_v28 = vld [vmem:[%s1309_s1 + $0x78] sm:$0xff]   ;;  %v1027_v32 = vld [vmem:[%s1310_s0 + $0x4] ss:$28 sps:$4 sm:$0xff]  }
   0xa   :  { %912 = vmatprep.subr.bf16.mxu1 %v1004_v10  ;;  %v1019_v25 = vld [vmem:[%s1309_s1 + $0x30] sm:$0xff]   ;;  %v1023_v29 = vld [vmem:[%s1309_s1 + $0x38] sm:$0xff]   ;;  %590 = vmatprep.mubr.bf16.mxu0 %v1027_v32  ;;  %v1029_v34 = vld [vmem:[%s1309_s1 + $0x140] sm:$0xff]  }
   0xb   :  { %885 = vmatpush3.bf16.msra.mxu0 %v1003_v9  ;;  %v1020_v26 = vld [vmem:[%s1309_s1 + $0xf0] sm:$0xff]   ;;  %v1024_v30 = vld [vmem:[%s1309_s1 + $0xf8] sm:$0xff]   ;;  %v1030_v35 = vld [vmem:[%s1310_s0 + $0x8] ss:$28 sps:$4 sm:$0xff]  }
   0xc   :  { %886 = vmatprep.subr.bf16.mxu0 %v1006_v12  ;;  %v1021_v27 = vld [vmem:[%s1309_s1 + $0xb0] sm:$0xff]   ;;  %v1025_v31 = vld [vmem:[%s1310_s0] ss:$28 sps:$4 sm:$0xff]   ;;  %v1032_v36 = vld [vmem:[%s1310_s0 + $0xc] ss:$28 sps:$4 sm:$0xff]  }
   0xd   :  { %913 = vmatpush3.bf16.msra.mxu1 %v1005_v11  ;;  %v1028_v33 = vld [vmem:[%s1309_s1 + $0xb8] sm:$0xff]   ;;  %v1033_v37 = vld [vmem:[%s1309_s1 + $0x100] sm:$0xff]   ;;  %639 = vmatprep.mubr.bf16.mxu1 %v1032_v36  ;;  %v1034_v38 = vld [vmem:[%s1309_s1 + $0x148] sm:$0xff]  }
   0xe   :  { %914 = vmatprep.subr.bf16.mxu1 %v1008_v14  ;;  %v1035_v39 = vld [vmem:[%s1309_s1 + $0x180] sm:$0xff]   ;;  %v1036_v40 = vld [vmem:[%s1309_s1 + $0x108] sm:$0xff]   ;;  %v1037_v41 = vld [vmem:[%s1309_s1 + $0x150] sm:$0xff]  }
   0xf   :  { %887 = vmatpush3.bf16.msra.mxu0 %v1007_v13  ;;  %v1038_v42 = vld [vmem:[%s1309_s1 + $0x188] sm:$0xff]   ;;  %v1039_v43 = vld [vmem:[%s1309_s1 + $0x110] sm:$0xff]   ;;  %v1040_v44 = vld [vmem:[%s1309_s1 + $0x158] sm:$0xff]  }
  0x10   :  { %888 = vmatprep.subr.bf16.mxu0 %v1010_v16  ;;  %v1041_v45 = vld [vmem:[%s1309_s1 + $0x190] sm:$0xff]   ;;  %v1042_v46 = vld [vmem:[%s1309_s1 + $0x118] sm:$0xff]   ;;  %v1043_v47 = vld [vmem:[%s1309_s1 + $0x160] sm:$0xff]  }
  0x11   :  { %915 = vmatpush3.bf16.msra.mxu1 %v1009_v15  ;;  %v1044_v48 = vld [vmem:[%s1309_s1 + $0x198] sm:$0xff]   ;;  %v1045_v49 = vld [vmem:[%s1309_s1 + $0x120] sm:$0xff]   ;;  %v1048_v51 = vld [vmem:[%s1309_s1 + $0x168] sm:$0xff]  }
  0x12   :  { %916 = vmatprep.subr.bf16.mxu1 %v1012_v18  ;;  %v1046_v50 = vld [vmem:[%s1310_s0 + $0x3c] ss:$28 sps:$4 sm:$0xff]   ;;  %v1049_v52 = vld [vmem:[%s1309_s1 + $0x1a0] sm:$0xff]   ;;  %v1051_v54 = vld [vmem:[%s1309_s1 + $0x128] sm:$0xff]  }
  0x13   :  { %889 = vmatpush3.bf16.msra.mxu0 %v1011_v17  ;;  %v1050_v53 = vld [vmem:[%s1310_s0 + $0x38] ss:$28 sps:$4 sm:$0xff]   ;;  %v1052_v55 = vld [vmem:[%s1310_s0 + $0x44] ss:$28 sps:$4 sm:$0xff]   ;;  %v1056_v58 = vld [vmem:[%s1309_s1 + $0x1a8] sm:$0xff]  }
  0x14   :  { %890 = vmatprep.subr.bf16.mxu0 %v1014_v20  ;;  %v1054_v56 = vld [vmem:[%s1310_s0 + $0x40] ss:$28 sps:$4 sm:$0xff]   ;;  %v1055_v57 = vld [vmem:[%s1309_s1 + $0x170] sm:$0xff]   ;;  %v1067_v3 = vld [vmem:[%s1310_s0 + $0x4c] ss:$28 sps:$4 sm:$0xff]  }
  0x15   :  { %917 = vmatpush3.bf16.msra.mxu1 %v1013_v19  ;;  %v1057_v59 = vld [vmem:[%s1309_s1 + $0x130] sm:$0xff]   ;;  %v1058_v60 = vld [vmem:[%s1309_s1 + $0x178] sm:$0xff]   ;;  %v1069_v5 = vld [vmem:[%s1310_s0 + $0x48] ss:$28 sps:$4 sm:$0xff]  }
  0x16   :  { %918 = vmatprep.subr.bf16.mxu1 %v1016_v22  ;;  %v1059_v61 = vld [vmem:[%s1309_s1 + $0x1b0] sm:$0xff]   ;;  %v1060_v62 = vld [vmem:[%s1309_s1 + $0x138] sm:$0xff]   ;;  %v790_v7 = vld [vmem:[%s1311_s2] ss:$0 sm:$0xff] }
  0x17   :  { %891 = vmatpush3.bf16.msra.mxu0 %v1015_v21  ;;  %v1063_v63 = vld [vmem:[%s1310_s0 + $0x14] ss:$28 sps:$4 sm:$0xff]   ;;  %v1064_v0 = vld [vmem:[%s1309_s1 + $0x1b8] sm:$0xff]  }
  0x18   :  { %892 = vmatprep.subr.bf16.mxu0 %v1018_v24  ;;  %v1065_v1 = vld [vmem:[%s1310_s0 + $0x18] ss:$28 sps:$4 sm:$0xff]   ;;  %v1061_v2 = vld [vmem:[%s1310_s0 + $0x10] ss:$28 sps:$4 sm:$0xff]  }
  0x19   :  { %919 = vmatpush3.bf16.msra.mxu1 %v1017_v23  ;;  %v1066_v4 = vld [vmem:[%s1310_s0 + $0x50] ss:$28 sps:$4 sm:$0xff]  }
  0x1a   :  { %920 = vmatprep.subr.bf16.mxu1 %v1020_v26 }
  0x1b   :  { %893 = vmatpush3.bf16.msra.mxu0 %v1019_v25 }
  0x1c   :  { %894 = vmatprep.subr.bf16.mxu0 %v1022_v28 }
  0x1d   :  { %921 = vmatpush3.bf16.msra.mxu1 %v1021_v27 }
  0x1e   :  { %922 = vmatprep.subr.bf16.mxu1 %v1024_v30 }
  0x1f   :  { %895 = vmatpush3.bf16.msra.mxu0 %v1023_v29 }
  0x20   :  { %936 = vmatprep.subr.bf16.mxu0 %v1029_v34 }
  0x21   :  { %923 = vmatpush3.bf16.msra.mxu1 %v1028_v33 }
  0x22   :  { %591 = vmatmul.mubr.bf16.vlgmr.msra.gmra.mrb[0].mxu0 %v1025_v31  ;;  %974 = vmatprep.subr.bf16.mxu1 %v1035_v39 }
  0x23   :  { %937 = vmatpush3.bf16.msra.mxu0 %v1033_v37  ;;  %598 = vmatprep.mubr.bf16.mxu0 %v1046_v50 }
  0x24   :  { %640 = vmatmul.mubr.bf16.vlgmr.msra.gmra.mrb[0].mxu1 %v1030_v35  ;;  %938 = vmatprep.subr.bf16.mxu0 %v1034_v38 }
  0x25   :  { %975 = vmatpush3.bf16.msra.mxu1 %v1035_v39  ;;  %647 = vmatprep.mubr.bf16.mxu1 %v1052_v55 }
  0x26   :  { %976 = vmatprep.subr.bf16.mxu1 %v1038_v42 }
  0x27   :  { %939 = vmatpush3.bf16.msra.mxu0 %v1036_v40 }
  0x28   :  { %940 = vmatprep.subr.bf16.mxu0 %v1037_v41 }
  0x29   :  { %977 = vmatpush3.bf16.msra.mxu1 %v1038_v42 }
  0x2a   :  { %978 = vmatprep.subr.bf16.mxu1 %v1041_v45  ;;  %599 = vmatmul.mubr.bf16.gmra.mrb[4].mxu0 %v1050_v53 }
  0x2b   :  { %941 = vmatpush3.bf16.msra.mxu0 %v1039_v43  ;;  %688 = vmatprep.mubr.bf16.mxu0 %v1063_v63 }
  0x2c   :  { %942 = vmatprep.subr.bf16.mxu0 %v1040_v44  ;;  %648 = vmatmul.mubr.bf16.gmra.mrb[4].mxu1 %v1054_v56 }
  0x2d   :  { %979 = vmatpush3.bf16.msra.mxu1 %v1041_v45  ;;  %990 = vmatprep.mubr.bf16.mxu1 %v1065_v1 }
  0x2e   :  { %980 = vmatprep.subr.bf16.mxu1 %v1044_v48 }
  0x2f   :  { %943 = vmatpush3.bf16.msra.mxu0 %v1042_v46 }
  0x30   :  { %944 = vmatprep.subr.bf16.mxu0 %v1043_v47 }
  0x31   :  { %981 = vmatpush3.bf16.msra.mxu1 %v1044_v48 }
  0x32   :  { %982 = vmatprep.subr.bf16.mxu1 %v1049_v52 }
  0x33   :  { %945 = vmatpush3.bf16.msra.mxu0 %v1045_v49 }
  0x34   :  { %946 = vmatprep.subr.bf16.mxu0 %v1048_v51 }
  0x35   :  { %983 = vmatpush3.bf16.msra.mxu1 %v1049_v52 }
  0x36   :  { %984 = vmatprep.subr.bf16.mxu1 %v1056_v58 }
  0x37   :  { %947 = vmatpush3.bf16.msra.mxu0 %v1051_v54 }
  0x38   :  { %948 = vmatprep.subr.bf16.mxu0 %v1055_v57 }
  0x39   :  { %985 = vmatpush3.bf16.msra.mxu1 %v1056_v58 }
  0x3a   :  { %986 = vmatprep.subr.bf16.mxu1 %v1059_v61 }
  0x3b   :  { %949 = vmatpush3.bf16.msra.mxu0 %v1057_v59 }
  0x3c   :  { %950 = vmatprep.subr.bf16.mxu0 %v1058_v60 }
  0x3d   :  { %987 = vmatpush3.bf16.msra.mxu1 %v1059_v61 }
  0x3e   :  { %988 = vmatprep.subr.bf16.mxu1 %v1064_v0 }
  0x3f   :  { %951 = vmatpush3.bf16.msra.mxu0 %v1060_v62 }
  0x41   :  { %989 = vmatpush3.bf16.msra.mxu1 %v1064_v0 }
  0x42   :  { %689 = vmatmul.mubr.bf16.vlgmr.msra.gmra.mrb[8].mxu0 %v1061_v2 }
  0x43   :  { %696 = vmatprep.mubr.bf16.mxu0 %v1067_v3 }
  0x44   :  { %991 = vmatmul.mubr.bf16.vlgmr.msra.gmra.mrb[8].mxu1 %v1066_v4 }
  0x4a   :  { %697 = vmatmul.mubr.bf16.gmra.mrb[12].mxu0 %v1069_v5 }
  0xf5   :  { %v896_v6 = vpop.f32.mrb[0].mxu0 }
  0xf6   :  { %v897_v8 = vpop.f32.mrb[1].mxu0 }
  0xf7   :  { %v898_v9 = vadd.f32 %v897_v8, %v896_v6  ;;  %v899_v10 = vpop.f32.mrb[2].mxu0  ;;  %v924_v11 = vpop.f32.mrb[0].mxu1 }
  0xf8   :  { %v900_v12 = vpop.f32.mrb[3].mxu0  ;;  %v925_v15 = vpop.f32.mrb[1].mxu1 }
  0xf9   :  { %v593_v13 = vadd.f32 %v898_v9, %v790_v7  ;;  %v901_v14 = vadd.f32 %v900_v12, %v899_v10  ;;  %v926_v16 = vadd.f32 %v925_v15, %v924_v11  ;;  %v927_v17 = vpop.f32.mrb[2].mxu1 }
  0xfa   :  { %v928_v19 = vpop.f32.mrb[3].mxu1 }
  0xfb   :  { %v596_v18 = vadd.f32 %v901_v14, %v790_v7  ;;  %v642_v20 = vadd.f32 %v926_v16, %v593_v13  ;;  %v929_v21 = vadd.f32 %v928_v19, %v927_v17 }
  0xfd   :  { %v645_v22 = vadd.f32 %v929_v21, %v596_v18  ;;  %v902_v23 = vpop.f32.mrb[4].mxu0 }
  0xfe   :  { %v903_v24 = vpop.f32.mrb[5].mxu0 }
  0xff   :  { %v904_v25 = vadd.f32 %v903_v24, %v902_v23  ;;  %v905_v26 = vpop.f32.mrb[6].mxu0  ;;  %v930_v27 = vpop.f32.mrb[4].mxu1 }
 0x100   :  { %v906_v28 = vpop.f32.mrb[7].mxu0  ;;  %v931_v31 = vpop.f32.mrb[5].mxu1 }
 0x101   :  { %v601_v29 = vadd.f32 %v904_v25, %v790_v7  ;;  %v907_v30 = vadd.f32 %v906_v28, %v905_v26  ;;  %v932_v32 = vadd.f32 %v931_v31, %v930_v27  ;;  %v933_v33 = vpop.f32.mrb[6].mxu1 }
 0x102   :  { %v934_v35 = vpop.f32.mrb[7].mxu1 }
 0x103   :  { %v604_v34 = vadd.f32 %v907_v30, %v790_v7  ;;  %v650_v36 = vadd.f32 %v932_v32, %v601_v29  ;;  %v935_v37 = vadd.f32 %v934_v35, %v933_v33 }
 0x105   :  { %v653_v38 = vadd.f32 %v935_v37, %v604_v34 }
 0x115   :  { %v952_v39 = vpop.f32.mrb[8].mxu0 }
 0x116   :  { %v953_v40 = vpop.f32.mrb[9].mxu0 }
 0x117   :  { %v954_v41 = vadd.f32 %v953_v40, %v952_v39  ;;  %v955_v42 = vpop.f32.mrb[10].mxu0  ;;  %v992_v44 = vpop.f32.mrb[8].mxu1 }
 0x118   :  { %v956_v43 = vpop.f32.mrb[11].mxu0  ;;  %v739_v47 = vpop.f32.mrb[9].mxu1 }
 0x119   :  { %v957_v45 = vadd.f32 %v956_v43, %v955_v42  ;;  %v691_v46 = vadd.f32 %v954_v41, %v642_v20  ;;  %v993_v48 = vpop.f32.mrb[10].mxu1 }
 0x11a   :  { %v742_v51 = vpop.f32.mrb[11].mxu1 }
 0x11b   :  { %v740_v49 = vadd.f32 %v739_v47, %v691_v46  ;;  %v694_v50 = vadd.f32 %v957_v45, %v645_v22 }
 0x11d   :  { %v758_v52 = vmul.f32 0.1, %v740_v49  ;;  %v743_v53 = vadd.f32 %v742_v51, %v694_v50  ;;  %v958_v54 = vpop.f32.mrb[12].mxu0  ;;  %vm754_vm0 = vcmp.gt.f32.partialorder %v740_v49, 0.0 }
 0x11e   :  { %v959_v55 = vpop.f32.mrb[13].mxu0 }
 0x11f   :  { %vm755_vm1 = vcmp.gt.f32.partialorder %v743_v53, 0.0  ;;  %v759_v56 = vmul.f32 0.1, %v743_v53  ;;  %v960_v57 = vadd.f32 %v959_v55, %v958_v54  ;;  %v961_v58 = vpop.f32.mrb[14].mxu0  ;;  %v762_v60 = vsel %vm754_vm0, %v740_v49, %v758_v52 }
 0x120   :  { %v962_v59 = vpop.f32.mrb[15].mxu0 }
 0x121   :  { %v763_v61 = vsel %vm755_vm1, %v743_v53, %v759_v56  ;;  %v699_v62 = vadd.f32 %v960_v57, %v650_v36  ;;  %v963_v63 = vadd.f32 %v962_v59, %v961_v58 }
 0x122   :  { %v872_v0 = vpack.c.bf16 %v763_v61, %v762_v60 }
 0x123   :  { %v748_v1 = vadd.f32 %v992_v44, %v699_v62  ;;  %v702_v2 = vadd.f32 %v963_v63, %v653_v38 }
 0x124   :  { %873 = vst [vmem:[%s1312_s3] sm:$0xff] %v872_v0  }
 0x125   :  { %v760_v3 = vmul.f32 0.1, %v748_v1  ;;  %v751_v4 = vadd.f32 %v993_v48, %v702_v2  ;;  %vm756_vm2 = vcmp.gt.f32.partialorder %v748_v1, 0.0 }
 0x127   :  { %vm757_vm3 = vcmp.gt.f32.partialorder %v751_v4, 0.0  ;;  %v761_v5 = vmul.f32 0.1, %v751_v4  ;;  %v764_v6 = vsel %vm756_vm2, %v748_v1, %v760_v3 }
 0x129   :  { %v765_v7 = vsel %vm757_vm3, %v751_v4, %v761_v5 }
 0x12a   :  { %v877_v8 = vpack.c.bf16 %v765_v7, %v764_v6 }
 0x12c   :  { %879 = vst [vmem:[%s1312_s3 + $0x8] sm:$0xff] %v877_v8  }

// kernel: flownets_forward.16
= control target key start
LH: loop header
LB: loop body
LE: loop exit
PB: predicated region body
PF: predicated region fallthrough
CT: control target
= control target key end

     0   :  { %s978_s1 = inlined_call_operand.vmem [shape: bf16[640,128], index: 1, kind: input, shape index: {}]   ;;  %s979_s0 = inlined_call_operand.vmem [shape: bf16[32,640], index: 0, kind: input, shape index: {}]   ;;  %s980_s2 = inlined_call_operand.vmem [shape: f32[1,128], index: 2, kind: input, shape index: {}]   ;;  %s981_s3 = inlined_call_operand.vmem [shape: bf16[32,128], index: 3, kind: output, shape index: {}]  }
   0x1   :  { %v745_v0 = vld [vmem:[%s978_s1 + $0x40] sm:$0xff]   ;;  %v749_v4 = vld [vmem:[%s978_s1 + $0x48] sm:$0xff]   ;;  %v753_v8 = vld [vmem:[%s978_s1 + $0x50] sm:$0xff]  }
   0x2   :  { %v746_v1 = vld [vmem:[%s978_s1] sm:$0xff]   ;;  %659 = vmatprep.subr.bf16.mxu0 %v745_v0  ;;  %v750_v5 = vld [vmem:[%s978_s1 + $0x8] sm:$0xff]   ;;  %v754_v9 = vld [vmem:[%s978_s1 + $0x10] sm:$0xff]  }
   0x3   :  { %v747_v2 = vld [vmem:[%s978_s1 + $0xc0] sm:$0xff]   ;;  %660 = vmatpush3.bf16.msra.mxu0 %v746_v1  ;;  %v751_v6 = vld [vmem:[%s978_s1 + $0xc8] sm:$0xff]   ;;  %v755_v10 = vld [vmem:[%s978_s1 + $0xd0] sm:$0xff]  }
   0x4   :  { %v748_v3 = vld [vmem:[%s978_s1 + $0x80] sm:$0xff]   ;;  %687 = vmatprep.subr.bf16.mxu1 %v747_v2  ;;  %661 = vmatprep.subr.bf16.mxu0 %v749_v4  ;;  %v752_v7 = vld [vmem:[%s978_s1 + $0x88] sm:$0xff]   ;;  %v756_v11 = vld [vmem:[%s978_s1 + $0x90] sm:$0xff]  }
   0x5   :  { %688 = vmatpush3.bf16.msra.mxu1 %v748_v3  ;;  %v757_v12 = vld [vmem:[%s978_s1 + $0x58] sm:$0xff]   ;;  %v761_v16 = vld [vmem:[%s978_s1 + $0x60] sm:$0xff]   ;;  %v765_v20 = vld [vmem:[%s978_s1 + $0x68] sm:$0xff]  }
   0x6   :  { %689 = vmatprep.subr.bf16.mxu1 %v751_v6  ;;  %v758_v13 = vld [vmem:[%s978_s1 + $0x18] sm:$0xff]   ;;  %v762_v17 = vld [vmem:[%s978_s1 + $0x20] sm:$0xff]   ;;  %v766_v21 = vld [vmem:[%s978_s1 + $0x28] sm:$0xff]  }
   0x7   :  { %662 = vmatpush3.bf16.msra.mxu0 %v750_v5  ;;  %v759_v14 = vld [vmem:[%s978_s1 + $0xd8] sm:$0xff]   ;;  %v763_v18 = vld [vmem:[%s978_s1 + $0xe0] sm:$0xff]   ;;  %v767_v22 = vld [vmem:[%s978_s1 + $0xe8] sm:$0xff]  }
   0x8   :  { %663 = vmatprep.subr.bf16.mxu0 %v753_v8  ;;  %v760_v15 = vld [vmem:[%s978_s1 + $0x98] sm:$0xff]   ;;  %v764_v19 = vld [vmem:[%s978_s1 + $0xa0] sm:$0xff]   ;;  %v768_v23 = vld [vmem:[%s978_s1 + $0xa8] sm:$0xff]  }
   0x9   :  { %690 = vmatpush3.bf16.msra.mxu1 %v752_v7  ;;  %v769_v24 = vld [vmem:[%s978_s1 + $0x70] sm:$0xff]   ;;  %v773_v28 = vld [vmem:[%s978_s1 + $0x78] sm:$0xff]   ;;  %v780_v34 = vld [vmem:[%s978_s1 + $0x100] sm:$0xff]  }
   0xa   :  { %691 = vmatprep.subr.bf16.mxu1 %v755_v10  ;;  %v770_v25 = vld [vmem:[%s978_s1 + $0x30] sm:$0xff]   ;;  %v774_v29 = vld [vmem:[%s978_s1 + $0x38] sm:$0xff]   ;;  %v783_v36 = vld [vmem:[%s979_s0 + $0xc] ss:$20 sps:$4 sm:$0xff]  }
   0xb   :  { %664 = vmatpush3.bf16.msra.mxu0 %v754_v9  ;;  %v771_v26 = vld [vmem:[%s978_s1 + $0xf0] sm:$0xff]   ;;  %v775_v30 = vld [vmem:[%s978_s1 + $0xf8] sm:$0xff]   ;;  %v784_v37 = vld [vmem:[%s978_s1 + $0x108] sm:$0xff]   ;;  %487 = vmatprep.mubr.bf16.mxu1 %v783_v36 }
   0xc   :  { %665 = vmatprep.subr.bf16.mxu0 %v757_v12  ;;  %v772_v27 = vld [vmem:[%s978_s1 + $0xb0] sm:$0xff]   ;;  %v778_v32 = vld [vmem:[%s979_s0 + $0x4] ss:$20 sps:$4 sm:$0xff]   ;;  %v781_v35 = vld [vmem:[%s979_s0 + $0x8] ss:$20 sps:$4 sm:$0xff]  }
   0xd   :  { %692 = vmatpush3.bf16.msra.mxu1 %v756_v11  ;;  %v776_v31 = vld [vmem:[%s979_s0] ss:$20 sps:$4 sm:$0xff]   ;;  %v779_v33 = vld [vmem:[%s978_s1 + $0xb8] sm:$0xff]   ;;  %438 = vmatprep.mubr.bf16.mxu0 %v778_v32  ;;  %v794_v43 = vld [vmem:[%s979_s0 + $0x30] ss:$20 sps:$4 sm:$0xff]  }
   0xe   :  { %693 = vmatprep.subr.bf16.mxu1 %v759_v14  ;;  %v785_v38 = vld [vmem:[%s978_s1 + $0x110] sm:$0xff]   ;;  %v788_v39 = vld [vmem:[%s979_s0 + $0x2c] ss:$20 sps:$4 sm:$0xff]   ;;  %v786_v40 = vld [vmem:[%s978_s1 + $0x118] sm:$0xff]  }
   0xf   :  { %666 = vmatpush3.bf16.msra.mxu0 %v758_v13  ;;  %v791_v41 = vld [vmem:[%s979_s0 + $0x28] ss:$20 sps:$4 sm:$0xff]   ;;  %v787_v44 = vld [vmem:[%s978_s1 + $0x120] sm:$0xff]   ;;  %v795_v47 = vld [vmem:[%s978_s1 + $0x130] sm:$0xff]  }
  0x10   :  { %667 = vmatprep.subr.bf16.mxu0 %v761_v16  ;;  %v792_v42 = vld [vmem:[%s979_s0 + $0x34] ss:$20 sps:$4 sm:$0xff]   ;;  %v797_v45 = vld [vmem:[%s979_s0 + $0x10] ss:$20 sps:$4 sm:$0xff]   ;;  %v796_v48 = vld [vmem:[%s978_s1 + $0x138] sm:$0xff]  }
  0x11   :  { %694 = vmatpush3.bf16.msra.mxu1 %v760_v15  ;;  %v790_v46 = vld [vmem:[%s978_s1 + $0x128] sm:$0xff]   ;;  %v589_v51 = vld [vmem:[%s980_s2] ss:$0 sm:$0xff] }
  0x12   :  { %695 = vmatprep.subr.bf16.mxu1 %v763_v18  ;;  %v798_v49 = vld [vmem:[%s979_s0 + $0x38] ss:$20 sps:$4 sm:$0xff]  }
  0x13   :  { %668 = vmatpush3.bf16.msra.mxu0 %v762_v17 }
  0x14   :  { %669 = vmatprep.subr.bf16.mxu0 %v765_v20 }
  0x15   :  { %696 = vmatpush3.bf16.msra.mxu1 %v764_v19 }
  0x16   :  { %697 = vmatprep.subr.bf16.mxu1 %v767_v22 }
  0x17   :  { %670 = vmatpush3.bf16.msra.mxu0 %v766_v21 }
  0x18   :  { %671 = vmatprep.subr.bf16.mxu0 %v769_v24 }
  0x19   :  { %698 = vmatpush3.bf16.msra.mxu1 %v768_v23 }
  0x1a   :  { %699 = vmatprep.subr.bf16.mxu1 %v771_v26 }
  0x1b   :  { %672 = vmatpush3.bf16.msra.mxu0 %v770_v25 }
  0x1c   :  { %673 = vmatprep.subr.bf16.mxu0 %v773_v28 }
  0x1d   :  { %700 = vmatpush3.bf16.msra.mxu1 %v772_v27 }
  0x1e   :  { %701 = vmatprep.subr.bf16.mxu1 %v775_v30 }
  0x1f   :  { %674 = vmatpush3.bf16.msra.mxu0 %v774_v29 }
  0x20   :  { %725 = vmatprep.subr.bf16.mxu0 %v780_v34 }
  0x21   :  { %702 = vmatpush3.bf16.msra.mxu1 %v779_v33 }
  0x22   :  { %439 = vmatmul.mubr.bf16.vlgmr.msra.gmra.mrb[0].mxu0 %v776_v31 }
  0x23   :  { %726 = vmatpush3.bf16.msra.mxu0 %v780_v34  ;;  %446 = vmatprep.mubr.bf16.mxu0 %v788_v39 }
  0x24   :  { %488 = vmatmul.mubr.bf16.vlgmr.msra.gmra.mrb[0].mxu1 %v781_v35  ;;  %727 = vmatprep.subr.bf16.mxu0 %v784_v37 }
  0x25   :  { %495 = vmatprep.mubr.bf16.mxu1 %v792_v42 }
  0x27   :  { %728 = vmatpush3.bf16.msra.mxu0 %v784_v37 }
  0x28   :  { %729 = vmatprep.subr.bf16.mxu0 %v785_v38 }
  0x2a   :  { %447 = vmatmul.mubr.bf16.gmra.mrb[4].mxu0 %v791_v41 }
  0x2b   :  { %730 = vmatpush3.bf16.msra.mxu0 %v785_v38  ;;  %741 = vmatprep.mubr.bf16.mxu0 %v797_v45 }
  0x2c   :  { %731 = vmatprep.subr.bf16.mxu0 %v786_v40  ;;  %496 = vmatmul.mubr.bf16.gmra.mrb[4].mxu1 %v794_v43 }
  0x2f   :  { %732 = vmatpush3.bf16.msra.mxu0 %v786_v40 }
  0x30   :  { %733 = vmatprep.subr.bf16.mxu0 %v787_v44 }
  0x33   :  { %734 = vmatpush3.bf16.msra.mxu0 %v787_v44 }
  0x34   :  { %735 = vmatprep.subr.bf16.mxu0 %v790_v46 }
  0x37   :  { %736 = vmatpush3.bf16.msra.mxu0 %v790_v46 }
  0x38   :  { %737 = vmatprep.subr.bf16.mxu0 %v795_v47 }
  0x3b   :  { %738 = vmatpush3.bf16.msra.mxu0 %v795_v47 }
  0x3c   :  { %739 = vmatprep.subr.bf16.mxu0 %v796_v48 }
  0x3f   :  { %740 = vmatpush3.bf16.msra.mxu0 %v796_v48 }
  0x42   :  { %742 = vmatmul.mubr.bf16.vlgmr.msra.gmra.mrb[8].mxu0 %v798_v49 }
  0xf5   :  { %v675_v50 = vpop.f32.mrb[0].mxu0 }
  0xf6   :  { %v676_v52 = vpop.f32.mrb[1].mxu0 }
  0xf7   :  { %v677_v53 = vadd.f32 %v676_v52, %v675_v50  ;;  %v678_v54 = vpop.f32.mrb[2].mxu0  ;;  %v703_v55 = vpop.f32.mrb[0].mxu1 }
  0xf8   :  { %v679_v56 = vpop.f32.mrb[3].mxu0  ;;  %v704_v59 = vpop.f32.mrb[1].mxu1 }
  0xf9   :  { %v441_v57 = vadd.f32 %v677_v53, %v589_v51  ;;  %v680_v58 = vadd.f32 %v679_v56, %v678_v54  ;;  %v705_v60 = vadd.f32 %v704_v59, %v703_v55  ;;  %v706_v61 = vpop.f32.mrb[2].mxu1 }
  0xfa   :  { %v707_v63 = vpop.f32.mrb[3].mxu1 }
  0xfb   :  { %v444_v62 = vadd.f32 %v680_v58, %v589_v51  ;;  %v708_v0 = vadd.f32 %v707_v63, %v706_v61  ;;  %v490_v1 = vadd.f32 %v705_v60, %v441_v57 }
  0xfd   :  { %v681_v2 = vpop.f32.mrb[4].mxu0  ;;  %v493_v4 = vadd.f32 %v708_v0, %v444_v62 }
  0xfe   :  { %v682_v3 = vpop.f32.mrb[5].mxu0 }
  0xff   :  { %v683_v5 = vadd.f32 %v682_v3, %v681_v2  ;;  %v684_v6 = vpop.f32.mrb[6].mxu0  ;;  %v709_v7 = vpop.f32.mrb[4].mxu1 }
 0x100   :  { %v685_v8 = vpop.f32.mrb[7].mxu0  ;;  %v710_v11 = vpop.f32.mrb[5].mxu1 }
 0x101   :  { %v449_v9 = vadd.f32 %v683_v5, %v589_v51  ;;  %v686_v10 = vadd.f32 %v685_v8, %v684_v6  ;;  %v711_v12 = vadd.f32 %v710_v11, %v709_v7  ;;  %v712_v13 = vpop.f32.mrb[6].mxu1 }
 0x102   :  { %v713_v15 = vpop.f32.mrb[7].mxu1 }
 0x103   :  { %v452_v14 = vadd.f32 %v686_v10, %v589_v51  ;;  %v714_v16 = vadd.f32 %v713_v15, %v712_v13  ;;  %v498_v17 = vadd.f32 %v711_v12, %v449_v9 }
 0x105   :  { %v501_v18 = vadd.f32 %v714_v16, %v452_v14 }
 0x115   :  { %v743_v19 = vpop.f32.mrb[8].mxu0 }
 0x116   :  { %v547_v20 = vadd.f32 %v743_v19, %v498_v17  ;;  %v538_v21 = vpop.f32.mrb[9].mxu0 }
 0x117   :  { %v539_v22 = vadd.f32 %v538_v21, %v490_v1  ;;  %v744_v23 = vpop.f32.mrb[10].mxu0 }
 0x118   :  { %v559_v24 = vmul.f32 0.1, %v547_v20  ;;  %v550_v25 = vadd.f32 %v744_v23, %v501_v18  ;;  %v541_v26 = vpop.f32.mrb[11].mxu0  ;;  %vm555_vm0 = vcmp.gt.f32.partialorder %v547_v20, 0.0 }
 0x119   :  { %v557_v27 = vmul.f32 0.1, %v539_v22  ;;  %v542_v28 = vadd.f32 %v541_v26, %v493_v4  ;;  %vm553_vm1 = vcmp.gt.f32.partialorder %v539_v22, 0.0 }
 0x11a   :  { %vm556_vm2 = vcmp.gt.f32.partialorder %v550_v25, 0.0  ;;  %v560_v29 = vmul.f32 0.1, %v550_v25  ;;  %v563_v31 = vsel %vm555_vm0, %v547_v20, %v559_v24 }
 0x11b   :  { %vm554_vm3 = vcmp.gt.f32.partialorder %v542_v28, 0.0  ;;  %v558_v30 = vmul.f32 0.1, %v542_v28  ;;  %v561_v33 = vsel %vm553_vm1, %v539_v22, %v557_v27 }
 0x11c   :  { %v564_v32 = vsel %vm556_vm2, %v550_v25, %v560_v29 }
 0x11d   :  { %v656_v34 = vpack.c.bf16 %v564_v32, %v563_v31  ;;  %v562_v35 = vsel %vm554_vm3, %v542_v28, %v558_v30 }
 0x11e   :  { %v651_v36 = vpack.c.bf16 %v562_v35, %v561_v33 }
 0x11f   :  { %658 = vst [vmem:[%s981_s3 + $0x8] sm:$0xff] %v656_v34  }
 0x120   :  { %652 = vst [vmem:[%s981_s3] sm:$0xff] %v651_v36  }

// kernel: flownets_forward.17
= control target key start
LH: loop header
LB: loop body
LE: loop exit
PB: predicated region body
PF: predicated region fallthrough
CT: control target
= control target key end

     0   :  { %v694_v33 = vmov 0.0   ;;  %vm695_vm0 = vmmov 0   ;;  %s857_s1 = inlined_call_operand.vmem [shape: bf16[640,128], index: 1, kind: input, shape index: {}]   ;;  %s858_s0 = inlined_call_operand.vmem [shape: bf16[16,640], index: 0, kind: input, shape index: {}]   ;;  %s859_s2 = inlined_call_operand.vmem [shape: f32[1,128], index: 2, kind: input, shape index: {}]   ;;  %s860_s3 = inlined_call_operand.vmem [shape: bf16[16,128], index: 3, kind: output, shape index: {}]  }
   0x1   :  { %v647_v0 = vld [vmem:[%s857_s1 + $0x40] sm:$0xff]   ;;  %v651_v4 = vld [vmem:[%s857_s1 + $0x48] sm:$0xff]   ;;  %v655_v8 = vld [vmem:[%s857_s1 + $0x50] sm:$0xff]  }
   0x2   :  { %v648_v1 = vld [vmem:[%s857_s1] sm:$0xff]   ;;  %572 = vmatprep.subr.bf16.mxu0 %v647_v0  ;;  %v652_v5 = vld [vmem:[%s857_s1 + $0x8] sm:$0xff]   ;;  %v656_v9 = vld [vmem:[%s857_s1 + $0x10] sm:$0xff]  }
   0x3   :  { %v649_v2 = vld [vmem:[%s857_s1 + $0xc0] sm:$0xff]   ;;  %573 = vmatpush3.bf16.msra.mxu0 %v648_v1  ;;  %v653_v6 = vld [vmem:[%s857_s1 + $0xc8] sm:$0xff]   ;;  %v657_v10 = vld [vmem:[%s857_s1 + $0xd0] sm:$0xff]  }
   0x4   :  { %v650_v3 = vld [vmem:[%s857_s1 + $0x80] sm:$0xff]   ;;  %594 = vmatprep.subr.bf16.mxu1 %v649_v2  ;;  %574 = vmatprep.subr.bf16.mxu0 %v651_v4  ;;  %v654_v7 = vld [vmem:[%s857_s1 + $0x88] sm:$0xff]   ;;  %v658_v11 = vld [vmem:[%s857_s1 + $0x90] sm:$0xff]  }
   0x5   :  { %595 = vmatpush3.bf16.msra.mxu1 %v650_v3  ;;  %v659_v12 = vld [vmem:[%s857_s1 + $0x58] sm:$0xff]   ;;  %v663_v16 = vld [vmem:[%s857_s1 + $0x60] sm:$0xff]   ;;  %v667_v20 = vld [vmem:[%s857_s1 + $0x68] sm:$0xff]  }
   0x6   :  { %596 = vmatprep.subr.bf16.mxu1 %v653_v6  ;;  %v660_v13 = vld [vmem:[%s857_s1 + $0x18] sm:$0xff]   ;;  %v664_v17 = vld [vmem:[%s857_s1 + $0x20] sm:$0xff]   ;;  %v668_v21 = vld [vmem:[%s857_s1 + $0x28] sm:$0xff]  }
   0x7   :  { %575 = vmatpush3.bf16.msra.mxu0 %v652_v5  ;;  %v661_v14 = vld [vmem:[%s857_s1 + $0xd8] sm:$0xff]   ;;  %v665_v18 = vld [vmem:[%s857_s1 + $0xe0] sm:$0xff]   ;;  %v669_v22 = vld [vmem:[%s857_s1 + $0xe8] sm:$0xff]  }
   0x8   :  { %576 = vmatprep.subr.bf16.mxu0 %v655_v8  ;;  %v662_v15 = vld [vmem:[%s857_s1 + $0x98] sm:$0xff]   ;;  %v666_v19 = vld [vmem:[%s857_s1 + $0xa0] sm:$0xff]   ;;  %v670_v23 = vld [vmem:[%s857_s1 + $0xa8] sm:$0xff]  }
   0x9   :  { %597 = vmatpush3.bf16.msra.mxu1 %v654_v7  ;;  %v671_v24 = vld [vmem:[%s857_s1 + $0x70] sm:$0xff]   ;;  %v675_v28 = vld [vmem:[%s857_s1 + $0x78] sm:$0xff]   ;;  %v684_v36 = vld [vmem:[%s858_s0 + $0xc] ss:$20 sps:$4 sm:$0xff]  }
   0xa   :  { %598 = vmatprep.subr.bf16.mxu1 %v657_v10  ;;  %v672_v25 = vld [vmem:[%s857_s1 + $0x30] sm:$0xff]   ;;  %v676_v29 = vld [vmem:[%s857_s1 + $0x38] sm:$0xff]   ;;  %v685_v37 = vld [vmem:[%s857_s1 + $0x100] sm:$0xff]   ;;  %447 = vmatprep.mubr.bf16.mxu1 %v684_v36 }
   0xb   :  { %577 = vmatpush3.bf16.msra.mxu0 %v656_v9  ;;  %v673_v26 = vld [vmem:[%s857_s1 + $0xf0] sm:$0xff]   ;;  %v677_v30 = vld [vmem:[%s857_s1 + $0xf8] sm:$0xff]   ;;  %v686_v38 = vld [vmem:[%s857_s1 + $0x108] sm:$0xff]  }
   0xc   :  { %578 = vmatprep.subr.bf16.mxu0 %v659_v12  ;;  %v674_v27 = vld [vmem:[%s857_s1 + $0xb0] sm:$0xff]   ;;  %v680_v32 = vld [vmem:[%s858_s0 + $0x4] ss:$20 sps:$4 sm:$0xff]   ;;  %v682_v35 = vld [vmem:[%s858_s0 + $0x8] ss:$20 sps:$4 sm:$0xff]  }
   0xd   :  { %599 = vmatpush3.bf16.msra.mxu1 %v658_v11  ;;  %v678_v31 = vld [vmem:[%s858_s0] ss:$20 sps:$4 sm:$0xff]   ;;  %v681_v34 = vld [vmem:[%s857_s1 + $0xb8] sm:$0xff]   ;;  %406 = vmatprep.mubr.bf16.mxu0 %v680_v32  ;;  %v690_v42 = vld [vmem:[%s857_s1 + $0x128] sm:$0xff]  }
   0xe   :  { %600 = vmatprep.subr.bf16.mxu1 %v661_v14  ;;  %v687_v39 = vld [vmem:[%s857_s1 + $0x110] sm:$0xff]   ;;  %v688_v40 = vld [vmem:[%s857_s1 + $0x118] sm:$0xff]   ;;  %v689_v41 = vld [vmem:[%s857_s1 + $0x120] sm:$0xff]  }
   0xf   :  { %579 = vmatpush3.bf16.msra.mxu0 %v660_v13  ;;  %v691_v43 = vld [vmem:[%s857_s1 + $0x130] sm:$0xff]   ;;  %v692_v44 = vld [vmem:[%s857_s1 + $0x138] sm:$0xff]   ;;  %v517_v47 = vld [vmem:[%s859_s2] ss:$0 sm:$0xff] }
  0x10   :  { %580 = vmatprep.subr.bf16.mxu0 %v663_v16  ;;  %v693_v45 = vld [vmem:[%s858_s0 + $0x10] ss:$20 sps:$4 sm:$0xff]  }
  0x11   :  { %601 = vmatpush3.bf16.msra.mxu1 %v662_v15 }
  0x12   :  { %602 = vmatprep.subr.bf16.mxu1 %v665_v18 }
  0x13   :  { %581 = vmatpush3.bf16.msra.mxu0 %v664_v17 }
  0x14   :  { %582 = vmatprep.subr.bf16.mxu0 %v667_v20 }
  0x15   :  { %603 = vmatpush3.bf16.msra.mxu1 %v666_v19 }
  0x16   :  { %604 = vmatprep.subr.bf16.mxu1 %v669_v22 }
  0x17   :  { %583 = vmatpush3.bf16.msra.mxu0 %v668_v21 }
  0x18   :  { %584 = vmatprep.subr.bf16.mxu0 %v671_v24 }
  0x19   :  { %605 = vmatpush3.bf16.msra.mxu1 %v670_v23 }
  0x1a   :  { %606 = vmatprep.subr.bf16.mxu1 %v673_v26 }
  0x1b   :  { %585 = vmatpush3.bf16.msra.mxu0 %v672_v25 }
  0x1c   :  { %586 = vmatprep.subr.bf16.mxu0 %v675_v28 }
  0x1d   :  { %607 = vmatpush3.bf16.msra.mxu1 %v674_v27 }
  0x1e   :  { %608 = vmatprep.subr.bf16.mxu1 %v677_v30 }
  0x1f   :  { %587 = vmatpush3.bf16.msra.mxu0 %v676_v29 }
  0x20   :  { %625 = vmatprep.subr.bf16.mxu0 %v694_v33 }
  0x21   :  { %609 = vmatpush3.bf16.msra.mxu1 %v681_v34 }
  0x22   :  { %407 = vmatmul.mubr.bf16.vlgmr.msra.gmra.mrb[0].mxu0 %v678_v31 }
  0x23   :  { %641 = vmatprep.mubr.msk.bf16.mxu0 %vm695_vm0, %v694_v33  ;;  %626 = vmatpush3.bf16.msra.mxu0 %v685_v37 }
  0x24   :  { %448 = vmatmul.mubr.bf16.vlgmr.msra.gmra.mrb[0].mxu1 %v682_v35  ;;  %627 = vmatprep.subr.bf16.mxu0 %v694_v33 }
  0x27   :  { %628 = vmatpush3.bf16.msra.mxu0 %v686_v38 }
  0x28   :  { %629 = vmatprep.subr.bf16.mxu0 %v694_v33 }
  0x2b   :  { %630 = vmatpush3.bf16.msra.mxu0 %v687_v39 }
  0x2c   :  { %631 = vmatprep.subr.bf16.mxu0 %v694_v33 }
  0x2f   :  { %632 = vmatpush3.bf16.msra.mxu0 %v688_v40 }
  0x30   :  { %633 = vmatprep.subr.bf16.mxu0 %v694_v33 }
  0x33   :  { %634 = vmatpush3.bf16.msra.mxu0 %v689_v41 }
  0x34   :  { %635 = vmatprep.subr.bf16.mxu0 %v694_v33 }
  0x37   :  { %636 = vmatpush3.bf16.msra.mxu0 %v690_v42 }
  0x38   :  { %637 = vmatprep.subr.bf16.mxu0 %v694_v33 }
  0x3b   :  { %638 = vmatpush3.bf16.msra.mxu0 %v691_v43 }
  0x3c   :  { %639 = vmatprep.subr.bf16.mxu0 %v694_v33 }
  0x3f   :  { %640 = vmatpush3.bf16.msra.mxu0 %v692_v44 }
  0x42   :  { %642 = vmatmul.mubr.bf16.vlgmr.msra.gmra.mrb[4].mxu0 %v693_v45 }
  0xf5   :  { %v588_v46 = vpop.f32.mrb[0].mxu0 }
  0xf6   :  { %v589_v48 = vpop.f32.mrb[1].mxu0 }
  0xf7   :  { %v590_v49 = vadd.f32 %v589_v48, %v588_v46  ;;  %v591_v50 = vpop.f32.mrb[2].mxu0  ;;  %v610_v51 = vpop.f32.mrb[0].mxu1 }
  0xf8   :  { %v592_v52 = vpop.f32.mrb[3].mxu0  ;;  %v611_v55 = vpop.f32.mrb[1].mxu1 }
  0xf9   :  { %v409_v53 = vadd.f32 %v590_v49, %v517_v47  ;;  %v593_v54 = vadd.f32 %v592_v52, %v591_v50  ;;  %v612_v56 = vadd.f32 %v611_v55, %v610_v51  ;;  %v613_v57 = vpop.f32.mrb[2].mxu1 }
  0xfa   :  { %v614_v59 = vpop.f32.mrb[3].mxu1 }
  0xfb   :  { %v412_v58 = vadd.f32 %v593_v54, %v517_v47  ;;  %v615_v60 = vadd.f32 %v614_v59, %v613_v57  ;;  %v450_v61 = vadd.f32 %v612_v56, %v409_v53 }
  0xfd   :  { %v453_v62 = vadd.f32 %v615_v60, %v412_v58 }
 0x115   :  { %v490_v63 = vpop.f32.mrb[4].mxu0 }
 0x116   :  { %v491_v0 = vadd.f32 %v490_v63, %v450_v61  ;;  %v643_v1 = vpop.f32.mrb[5].mxu0 }
 0x117   :  { %v493_v2 = vpop.f32.mrb[6].mxu0 }
 0x118   :  { %v499_v3 = vmul.f32 0.1, %v491_v0  ;;  %v494_v4 = vadd.f32 %v493_v2, %v453_v62  ;;  %v644_v5 = vpop.f32.mrb[7].mxu0  ;;  %vm497_vm1 = vcmp.gt.f32.partialorder %v491_v0, 0.0 }
 0x11a   :  { %vm498_vm2 = vcmp.gt.f32.partialorder %v494_v4, 0.0  ;;  %v500_v6 = vmul.f32 0.1, %v494_v4  ;;  %v501_v7 = vsel %vm497_vm1, %v491_v0, %v499_v3 }
 0x11c   :  { %v502_v8 = vsel %vm498_vm2, %v494_v4, %v500_v6 }
 0x11d   :  { %v570_v9 = vpack.c.bf16 %v502_v8, %v501_v7 }
 0x11f   :  { %571 = vst [vmem:[%s860_s3] sm:$0xff] %v570_v9  }

// kernel: flownets_forward.19
= control target key start
LH: loop header
LB: loop body
LE: loop exit
PB: predicated region body
PF: predicated region fallthrough
CT: control target
= control target key end

     0   :  { %vm1169_vm0 = vmmov 0   ;;  %s1439_s1 = inlined_call_operand.vmem [shape: bf16[1152,128], index: 1, kind: input, shape index: {}]   ;;  %s1440_s0 = inlined_call_operand.vmem [shape: bf16[16,1152], index: 0, kind: input, shape index: {}]   ;;  %s1441_s2 = inlined_call_operand.vmem [shape: f32[1,128], index: 2, kind: input, shape index: {}]   ;;  %s1442_s3 = inlined_call_operand.vmem [shape: bf16[16,128], index: 3, kind: output, shape index: {}]  }
   0x1   :  { %v1083_v0 = vld [vmem:[%s1439_s1 + $0x40] sm:$0xff]   ;;  %v1087_v4 = vld [vmem:[%s1439_s1 + $0x48] sm:$0xff]   ;;  %v1091_v8 = vld [vmem:[%s1439_s1 + $0x50] sm:$0xff]  }
   0x2   :  { %v1084_v1 = vld [vmem:[%s1439_s1] sm:$0xff]   ;;  %964 = vmatprep.subr.bf16.mxu0 %v1083_v0  ;;  %v1088_v5 = vld [vmem:[%s1439_s1 + $0x8] sm:$0xff]   ;;  %v1092_v9 = vld [vmem:[%s1439_s1 + $0x10] sm:$0xff]  }
   0x3   :  { %v1085_v2 = vld [vmem:[%s1439_s1 + $0xc0] sm:$0xff]   ;;  %965 = vmatpush3.bf16.msra.mxu0 %v1084_v1  ;;  %v1089_v6 = vld [vmem:[%s1439_s1 + $0xc8] sm:$0xff]   ;;  %v1093_v10 = vld [vmem:[%s1439_s1 + $0xd0] sm:$0xff]  }
   0x4   :  { %v1086_v3 = vld [vmem:[%s1439_s1 + $0x80] sm:$0xff]   ;;  %986 = vmatprep.subr.bf16.mxu1 %v1085_v2  ;;  %966 = vmatprep.subr.bf16.mxu0 %v1087_v4  ;;  %v1090_v7 = vld [vmem:[%s1439_s1 + $0x88] sm:$0xff]   ;;  %v1094_v11 = vld [vmem:[%s1439_s1 + $0x90] sm:$0xff]  }
   0x5   :  { %987 = vmatpush3.bf16.msra.mxu1 %v1086_v3  ;;  %v1095_v12 = vld [vmem:[%s1439_s1 + $0x58] sm:$0xff]   ;;  %v1099_v16 = vld [vmem:[%s1439_s1 + $0x60] sm:$0xff]   ;;  %v1103_v20 = vld [vmem:[%s1439_s1 + $0x68] sm:$0xff]  }
   0x6   :  { %988 = vmatprep.subr.bf16.mxu1 %v1089_v6  ;;  %v1096_v13 = vld [vmem:[%s1439_s1 + $0x18] sm:$0xff]   ;;  %v1100_v17 = vld [vmem:[%s1439_s1 + $0x20] sm:$0xff]   ;;  %v1104_v21 = vld [vmem:[%s1439_s1 + $0x28] sm:$0xff]   ;;  %v1168_v6 = vmov 0.0  }
   0x7   :  { %967 = vmatpush3.bf16.msra.mxu0 %v1088_v5  ;;  %v1097_v14 = vld [vmem:[%s1439_s1 + $0xd8] sm:$0xff]   ;;  %v1101_v18 = vld [vmem:[%s1439_s1 + $0xe0] sm:$0xff]   ;;  %v1105_v22 = vld [vmem:[%s1439_s1 + $0xe8] sm:$0xff]  }
   0x8   :  { %968 = vmatprep.subr.bf16.mxu0 %v1091_v8  ;;  %v1098_v15 = vld [vmem:[%s1439_s1 + $0x98] sm:$0xff]   ;;  %v1102_v19 = vld [vmem:[%s1439_s1 + $0xa0] sm:$0xff]   ;;  %v1106_v23 = vld [vmem:[%s1439_s1 + $0xa8] sm:$0xff]  }
   0x9   :  { %989 = vmatpush3.bf16.msra.mxu1 %v1090_v7  ;;  %v1107_v24 = vld [vmem:[%s1439_s1 + $0x70] sm:$0xff]   ;;  %v1111_v28 = vld [vmem:[%s1439_s1 + $0x78] sm:$0xff]   ;;  %v1114_v31 = vld [vmem:[%s1440_s0] ss:$36 sps:$4 sm:$0xff]  }
   0xa   :  { %990 = vmatprep.subr.bf16.mxu1 %v1093_v10  ;;  %v1108_v25 = vld [vmem:[%s1439_s1 + $0x30] sm:$0xff]   ;;  %v1112_v29 = vld [vmem:[%s1439_s1 + $0x38] sm:$0xff]   ;;  %v1116_v32 = vld [vmem:[%s1440_s0 + $0x4] ss:$36 sps:$4 sm:$0xff]  }
   0xb   :  { %969 = vmatpush3.bf16.msra.mxu0 %v1092_v9  ;;  %v1109_v26 = vld [vmem:[%s1439_s1 + $0xf0] sm:$0xff]   ;;  %v1113_v30 = vld [vmem:[%s1439_s1 + $0xf8] sm:$0xff]   ;;  %686 = vmatprep.mubr.bf16.mxu0 %v1116_v32  ;;  %v1118_v34 = vld [vmem:[%s1439_s1 + $0x140] sm:$0xff]  }
   0xc   :  { %970 = vmatprep.subr.bf16.mxu0 %v1095_v12  ;;  %v1110_v27 = vld [vmem:[%s1439_s1 + $0xb0] sm:$0xff]   ;;  %v1117_v33 = vld [vmem:[%s1439_s1 + $0xb8] sm:$0xff]   ;;  %v1119_v35 = vld [vmem:[%s1440_s0 + $0x8] ss:$36 sps:$4 sm:$0xff]  }
   0xd   :  { %991 = vmatpush3.bf16.msra.mxu1 %v1094_v11  ;;  %v1121_v36 = vld [vmem:[%s1440_s0 + $0xc] ss:$36 sps:$4 sm:$0xff]   ;;  %v1122_v37 = vld [vmem:[%s1439_s1 + $0x100] sm:$0xff]   ;;  %v1133_v48 = vld [vmem:[%s1439_s1 + $0x158] sm:$0xff]  }
   0xe   :  { %992 = vmatprep.subr.bf16.mxu1 %v1097_v14  ;;  %727 = vmatprep.mubr.bf16.mxu1 %v1121_v36  ;;  %v1123_v38 = vld [vmem:[%s1439_s1 + $0x1c0] sm:$0xff]   ;;  %v1125_v40 = vld [vmem:[%s1439_s1 + $0x148] sm:$0xff]   ;;  %v1129_v44 = vld [vmem:[%s1439_s1 + $0x150] sm:$0xff]  }
   0xf   :  { %971 = vmatpush3.bf16.msra.mxu0 %v1096_v13  ;;  %v1124_v39 = vld [vmem:[%s1439_s1 + $0x180] sm:$0xff]   ;;  %v1126_v41 = vld [vmem:[%s1439_s1 + $0x108] sm:$0xff]   ;;  %v1130_v45 = vld [vmem:[%s1439_s1 + $0x110] sm:$0xff]  }
  0x10   :  { %972 = vmatprep.subr.bf16.mxu0 %v1099_v16  ;;  %v1127_v42 = vld [vmem:[%s1439_s1 + $0x1c8] sm:$0xff]   ;;  %v1131_v46 = vld [vmem:[%s1439_s1 + $0x1d0] sm:$0xff]   ;;  %v1134_v49 = vld [vmem:[%s1439_s1 + $0x118] sm:$0xff]  }
  0x11   :  { %993 = vmatpush3.bf16.msra.mxu1 %v1098_v15  ;;  %v1128_v43 = vld [vmem:[%s1439_s1 + $0x188] sm:$0xff]   ;;  %v1132_v47 = vld [vmem:[%s1439_s1 + $0x190] sm:$0xff]   ;;  %v1135_v50 = vld [vmem:[%s1439_s1 + $0x1d8] sm:$0xff]  }
  0x12   :  { %994 = vmatprep.subr.bf16.mxu1 %v1101_v18  ;;  %v1136_v51 = vld [vmem:[%s1439_s1 + $0x198] sm:$0xff]   ;;  %v1137_v52 = vld [vmem:[%s1439_s1 + $0x160] sm:$0xff]   ;;  %v1141_v56 = vld [vmem:[%s1439_s1 + $0x168] sm:$0xff]  }
  0x13   :  { %973 = vmatpush3.bf16.msra.mxu0 %v1100_v17  ;;  %v1138_v53 = vld [vmem:[%s1439_s1 + $0x120] sm:$0xff]   ;;  %v1142_v57 = vld [vmem:[%s1439_s1 + $0x128] sm:$0xff]   ;;  %v1145_v60 = vld [vmem:[%s1439_s1 + $0x170] sm:$0xff]  }
  0x14   :  { %974 = vmatprep.subr.bf16.mxu0 %v1103_v20  ;;  %v1139_v54 = vld [vmem:[%s1439_s1 + $0x1e0] sm:$0xff]   ;;  %v1143_v58 = vld [vmem:[%s1439_s1 + $0x1e8] sm:$0xff]   ;;  %v1146_v61 = vld [vmem:[%s1439_s1 + $0x130] sm:$0xff]  }
  0x15   :  { %995 = vmatpush3.bf16.msra.mxu1 %v1102_v19  ;;  %v1140_v55 = vld [vmem:[%s1439_s1 + $0x1a0] sm:$0xff]   ;;  %v1144_v59 = vld [vmem:[%s1439_s1 + $0x1a8] sm:$0xff]   ;;  %v1147_v62 = vld [vmem:[%s1439_s1 + $0x1f0] sm:$0xff]  }
  0x16   :  { %996 = vmatprep.subr.bf16.mxu1 %v1105_v22  ;;  %v1148_v63 = vld [vmem:[%s1439_s1 + $0x1b0] sm:$0xff]   ;;  %v1149_v0 = vld [vmem:[%s1439_s1 + $0x178] sm:$0xff]   ;;  %v1159_v9 = vld [vmem:[%s1439_s1 + $0x200] sm:$0xff]  }
  0x17   :  { %975 = vmatpush3.bf16.msra.mxu0 %v1104_v21  ;;  %v1150_v1 = vld [vmem:[%s1439_s1 + $0x138] sm:$0xff]   ;;  %v1152_v3 = vld [vmem:[%s1440_s0 + $0x10] ss:$36 sps:$4 sm:$0xff]   ;;  %v1160_v10 = vld [vmem:[%s1439_s1 + $0x208] sm:$0xff]  }
  0x18   :  { %976 = vmatprep.subr.bf16.mxu0 %v1107_v24  ;;  %v1151_v2 = vld [vmem:[%s1439_s1 + $0x1f8] sm:$0xff]   ;;  %v1161_v11 = vld [vmem:[%s1439_s1 + $0x210] sm:$0xff]   ;;  %v1163_v13 = vld [vmem:[%s1439_s1 + $0x220] sm:$0xff]  }
  0x19   :  { %997 = vmatpush3.bf16.msra.mxu1 %v1106_v23  ;;  %v1154_v4 = vld [vmem:[%s1440_s0 + $0x14] ss:$36 sps:$4 sm:$0xff]   ;;  %v1158_v8 = vld [vmem:[%s1440_s0 + $0x1c] ss:$36 sps:$4 sm:$0xff]   ;;  %v1164_v14 = vld [vmem:[%s1439_s1 + $0x228] sm:$0xff]  }
  0x1a   :  { %998 = vmatprep.subr.bf16.mxu1 %v1109_v26  ;;  %v1155_v5 = vld [vmem:[%s1439_s1 + $0x1b8] sm:$0xff]   ;;  %v1165_v15 = vld [vmem:[%s1439_s1 + $0x230] sm:$0xff]   ;;  %v1167_v17 = vld [vmem:[%s1440_s0 + $0x20] ss:$36 sps:$4 sm:$0xff]  }
  0x1b   :  { %977 = vmatpush3.bf16.msra.mxu0 %v1108_v25  ;;  %v1156_v7 = vld [vmem:[%s1440_s0 + $0x18] ss:$36 sps:$4 sm:$0xff]   ;;  %v873_v19 = vld [vmem:[%s1441_s2] ss:$0 sm:$0xff] }
  0x1c   :  { %978 = vmatprep.subr.bf16.mxu0 %v1111_v28  ;;  %v1162_v12 = vld [vmem:[%s1439_s1 + $0x218] sm:$0xff]  }
  0x1d   :  { %999 = vmatpush3.bf16.msra.mxu1 %v1110_v27  ;;  %v1166_v16 = vld [vmem:[%s1439_s1 + $0x238] sm:$0xff]  }
  0x1e   :  { %1000 = vmatprep.subr.bf16.mxu1 %v1113_v30 }
  0x1f   :  { %979 = vmatpush3.bf16.msra.mxu0 %v1112_v29 }
  0x20   :  { %1008 = vmatprep.subr.bf16.mxu0 %v1118_v34 }
  0x21   :  { %1001 = vmatpush3.bf16.msra.mxu1 %v1117_v33 }
  0x22   :  { %687 = vmatmul.mubr.bf16.vlgmr.msra.gmra.mrb[0].mxu0 %v1114_v31  ;;  %1030 = vmatprep.subr.bf16.mxu1 %v1123_v38 }
  0x23   :  { %1009 = vmatpush3.bf16.msra.mxu0 %v1122_v37  ;;  %768 = vmatprep.mubr.bf16.mxu0 %v1154_v4 }
  0x24   :  { %728 = vmatmul.mubr.bf16.vlgmr.msra.gmra.mrb[0].mxu1 %v1119_v35  ;;  %1010 = vmatprep.subr.bf16.mxu0 %v1125_v40 }
  0x25   :  { %1031 = vmatpush3.bf16.msra.mxu1 %v1124_v39  ;;  %809 = vmatprep.mubr.bf16.mxu1 %v1158_v8 }
  0x26   :  { %1032 = vmatprep.subr.bf16.mxu1 %v1127_v42 }
  0x27   :  { %1011 = vmatpush3.bf16.msra.mxu0 %v1126_v41 }
  0x28   :  { %1012 = vmatprep.subr.bf16.mxu0 %v1129_v44 }
  0x29   :  { %1033 = vmatpush3.bf16.msra.mxu1 %v1128_v43 }
  0x2a   :  { %1034 = vmatprep.subr.bf16.mxu1 %v1131_v46 }
  0x2b   :  { %1013 = vmatpush3.bf16.msra.mxu0 %v1130_v45 }
  0x2c   :  { %1014 = vmatprep.subr.bf16.mxu0 %v1133_v48 }
  0x2d   :  { %1035 = vmatpush3.bf16.msra.mxu1 %v1132_v47 }
  0x2e   :  { %1036 = vmatprep.subr.bf16.mxu1 %v1135_v50 }
  0x2f   :  { %1015 = vmatpush3.bf16.msra.mxu0 %v1134_v49 }
  0x30   :  { %1016 = vmatprep.subr.bf16.mxu0 %v1137_v52 }
  0x31   :  { %1037 = vmatpush3.bf16.msra.mxu1 %v1136_v51 }
  0x32   :  { %1038 = vmatprep.subr.bf16.mxu1 %v1139_v54 }
  0x33   :  { %1017 = vmatpush3.bf16.msra.mxu0 %v1138_v53 }
  0x34   :  { %1018 = vmatprep.subr.bf16.mxu0 %v1141_v56 }
  0x35   :  { %1039 = vmatpush3.bf16.msra.mxu1 %v1140_v55 }
  0x36   :  { %1040 = vmatprep.subr.bf16.mxu1 %v1143_v58 }
  0x37   :  { %1019 = vmatpush3.bf16.msra.mxu0 %v1142_v57 }
  0x38   :  { %1020 = vmatprep.subr.bf16.mxu0 %v1145_v60 }
  0x39   :  { %1041 = vmatpush3.bf16.msra.mxu1 %v1144_v59 }
  0x3a   :  { %1042 = vmatprep.subr.bf16.mxu1 %v1147_v62 }
  0x3b   :  { %1021 = vmatpush3.bf16.msra.mxu0 %v1146_v61 }
  0x3c   :  { %1022 = vmatprep.subr.bf16.mxu0 %v1149_v0 }
  0x3d   :  { %1043 = vmatpush3.bf16.msra.mxu1 %v1148_v63 }
  0x3e   :  { %1044 = vmatprep.subr.bf16.mxu1 %v1151_v2 }
  0x3f   :  { %1023 = vmatpush3.bf16.msra.mxu0 %v1150_v1 }
  0x40   :  { %1061 = vmatprep.subr.bf16.mxu0 %v1168_v6 }
  0x41   :  { %1045 = vmatpush3.bf16.msra.mxu1 %v1155_v5 }
  0x42   :  { %769 = vmatmul.mubr.bf16.vlgmr.msra.gmra.mrb[4].mxu0 %v1152_v3 }
  0x43   :  { %1077 = vmatprep.mubr.msk.bf16.mxu0 %vm1169_vm0, %v1168_v6  ;;  %1062 = vmatpush3.bf16.msra.mxu0 %v1159_v9 }
  0x44   :  { %810 = vmatmul.mubr.bf16.vlgmr.msra.gmra.mrb[4].mxu1 %v1156_v7  ;;  %1063 = vmatprep.subr.bf16.mxu0 %v1168_v6 }
  0x47   :  { %1064 = vmatpush3.bf16.msra.mxu0 %v1160_v10 }
  0x48   :  { %1065 = vmatprep.subr.bf16.mxu0 %v1168_v6 }
  0x4b   :  { %1066 = vmatpush3.bf16.msra.mxu0 %v1161_v11 }
  0x4c   :  { %1067 = vmatprep.subr.bf16.mxu0 %v1168_v6 }
  0x4f   :  { %1068 = vmatpush3.bf16.msra.mxu0 %v1162_v12 }
  0x50   :  { %1069 = vmatprep.subr.bf16.mxu0 %v1168_v6 }
  0x53   :  { %1070 = vmatpush3.bf16.msra.mxu0 %v1163_v13 }
  0x54   :  { %1071 = vmatprep.subr.bf16.mxu0 %v1168_v6 }
  0x57   :  { %1072 = vmatpush3.bf16.msra.mxu0 %v1164_v14 }
  0x58   :  { %1073 = vmatprep.subr.bf16.mxu0 %v1168_v6 }
  0x5b   :  { %1074 = vmatpush3.bf16.msra.mxu0 %v1165_v15 }
  0x5c   :  { %1075 = vmatprep.subr.bf16.mxu0 %v1168_v6 }
  0x5f   :  { %1076 = vmatpush3.bf16.msra.mxu0 %v1166_v16 }
  0x62   :  { %1078 = vmatmul.mubr.bf16.vlgmr.msra.gmra.mrb[8].mxu0 %v1167_v17 }
  0xf5   :  { %v980_v18 = vpop.f32.mrb[0].mxu0 }
  0xf6   :  { %v981_v20 = vpop.f32.mrb[1].mxu0 }
  0xf7   :  { %v982_v21 = vadd.f32 %v981_v20, %v980_v18  ;;  %v983_v22 = vpop.f32.mrb[2].mxu0  ;;  %v1002_v23 = vpop.f32.mrb[0].mxu1 }
  0xf8   :  { %v984_v24 = vpop.f32.mrb[3].mxu0  ;;  %v1003_v27 = vpop.f32.mrb[1].mxu1 }
  0xf9   :  { %v689_v25 = vadd.f32 %v982_v21, %v873_v19  ;;  %v985_v26 = vadd.f32 %v984_v24, %v983_v22  ;;  %v1004_v28 = vadd.f32 %v1003_v27, %v1002_v23  ;;  %v1005_v29 = vpop.f32.mrb[2].mxu1 }
  0xfa   :  { %v1006_v31 = vpop.f32.mrb[3].mxu1 }
  0xfb   :  { %v692_v30 = vadd.f32 %v985_v26, %v873_v19  ;;  %v730_v32 = vadd.f32 %v1004_v28, %v689_v25  ;;  %v1007_v33 = vadd.f32 %v1006_v31, %v1005_v29 }
  0xfd   :  { %v733_v34 = vadd.f32 %v1007_v33, %v692_v30 }
 0x115   :  { %v1024_v35 = vpop.f32.mrb[4].mxu0 }
 0x116   :  { %v1025_v36 = vpop.f32.mrb[5].mxu0 }
 0x117   :  { %v1026_v37 = vadd.f32 %v1025_v36, %v1024_v35  ;;  %v1027_v38 = vpop.f32.mrb[6].mxu0  ;;  %v1046_v39 = vpop.f32.mrb[4].mxu1 }
 0x118   :  { %v1028_v40 = vpop.f32.mrb[7].mxu0  ;;  %v1047_v43 = vpop.f32.mrb[5].mxu1 }
 0x119   :  { %v771_v41 = vadd.f32 %v1026_v37, %v730_v32  ;;  %v1029_v42 = vadd.f32 %v1028_v40, %v1027_v38  ;;  %v1048_v44 = vadd.f32 %v1047_v43, %v1046_v39  ;;  %v1049_v45 = vpop.f32.mrb[6].mxu1 }
 0x11a   :  { %v1050_v47 = vpop.f32.mrb[7].mxu1 }
 0x11b   :  { %v774_v46 = vadd.f32 %v1029_v42, %v733_v34  ;;  %v1051_v48 = vadd.f32 %v1050_v47, %v1049_v45  ;;  %v812_v49 = vadd.f32 %v1048_v44, %v771_v41 }
 0x11d   :  { %v815_v50 = vadd.f32 %v1051_v48, %v774_v46 }
 0x135   :  { %v852_v51 = vpop.f32.mrb[8].mxu0 }
 0x136   :  { %v853_v52 = vadd.f32 %v852_v51, %v812_v49  ;;  %v1079_v53 = vpop.f32.mrb[9].mxu0 }
 0x137   :  { %v855_v54 = vpop.f32.mrb[10].mxu0 }
 0x138   :  { %v856_v55 = vadd.f32 %v855_v54, %v815_v50  ;;  %v1080_v56 = vpop.f32.mrb[11].mxu0 }
 0x13a   :  { %v962_v57 = vpack.c.bf16 %v856_v55, %v853_v52 }
 0x13c   :  { %963 = vst [vmem:[%s1442_s3] sm:$0xff] %v962_v57  }

// kernel: flownets_forward.20
= control target key start
LH: loop header
LB: loop body
LE: loop exit
PB: predicated region body
PF: predicated region fallthrough
CT: control target
= control target key end

     0   :  { %v208_v0 = vmov 0.0   ;;  %vm209_vm0 = vmmov 0   ;;  %s263_s1 = inlined_call_operand.vmem [shape: bf16[128,128], index: 1, kind: input, shape index: {}]   ;;  %s264_s0 = inlined_call_operand.vmem [shape: bf16[16,128], index: 0, kind: input, shape index: {}]   ;;  %s265_s2 = inlined_call_operand.vmem [shape: f32[1,128], index: 2, kind: input, shape index: {}]   ;;  %s266_s3 = inlined_call_operand.vmem [shape: bf16[16,128], index: 3, kind: output, shape index: {}]  }
   0x1   :  { %177 = vmatprep.subr.bf16.mxu0 %v208_v0  ;;  %v199_v1 = vld [vmem:[%s263_s1] sm:$0xff]   ;;  %193 = vmatprep.mubr.msk.bf16.mxu0 %vm209_vm0, %v208_v0  ;;  %v200_v2 = vld [vmem:[%s263_s1 + $0x8] sm:$0xff]   ;;  %v201_v3 = vld [vmem:[%s263_s1 + $0x10] sm:$0xff]  }
   0x2   :  { %178 = vmatpush3.bf16.msra.mxu0 %v199_v1  ;;  %v202_v4 = vld [vmem:[%s263_s1 + $0x18] sm:$0xff]   ;;  %v203_v5 = vld [vmem:[%s263_s1 + $0x20] sm:$0xff]   ;;  %v204_v6 = vld [vmem:[%s263_s1 + $0x28] sm:$0xff]  }
   0x3   :  { %179 = vmatprep.subr.bf16.mxu0 %v208_v0  ;;  %v205_v7 = vld [vmem:[%s263_s1 + $0x30] sm:$0xff]   ;;  %v206_v8 = vld [vmem:[%s263_s1 + $0x38] sm:$0xff]   ;;  %v207_v9 = vld [vmem:[%s264_s0] sm:$0xff]  }
   0x4   :  { %v149_v10 = vld [vmem:[%s265_s2] ss:$0 sm:$0xff] }
   0x6   :  { %180 = vmatpush3.bf16.msra.mxu0 %v200_v2 }
   0x7   :  { %181 = vmatprep.subr.bf16.mxu0 %v208_v0 }
   0xa   :  { %182 = vmatpush3.bf16.msra.mxu0 %v201_v3 }
   0xb   :  { %183 = vmatprep.subr.bf16.mxu0 %v208_v0 }
   0xe   :  { %184 = vmatpush3.bf16.msra.mxu0 %v202_v4 }
   0xf   :  { %185 = vmatprep.subr.bf16.mxu0 %v208_v0 }
  0x12   :  { %186 = vmatpush3.bf16.msra.mxu0 %v203_v5 }
  0x13   :  { %187 = vmatprep.subr.bf16.mxu0 %v208_v0 }
  0x16   :  { %188 = vmatpush3.bf16.msra.mxu0 %v204_v6 }
  0x17   :  { %189 = vmatprep.subr.bf16.mxu0 %v208_v0 }
  0x1a   :  { %190 = vmatpush3.bf16.msra.mxu0 %v205_v7 }
  0x1b   :  { %191 = vmatprep.subr.bf16.mxu0 %v208_v0 }
  0x1e   :  { %192 = vmatpush3.bf16.msra.mxu0 %v206_v8 }
  0x21   :  { %194 = vmatmul.mubr.bf16.vlgmr.msra.gmra.mrb[0].mxu0 %v207_v9 }
  0xf4   :  { %v128_v11 = vpop.f32.mrb[0].mxu0 }
  0xf5   :  { %v195_v12 = vpop.f32.mrb[1].mxu0  ;;  %v129_v14 = vadd.f32 %v149_v10, %v128_v11 }
  0xf6   :  { %v131_v13 = vpop.f32.mrb[2].mxu0 }
  0xf7   :  { %v132_v15 = vadd.f32 %v149_v10, %v131_v13  ;;  %v196_v16 = vpop.f32.mrb[3].mxu0 }
  0xf9   :  { %v166_v17 = vpack.c.bf16 %v132_v15, %v129_v14 }
  0xfb   :  { %167 = vst [vmem:[%s266_s3] sm:$0xff] %v166_v17  }

// kernel: flownets_forward.18
= control target key start
LH: loop header
LB: loop body
LE: loop exit
PB: predicated region body
PF: predicated region fallthrough
CT: control target
= control target key end

     0   :  { %vm1175_vm0 = vmmov 0   ;;  %s1445_s1 = inlined_call_operand.vmem [shape: bf16[1152,128], index: 1, kind: input, shape index: {}]   ;;  %s1446_s0 = inlined_call_operand.vmem [shape: bf16[16,1152], index: 0, kind: input, shape index: {}]   ;;  %s1447_s2 = inlined_call_operand.vmem [shape: f32[1,128], index: 2, kind: input, shape index: {}]   ;;  %s1448_s3 = inlined_call_operand.vmem [shape: bf16[16,128], index: 3, kind: output, shape index: {}]  }
   0x1   :  { %v1089_v0 = vld [vmem:[%s1445_s1 + $0x40] sm:$0xff]   ;;  %v1093_v4 = vld [vmem:[%s1445_s1 + $0x48] sm:$0xff]   ;;  %v1097_v8 = vld [vmem:[%s1445_s1 + $0x50] sm:$0xff]  }
   0x2   :  { %v1090_v1 = vld [vmem:[%s1445_s1] sm:$0xff]   ;;  %970 = vmatprep.subr.bf16.mxu0 %v1089_v0  ;;  %v1094_v5 = vld [vmem:[%s1445_s1 + $0x8] sm:$0xff]   ;;  %v1098_v9 = vld [vmem:[%s1445_s1 + $0x10] sm:$0xff]  }
   0x3   :  { %v1091_v2 = vld [vmem:[%s1445_s1 + $0xc0] sm:$0xff]   ;;  %971 = vmatpush3.bf16.msra.mxu0 %v1090_v1  ;;  %v1095_v6 = vld [vmem:[%s1445_s1 + $0xc8] sm:$0xff]   ;;  %v1099_v10 = vld [vmem:[%s1445_s1 + $0xd0] sm:$0xff]  }
   0x4   :  { %v1092_v3 = vld [vmem:[%s1445_s1 + $0x80] sm:$0xff]   ;;  %992 = vmatprep.subr.bf16.mxu1 %v1091_v2  ;;  %972 = vmatprep.subr.bf16.mxu0 %v1093_v4  ;;  %v1096_v7 = vld [vmem:[%s1445_s1 + $0x88] sm:$0xff]   ;;  %v1100_v11 = vld [vmem:[%s1445_s1 + $0x90] sm:$0xff]  }
   0x5   :  { %993 = vmatpush3.bf16.msra.mxu1 %v1092_v3  ;;  %v1101_v12 = vld [vmem:[%s1445_s1 + $0x58] sm:$0xff]   ;;  %v1105_v16 = vld [vmem:[%s1445_s1 + $0x60] sm:$0xff]   ;;  %v1109_v20 = vld [vmem:[%s1445_s1 + $0x68] sm:$0xff]  }
   0x6   :  { %994 = vmatprep.subr.bf16.mxu1 %v1095_v6  ;;  %v1102_v13 = vld [vmem:[%s1445_s1 + $0x18] sm:$0xff]   ;;  %v1106_v17 = vld [vmem:[%s1445_s1 + $0x20] sm:$0xff]   ;;  %v1110_v21 = vld [vmem:[%s1445_s1 + $0x28] sm:$0xff]   ;;  %v1174_v6 = vmov 0.0  }
   0x7   :  { %973 = vmatpush3.bf16.msra.mxu0 %v1094_v5  ;;  %v1103_v14 = vld [vmem:[%s1445_s1 + $0xd8] sm:$0xff]   ;;  %v1107_v18 = vld [vmem:[%s1445_s1 + $0xe0] sm:$0xff]   ;;  %v1111_v22 = vld [vmem:[%s1445_s1 + $0xe8] sm:$0xff]  }
   0x8   :  { %974 = vmatprep.subr.bf16.mxu0 %v1097_v8  ;;  %v1104_v15 = vld [vmem:[%s1445_s1 + $0x98] sm:$0xff]   ;;  %v1108_v19 = vld [vmem:[%s1445_s1 + $0xa0] sm:$0xff]   ;;  %v1112_v23 = vld [vmem:[%s1445_s1 + $0xa8] sm:$0xff]  }
   0x9   :  { %995 = vmatpush3.bf16.msra.mxu1 %v1096_v7  ;;  %v1113_v24 = vld [vmem:[%s1445_s1 + $0x70] sm:$0xff]   ;;  %v1117_v28 = vld [vmem:[%s1445_s1 + $0x78] sm:$0xff]   ;;  %v1120_v31 = vld [vmem:[%s1446_s0] ss:$36 sps:$4 sm:$0xff]  }
   0xa   :  { %996 = vmatprep.subr.bf16.mxu1 %v1099_v10  ;;  %v1114_v25 = vld [vmem:[%s1445_s1 + $0x30] sm:$0xff]   ;;  %v1118_v29 = vld [vmem:[%s1445_s1 + $0x38] sm:$0xff]   ;;  %v1122_v32 = vld [vmem:[%s1446_s0 + $0x4] ss:$36 sps:$4 sm:$0xff]  }
   0xb   :  { %975 = vmatpush3.bf16.msra.mxu0 %v1098_v9  ;;  %v1115_v26 = vld [vmem:[%s1445_s1 + $0xf0] sm:$0xff]   ;;  %v1119_v30 = vld [vmem:[%s1445_s1 + $0xf8] sm:$0xff]   ;;  %686 = vmatprep.mubr.bf16.mxu0 %v1122_v32  ;;  %v1124_v34 = vld [vmem:[%s1445_s1 + $0x140] sm:$0xff]  }
   0xc   :  { %976 = vmatprep.subr.bf16.mxu0 %v1101_v12  ;;  %v1116_v27 = vld [vmem:[%s1445_s1 + $0xb0] sm:$0xff]   ;;  %v1123_v33 = vld [vmem:[%s1445_s1 + $0xb8] sm:$0xff]   ;;  %v1125_v35 = vld [vmem:[%s1446_s0 + $0x8] ss:$36 sps:$4 sm:$0xff]  }
   0xd   :  { %997 = vmatpush3.bf16.msra.mxu1 %v1100_v11  ;;  %v1127_v36 = vld [vmem:[%s1446_s0 + $0xc] ss:$36 sps:$4 sm:$0xff]   ;;  %v1128_v37 = vld [vmem:[%s1445_s1 + $0x100] sm:$0xff]   ;;  %v1139_v48 = vld [vmem:[%s1445_s1 + $0x158] sm:$0xff]  }
   0xe   :  { %998 = vmatprep.subr.bf16.mxu1 %v1103_v14  ;;  %727 = vmatprep.mubr.bf16.mxu1 %v1127_v36  ;;  %v1129_v38 = vld [vmem:[%s1445_s1 + $0x1c0] sm:$0xff]   ;;  %v1131_v40 = vld [vmem:[%s1445_s1 + $0x148] sm:$0xff]   ;;  %v1135_v44 = vld [vmem:[%s1445_s1 + $0x150] sm:$0xff]  }
   0xf   :  { %977 = vmatpush3.bf16.msra.mxu0 %v1102_v13  ;;  %v1130_v39 = vld [vmem:[%s1445_s1 + $0x180] sm:$0xff]   ;;  %v1132_v41 = vld [vmem:[%s1445_s1 + $0x108] sm:$0xff]   ;;  %v1136_v45 = vld [vmem:[%s1445_s1 + $0x110] sm:$0xff]  }
  0x10   :  { %978 = vmatprep.subr.bf16.mxu0 %v1105_v16  ;;  %v1133_v42 = vld [vmem:[%s1445_s1 + $0x1c8] sm:$0xff]   ;;  %v1137_v46 = vld [vmem:[%s1445_s1 + $0x1d0] sm:$0xff]   ;;  %v1140_v49 = vld [vmem:[%s1445_s1 + $0x118] sm:$0xff]  }
  0x11   :  { %999 = vmatpush3.bf16.msra.mxu1 %v1104_v15  ;;  %v1134_v43 = vld [vmem:[%s1445_s1 + $0x188] sm:$0xff]   ;;  %v1138_v47 = vld [vmem:[%s1445_s1 + $0x190] sm:$0xff]   ;;  %v1141_v50 = vld [vmem:[%s1445_s1 + $0x1d8] sm:$0xff]  }
  0x12   :  { %1000 = vmatprep.subr.bf16.mxu1 %v1107_v18  ;;  %v1142_v51 = vld [vmem:[%s1445_s1 + $0x198] sm:$0xff]   ;;  %v1143_v52 = vld [vmem:[%s1445_s1 + $0x160] sm:$0xff]   ;;  %v1147_v56 = vld [vmem:[%s1445_s1 + $0x168] sm:$0xff]  }
  0x13   :  { %979 = vmatpush3.bf16.msra.mxu0 %v1106_v17  ;;  %v1144_v53 = vld [vmem:[%s1445_s1 + $0x120] sm:$0xff]   ;;  %v1148_v57 = vld [vmem:[%s1445_s1 + $0x128] sm:$0xff]   ;;  %v1151_v60 = vld [vmem:[%s1445_s1 + $0x170] sm:$0xff]  }
  0x14   :  { %980 = vmatprep.subr.bf16.mxu0 %v1109_v20  ;;  %v1145_v54 = vld [vmem:[%s1445_s1 + $0x1e0] sm:$0xff]   ;;  %v1149_v58 = vld [vmem:[%s1445_s1 + $0x1e8] sm:$0xff]   ;;  %v1152_v61 = vld [vmem:[%s1445_s1 + $0x130] sm:$0xff]  }
  0x15   :  { %1001 = vmatpush3.bf16.msra.mxu1 %v1108_v19  ;;  %v1146_v55 = vld [vmem:[%s1445_s1 + $0x1a0] sm:$0xff]   ;;  %v1150_v59 = vld [vmem:[%s1445_s1 + $0x1a8] sm:$0xff]   ;;  %v1153_v62 = vld [vmem:[%s1445_s1 + $0x1f0] sm:$0xff]  }
  0x16   :  { %1002 = vmatprep.subr.bf16.mxu1 %v1111_v22  ;;  %v1154_v63 = vld [vmem:[%s1445_s1 + $0x1b0] sm:$0xff]   ;;  %v1155_v0 = vld [vmem:[%s1445_s1 + $0x178] sm:$0xff]   ;;  %v1165_v9 = vld [vmem:[%s1445_s1 + $0x200] sm:$0xff]  }
  0x17   :  { %981 = vmatpush3.bf16.msra.mxu0 %v1110_v21  ;;  %v1156_v1 = vld [vmem:[%s1445_s1 + $0x138] sm:$0xff]   ;;  %v1158_v3 = vld [vmem:[%s1446_s0 + $0x10] ss:$36 sps:$4 sm:$0xff]   ;;  %v1166_v10 = vld [vmem:[%s1445_s1 + $0x208] sm:$0xff]  }
  0x18   :  { %982 = vmatprep.subr.bf16.mxu0 %v1113_v24  ;;  %v1157_v2 = vld [vmem:[%s1445_s1 + $0x1f8] sm:$0xff]   ;;  %v1167_v11 = vld [vmem:[%s1445_s1 + $0x210] sm:$0xff]   ;;  %v1169_v13 = vld [vmem:[%s1445_s1 + $0x220] sm:$0xff]  }
  0x19   :  { %1003 = vmatpush3.bf16.msra.mxu1 %v1112_v23  ;;  %v1160_v4 = vld [vmem:[%s1446_s0 + $0x14] ss:$36 sps:$4 sm:$0xff]   ;;  %v1164_v8 = vld [vmem:[%s1446_s0 + $0x1c] ss:$36 sps:$4 sm:$0xff]   ;;  %v1170_v14 = vld [vmem:[%s1445_s1 + $0x228] sm:$0xff]  }
  0x1a   :  { %1004 = vmatprep.subr.bf16.mxu1 %v1115_v26  ;;  %v1161_v5 = vld [vmem:[%s1445_s1 + $0x1b8] sm:$0xff]   ;;  %v1171_v15 = vld [vmem:[%s1445_s1 + $0x230] sm:$0xff]   ;;  %v1173_v17 = vld [vmem:[%s1446_s0 + $0x20] ss:$36 sps:$4 sm:$0xff]  }
  0x1b   :  { %983 = vmatpush3.bf16.msra.mxu0 %v1114_v25  ;;  %v1162_v7 = vld [vmem:[%s1446_s0 + $0x18] ss:$36 sps:$4 sm:$0xff]   ;;  %v879_v19 = vld [vmem:[%s1447_s2] ss:$0 sm:$0xff] }
  0x1c   :  { %984 = vmatprep.subr.bf16.mxu0 %v1117_v28  ;;  %v1168_v12 = vld [vmem:[%s1445_s1 + $0x218] sm:$0xff]  }
  0x1d   :  { %1005 = vmatpush3.bf16.msra.mxu1 %v1116_v27  ;;  %v1172_v16 = vld [vmem:[%s1445_s1 + $0x238] sm:$0xff]  }
  0x1e   :  { %1006 = vmatprep.subr.bf16.mxu1 %v1119_v30 }
  0x1f   :  { %985 = vmatpush3.bf16.msra.mxu0 %v1118_v29 }
  0x20   :  { %1014 = vmatprep.subr.bf16.mxu0 %v1124_v34 }
  0x21   :  { %1007 = vmatpush3.bf16.msra.mxu1 %v1123_v33 }
  0x22   :  { %687 = vmatmul.mubr.bf16.vlgmr.msra.gmra.mrb[0].mxu0 %v1120_v31  ;;  %1036 = vmatprep.subr.bf16.mxu1 %v1129_v38 }
  0x23   :  { %1015 = vmatpush3.bf16.msra.mxu0 %v1128_v37  ;;  %768 = vmatprep.mubr.bf16.mxu0 %v1160_v4 }
  0x24   :  { %728 = vmatmul.mubr.bf16.vlgmr.msra.gmra.mrb[0].mxu1 %v1125_v35  ;;  %1016 = vmatprep.subr.bf16.mxu0 %v1131_v40 }
  0x25   :  { %1037 = vmatpush3.bf16.msra.mxu1 %v1130_v39  ;;  %809 = vmatprep.mubr.bf16.mxu1 %v1164_v8 }
  0x26   :  { %1038 = vmatprep.subr.bf16.mxu1 %v1133_v42 }
  0x27   :  { %1017 = vmatpush3.bf16.msra.mxu0 %v1132_v41 }
  0x28   :  { %1018 = vmatprep.subr.bf16.mxu0 %v1135_v44 }
  0x29   :  { %1039 = vmatpush3.bf16.msra.mxu1 %v1134_v43 }
  0x2a   :  { %1040 = vmatprep.subr.bf16.mxu1 %v1137_v46 }
  0x2b   :  { %1019 = vmatpush3.bf16.msra.mxu0 %v1136_v45 }
  0x2c   :  { %1020 = vmatprep.subr.bf16.mxu0 %v1139_v48 }
  0x2d   :  { %1041 = vmatpush3.bf16.msra.mxu1 %v1138_v47 }
  0x2e   :  { %1042 = vmatprep.subr.bf16.mxu1 %v1141_v50 }
  0x2f   :  { %1021 = vmatpush3.bf16.msra.mxu0 %v1140_v49 }
  0x30   :  { %1022 = vmatprep.subr.bf16.mxu0 %v1143_v52 }
  0x31   :  { %1043 = vmatpush3.bf16.msra.mxu1 %v1142_v51 }
  0x32   :  { %1044 = vmatprep.subr.bf16.mxu1 %v1145_v54 }
  0x33   :  { %1023 = vmatpush3.bf16.msra.mxu0 %v1144_v53 }
  0x34   :  { %1024 = vmatprep.subr.bf16.mxu0 %v1147_v56 }
  0x35   :  { %1045 = vmatpush3.bf16.msra.mxu1 %v1146_v55 }
  0x36   :  { %1046 = vmatprep.subr.bf16.mxu1 %v1149_v58 }
  0x37   :  { %1025 = vmatpush3.bf16.msra.mxu0 %v1148_v57 }
  0x38   :  { %1026 = vmatprep.subr.bf16.mxu0 %v1151_v60 }
  0x39   :  { %1047 = vmatpush3.bf16.msra.mxu1 %v1150_v59 }
  0x3a   :  { %1048 = vmatprep.subr.bf16.mxu1 %v1153_v62 }
  0x3b   :  { %1027 = vmatpush3.bf16.msra.mxu0 %v1152_v61 }
  0x3c   :  { %1028 = vmatprep.subr.bf16.mxu0 %v1155_v0 }
  0x3d   :  { %1049 = vmatpush3.bf16.msra.mxu1 %v1154_v63 }
  0x3e   :  { %1050 = vmatprep.subr.bf16.mxu1 %v1157_v2 }
  0x3f   :  { %1029 = vmatpush3.bf16.msra.mxu0 %v1156_v1 }
  0x40   :  { %1067 = vmatprep.subr.bf16.mxu0 %v1174_v6 }
  0x41   :  { %1051 = vmatpush3.bf16.msra.mxu1 %v1161_v5 }
  0x42   :  { %769 = vmatmul.mubr.bf16.vlgmr.msra.gmra.mrb[4].mxu0 %v1158_v3 }
  0x43   :  { %1083 = vmatprep.mubr.msk.bf16.mxu0 %vm1175_vm0, %v1174_v6  ;;  %1068 = vmatpush3.bf16.msra.mxu0 %v1165_v9 }
  0x44   :  { %810 = vmatmul.mubr.bf16.vlgmr.msra.gmra.mrb[4].mxu1 %v1162_v7  ;;  %1069 = vmatprep.subr.bf16.mxu0 %v1174_v6 }
  0x47   :  { %1070 = vmatpush3.bf16.msra.mxu0 %v1166_v10 }
  0x48   :  { %1071 = vmatprep.subr.bf16.mxu0 %v1174_v6 }
  0x4b   :  { %1072 = vmatpush3.bf16.msra.mxu0 %v1167_v11 }
  0x4c   :  { %1073 = vmatprep.subr.bf16.mxu0 %v1174_v6 }
  0x4f   :  { %1074 = vmatpush3.bf16.msra.mxu0 %v1168_v12 }
  0x50   :  { %1075 = vmatprep.subr.bf16.mxu0 %v1174_v6 }
  0x53   :  { %1076 = vmatpush3.bf16.msra.mxu0 %v1169_v13 }
  0x54   :  { %1077 = vmatprep.subr.bf16.mxu0 %v1174_v6 }
  0x57   :  { %1078 = vmatpush3.bf16.msra.mxu0 %v1170_v14 }
  0x58   :  { %1079 = vmatprep.subr.bf16.mxu0 %v1174_v6 }
  0x5b   :  { %1080 = vmatpush3.bf16.msra.mxu0 %v1171_v15 }
  0x5c   :  { %1081 = vmatprep.subr.bf16.mxu0 %v1174_v6 }
  0x5f   :  { %1082 = vmatpush3.bf16.msra.mxu0 %v1172_v16 }
  0x62   :  { %1084 = vmatmul.mubr.bf16.vlgmr.msra.gmra.mrb[8].mxu0 %v1173_v17 }
  0xf5   :  { %v986_v18 = vpop.f32.mrb[0].mxu0 }
  0xf6   :  { %v987_v20 = vpop.f32.mrb[1].mxu0 }
  0xf7   :  { %v988_v21 = vadd.f32 %v987_v20, %v986_v18  ;;  %v989_v22 = vpop.f32.mrb[2].mxu0  ;;  %v1008_v23 = vpop.f32.mrb[0].mxu1 }
  0xf8   :  { %v990_v24 = vpop.f32.mrb[3].mxu0  ;;  %v1009_v27 = vpop.f32.mrb[1].mxu1 }
  0xf9   :  { %v689_v25 = vadd.f32 %v988_v21, %v879_v19  ;;  %v991_v26 = vadd.f32 %v990_v24, %v989_v22  ;;  %v1010_v28 = vadd.f32 %v1009_v27, %v1008_v23  ;;  %v1011_v29 = vpop.f32.mrb[2].mxu1 }
  0xfa   :  { %v1012_v31 = vpop.f32.mrb[3].mxu1 }
  0xfb   :  { %v692_v30 = vadd.f32 %v991_v26, %v879_v19  ;;  %v730_v32 = vadd.f32 %v1010_v28, %v689_v25  ;;  %v1013_v33 = vadd.f32 %v1012_v31, %v1011_v29 }
  0xfd   :  { %v733_v34 = vadd.f32 %v1013_v33, %v692_v30 }
 0x115   :  { %v1030_v35 = vpop.f32.mrb[4].mxu0 }
 0x116   :  { %v1031_v36 = vpop.f32.mrb[5].mxu0 }
 0x117   :  { %v1032_v37 = vadd.f32 %v1031_v36, %v1030_v35  ;;  %v1033_v38 = vpop.f32.mrb[6].mxu0  ;;  %v1052_v39 = vpop.f32.mrb[4].mxu1 }
 0x118   :  { %v1034_v40 = vpop.f32.mrb[7].mxu0  ;;  %v1053_v43 = vpop.f32.mrb[5].mxu1 }
 0x119   :  { %v771_v41 = vadd.f32 %v1032_v37, %v730_v32  ;;  %v1035_v42 = vadd.f32 %v1034_v40, %v1033_v38  ;;  %v1054_v44 = vadd.f32 %v1053_v43, %v1052_v39  ;;  %v1055_v45 = vpop.f32.mrb[6].mxu1 }
 0x11a   :  { %v1056_v47 = vpop.f32.mrb[7].mxu1 }
 0x11b   :  { %v774_v46 = vadd.f32 %v1035_v42, %v733_v34  ;;  %v1057_v48 = vadd.f32 %v1056_v47, %v1055_v45  ;;  %v812_v49 = vadd.f32 %v1054_v44, %v771_v41 }
 0x11d   :  { %v815_v50 = vadd.f32 %v1057_v48, %v774_v46 }
 0x135   :  { %v852_v51 = vpop.f32.mrb[8].mxu0 }
 0x136   :  { %v853_v52 = vadd.f32 %v852_v51, %v812_v49  ;;  %v1085_v53 = vpop.f32.mrb[9].mxu0 }
 0x137   :  { %v855_v54 = vpop.f32.mrb[10].mxu0 }
 0x138   :  { %v861_v55 = vmul.f32 0.1, %v853_v52  ;;  %v856_v56 = vadd.f32 %v855_v54, %v815_v50  ;;  %v1086_v57 = vpop.f32.mrb[11].mxu0  ;;  %vm859_vm1 = vcmp.gt.f32.partialorder %v853_v52, 0.0 }
 0x13a   :  { %vm860_vm2 = vcmp.gt.f32.partialorder %v856_v56, 0.0  ;;  %v862_v58 = vmul.f32 0.1, %v856_v56  ;;  %v863_v59 = vsel %vm859_vm1, %v853_v52, %v861_v55 }
 0x13c   :  { %v864_v60 = vsel %vm860_vm2, %v856_v56, %v862_v58 }
 0x13d   :  { %v968_v61 = vpack.c.bf16 %v864_v60, %v863_v59 }
 0x13f   :  { %969 = vst [vmem:[%s1448_s3] sm:$0xff] %v968_v61  }

// kernel: flownets_forward.22
= control target key start
LH: loop header
LB: loop body
LE: loop exit
PB: predicated region body
PF: predicated region fallthrough
CT: control target
= control target key end

     0   :  { %s1297_s1 = inlined_call_operand.vmem [shape: bf16[896,128], index: 1, kind: input, shape index: {}]   ;;  %s1298_s0 = inlined_call_operand.vmem [shape: bf16[32,896], index: 0, kind: input, shape index: {}]   ;;  %s1299_s2 = inlined_call_operand.vmem [shape: f32[1,128], index: 2, kind: input, shape index: {}]   ;;  %s1300_s3 = inlined_call_operand.vmem [shape: bf16[32,128], index: 3, kind: output, shape index: {}]  }
   0x1   :  { %v982_v0 = vld [vmem:[%s1297_s1 + $0x40] sm:$0xff]   ;;  %v986_v4 = vld [vmem:[%s1297_s1 + $0x48] sm:$0xff]   ;;  %v990_v8 = vld [vmem:[%s1297_s1 + $0x50] sm:$0xff]  }
   0x2   :  { %v983_v1 = vld [vmem:[%s1297_s1] sm:$0xff]   ;;  %868 = vmatprep.subr.bf16.mxu0 %v982_v0  ;;  %v987_v5 = vld [vmem:[%s1297_s1 + $0x8] sm:$0xff]   ;;  %v991_v9 = vld [vmem:[%s1297_s1 + $0x10] sm:$0xff]  }
   0x3   :  { %v984_v2 = vld [vmem:[%s1297_s1 + $0xc0] sm:$0xff]   ;;  %869 = vmatpush3.bf16.msra.mxu0 %v983_v1  ;;  %v988_v6 = vld [vmem:[%s1297_s1 + $0xc8] sm:$0xff]   ;;  %v992_v10 = vld [vmem:[%s1297_s1 + $0xd0] sm:$0xff]  }
   0x4   :  { %v985_v3 = vld [vmem:[%s1297_s1 + $0x80] sm:$0xff]   ;;  %896 = vmatprep.subr.bf16.mxu1 %v984_v2  ;;  %870 = vmatprep.subr.bf16.mxu0 %v986_v4  ;;  %v989_v7 = vld [vmem:[%s1297_s1 + $0x88] sm:$0xff]   ;;  %v993_v11 = vld [vmem:[%s1297_s1 + $0x90] sm:$0xff]  }
   0x5   :  { %897 = vmatpush3.bf16.msra.mxu1 %v985_v3  ;;  %v994_v12 = vld [vmem:[%s1297_s1 + $0x58] sm:$0xff]   ;;  %v998_v16 = vld [vmem:[%s1297_s1 + $0x60] sm:$0xff]   ;;  %v1002_v20 = vld [vmem:[%s1297_s1 + $0x68] sm:$0xff]  }
   0x6   :  { %898 = vmatprep.subr.bf16.mxu1 %v988_v6  ;;  %v995_v13 = vld [vmem:[%s1297_s1 + $0x18] sm:$0xff]   ;;  %v999_v17 = vld [vmem:[%s1297_s1 + $0x20] sm:$0xff]   ;;  %v1003_v21 = vld [vmem:[%s1297_s1 + $0x28] sm:$0xff]  }
   0x7   :  { %871 = vmatpush3.bf16.msra.mxu0 %v987_v5  ;;  %v996_v14 = vld [vmem:[%s1297_s1 + $0xd8] sm:$0xff]   ;;  %v1000_v18 = vld [vmem:[%s1297_s1 + $0xe0] sm:$0xff]   ;;  %v1004_v22 = vld [vmem:[%s1297_s1 + $0xe8] sm:$0xff]  }
   0x8   :  { %872 = vmatprep.subr.bf16.mxu0 %v990_v8  ;;  %v997_v15 = vld [vmem:[%s1297_s1 + $0x98] sm:$0xff]   ;;  %v1001_v19 = vld [vmem:[%s1297_s1 + $0xa0] sm:$0xff]   ;;  %v1005_v23 = vld [vmem:[%s1297_s1 + $0xa8] sm:$0xff]  }
   0x9   :  { %899 = vmatpush3.bf16.msra.mxu1 %v989_v7  ;;  %v1006_v24 = vld [vmem:[%s1297_s1 + $0x70] sm:$0xff]   ;;  %v1010_v28 = vld [vmem:[%s1297_s1 + $0x78] sm:$0xff]   ;;  %v1015_v32 = vld [vmem:[%s1298_s0 + $0x4] ss:$28 sps:$4 sm:$0xff]  }
   0xa   :  { %900 = vmatprep.subr.bf16.mxu1 %v992_v10  ;;  %v1007_v25 = vld [vmem:[%s1297_s1 + $0x30] sm:$0xff]   ;;  %v1011_v29 = vld [vmem:[%s1297_s1 + $0x38] sm:$0xff]   ;;  %590 = vmatprep.mubr.bf16.mxu0 %v1015_v32  ;;  %v1017_v34 = vld [vmem:[%s1297_s1 + $0x140] sm:$0xff]  }
   0xb   :  { %873 = vmatpush3.bf16.msra.mxu0 %v991_v9  ;;  %v1008_v26 = vld [vmem:[%s1297_s1 + $0xf0] sm:$0xff]   ;;  %v1012_v30 = vld [vmem:[%s1297_s1 + $0xf8] sm:$0xff]   ;;  %v1018_v35 = vld [vmem:[%s1298_s0 + $0x8] ss:$28 sps:$4 sm:$0xff]  }
   0xc   :  { %874 = vmatprep.subr.bf16.mxu0 %v994_v12  ;;  %v1009_v27 = vld [vmem:[%s1297_s1 + $0xb0] sm:$0xff]   ;;  %v1013_v31 = vld [vmem:[%s1298_s0] ss:$28 sps:$4 sm:$0xff]   ;;  %v1020_v36 = vld [vmem:[%s1298_s0 + $0xc] ss:$28 sps:$4 sm:$0xff]  }
   0xd   :  { %901 = vmatpush3.bf16.msra.mxu1 %v993_v11  ;;  %v1016_v33 = vld [vmem:[%s1297_s1 + $0xb8] sm:$0xff]   ;;  %v1021_v37 = vld [vmem:[%s1297_s1 + $0x100] sm:$0xff]   ;;  %639 = vmatprep.mubr.bf16.mxu1 %v1020_v36  ;;  %v1022_v38 = vld [vmem:[%s1297_s1 + $0x148] sm:$0xff]  }
   0xe   :  { %902 = vmatprep.subr.bf16.mxu1 %v996_v14  ;;  %v1023_v39 = vld [vmem:[%s1297_s1 + $0x180] sm:$0xff]   ;;  %v1024_v40 = vld [vmem:[%s1297_s1 + $0x108] sm:$0xff]   ;;  %v1025_v41 = vld [vmem:[%s1297_s1 + $0x150] sm:$0xff]  }
   0xf   :  { %875 = vmatpush3.bf16.msra.mxu0 %v995_v13  ;;  %v1026_v42 = vld [vmem:[%s1297_s1 + $0x188] sm:$0xff]   ;;  %v1027_v43 = vld [vmem:[%s1297_s1 + $0x110] sm:$0xff]   ;;  %v1028_v44 = vld [vmem:[%s1297_s1 + $0x158] sm:$0xff]  }
  0x10   :  { %876 = vmatprep.subr.bf16.mxu0 %v998_v16  ;;  %v1029_v45 = vld [vmem:[%s1297_s1 + $0x190] sm:$0xff]   ;;  %v1030_v46 = vld [vmem:[%s1297_s1 + $0x118] sm:$0xff]   ;;  %v1031_v47 = vld [vmem:[%s1297_s1 + $0x160] sm:$0xff]  }
  0x11   :  { %903 = vmatpush3.bf16.msra.mxu1 %v997_v15  ;;  %v1032_v48 = vld [vmem:[%s1297_s1 + $0x198] sm:$0xff]   ;;  %v1033_v49 = vld [vmem:[%s1297_s1 + $0x120] sm:$0xff]   ;;  %v1036_v51 = vld [vmem:[%s1297_s1 + $0x168] sm:$0xff]  }
  0x12   :  { %904 = vmatprep.subr.bf16.mxu1 %v1000_v18  ;;  %v1034_v50 = vld [vmem:[%s1298_s0 + $0x3c] ss:$28 sps:$4 sm:$0xff]   ;;  %v1037_v52 = vld [vmem:[%s1297_s1 + $0x1a0] sm:$0xff]   ;;  %v1039_v54 = vld [vmem:[%s1297_s1 + $0x128] sm:$0xff]  }
  0x13   :  { %877 = vmatpush3.bf16.msra.mxu0 %v999_v17  ;;  %v1038_v53 = vld [vmem:[%s1298_s0 + $0x38] ss:$28 sps:$4 sm:$0xff]   ;;  %v1040_v55 = vld [vmem:[%s1298_s0 + $0x44] ss:$28 sps:$4 sm:$0xff]   ;;  %v1044_v58 = vld [vmem:[%s1297_s1 + $0x1a8] sm:$0xff]  }
  0x14   :  { %878 = vmatprep.subr.bf16.mxu0 %v1002_v20  ;;  %v1042_v56 = vld [vmem:[%s1298_s0 + $0x40] ss:$28 sps:$4 sm:$0xff]   ;;  %v1043_v57 = vld [vmem:[%s1297_s1 + $0x170] sm:$0xff]   ;;  %v1055_v3 = vld [vmem:[%s1298_s0 + $0x4c] ss:$28 sps:$4 sm:$0xff]  }
  0x15   :  { %905 = vmatpush3.bf16.msra.mxu1 %v1001_v19  ;;  %v1045_v59 = vld [vmem:[%s1297_s1 + $0x130] sm:$0xff]   ;;  %v1046_v60 = vld [vmem:[%s1297_s1 + $0x178] sm:$0xff]   ;;  %v1057_v5 = vld [vmem:[%s1298_s0 + $0x48] ss:$28 sps:$4 sm:$0xff]  }
  0x16   :  { %906 = vmatprep.subr.bf16.mxu1 %v1004_v22  ;;  %v1047_v61 = vld [vmem:[%s1297_s1 + $0x1b0] sm:$0xff]   ;;  %v1048_v62 = vld [vmem:[%s1297_s1 + $0x138] sm:$0xff]   ;;  %v778_v7 = vld [vmem:[%s1299_s2] ss:$0 sm:$0xff] }
  0x17   :  { %879 = vmatpush3.bf16.msra.mxu0 %v1003_v21  ;;  %v1051_v63 = vld [vmem:[%s1298_s0 + $0x14] ss:$28 sps:$4 sm:$0xff]   ;;  %v1052_v0 = vld [vmem:[%s1297_s1 + $0x1b8] sm:$0xff]  }
  0x18   :  { %880 = vmatprep.subr.bf16.mxu0 %v1006_v24  ;;  %v1053_v1 = vld [vmem:[%s1298_s0 + $0x18] ss:$28 sps:$4 sm:$0xff]   ;;  %v1049_v2 = vld [vmem:[%s1298_s0 + $0x10] ss:$28 sps:$4 sm:$0xff]  }
  0x19   :  { %907 = vmatpush3.bf16.msra.mxu1 %v1005_v23  ;;  %v1054_v4 = vld [vmem:[%s1298_s0 + $0x50] ss:$28 sps:$4 sm:$0xff]  }
  0x1a   :  { %908 = vmatprep.subr.bf16.mxu1 %v1008_v26 }
  0x1b   :  { %881 = vmatpush3.bf16.msra.mxu0 %v1007_v25 }
  0x1c   :  { %882 = vmatprep.subr.bf16.mxu0 %v1010_v28 }
  0x1d   :  { %909 = vmatpush3.bf16.msra.mxu1 %v1009_v27 }
  0x1e   :  { %910 = vmatprep.subr.bf16.mxu1 %v1012_v30 }
  0x1f   :  { %883 = vmatpush3.bf16.msra.mxu0 %v1011_v29 }
  0x20   :  { %924 = vmatprep.subr.bf16.mxu0 %v1017_v34 }
  0x21   :  { %911 = vmatpush3.bf16.msra.mxu1 %v1016_v33 }
  0x22   :  { %591 = vmatmul.mubr.bf16.vlgmr.msra.gmra.mrb[0].mxu0 %v1013_v31  ;;  %962 = vmatprep.subr.bf16.mxu1 %v1023_v39 }
  0x23   :  { %925 = vmatpush3.bf16.msra.mxu0 %v1021_v37  ;;  %598 = vmatprep.mubr.bf16.mxu0 %v1034_v50 }
  0x24   :  { %640 = vmatmul.mubr.bf16.vlgmr.msra.gmra.mrb[0].mxu1 %v1018_v35  ;;  %926 = vmatprep.subr.bf16.mxu0 %v1022_v38 }
  0x25   :  { %963 = vmatpush3.bf16.msra.mxu1 %v1023_v39  ;;  %647 = vmatprep.mubr.bf16.mxu1 %v1040_v55 }
  0x26   :  { %964 = vmatprep.subr.bf16.mxu1 %v1026_v42 }
  0x27   :  { %927 = vmatpush3.bf16.msra.mxu0 %v1024_v40 }
  0x28   :  { %928 = vmatprep.subr.bf16.mxu0 %v1025_v41 }
  0x29   :  { %965 = vmatpush3.bf16.msra.mxu1 %v1026_v42 }
  0x2a   :  { %966 = vmatprep.subr.bf16.mxu1 %v1029_v45  ;;  %599 = vmatmul.mubr.bf16.gmra.mrb[4].mxu0 %v1038_v53 }
  0x2b   :  { %929 = vmatpush3.bf16.msra.mxu0 %v1027_v43  ;;  %688 = vmatprep.mubr.bf16.mxu0 %v1051_v63 }
  0x2c   :  { %930 = vmatprep.subr.bf16.mxu0 %v1028_v44  ;;  %648 = vmatmul.mubr.bf16.gmra.mrb[4].mxu1 %v1042_v56 }
  0x2d   :  { %967 = vmatpush3.bf16.msra.mxu1 %v1029_v45  ;;  %978 = vmatprep.mubr.bf16.mxu1 %v1053_v1 }
  0x2e   :  { %968 = vmatprep.subr.bf16.mxu1 %v1032_v48 }
  0x2f   :  { %931 = vmatpush3.bf16.msra.mxu0 %v1030_v46 }
  0x30   :  { %932 = vmatprep.subr.bf16.mxu0 %v1031_v47 }
  0x31   :  { %969 = vmatpush3.bf16.msra.mxu1 %v1032_v48 }
  0x32   :  { %970 = vmatprep.subr.bf16.mxu1 %v1037_v52 }
  0x33   :  { %933 = vmatpush3.bf16.msra.mxu0 %v1033_v49 }
  0x34   :  { %934 = vmatprep.subr.bf16.mxu0 %v1036_v51 }
  0x35   :  { %971 = vmatpush3.bf16.msra.mxu1 %v1037_v52 }
  0x36   :  { %972 = vmatprep.subr.bf16.mxu1 %v1044_v58 }
  0x37   :  { %935 = vmatpush3.bf16.msra.mxu0 %v1039_v54 }
  0x38   :  { %936 = vmatprep.subr.bf16.mxu0 %v1043_v57 }
  0x39   :  { %973 = vmatpush3.bf16.msra.mxu1 %v1044_v58 }
  0x3a   :  { %974 = vmatprep.subr.bf16.mxu1 %v1047_v61 }
  0x3b   :  { %937 = vmatpush3.bf16.msra.mxu0 %v1045_v59 }
  0x3c   :  { %938 = vmatprep.subr.bf16.mxu0 %v1046_v60 }
  0x3d   :  { %975 = vmatpush3.bf16.msra.mxu1 %v1047_v61 }
  0x3e   :  { %976 = vmatprep.subr.bf16.mxu1 %v1052_v0 }
  0x3f   :  { %939 = vmatpush3.bf16.msra.mxu0 %v1048_v62 }
  0x41   :  { %977 = vmatpush3.bf16.msra.mxu1 %v1052_v0 }
  0x42   :  { %689 = vmatmul.mubr.bf16.vlgmr.msra.gmra.mrb[8].mxu0 %v1049_v2 }
  0x43   :  { %696 = vmatprep.mubr.bf16.mxu0 %v1055_v3 }
  0x44   :  { %979 = vmatmul.mubr.bf16.vlgmr.msra.gmra.mrb[8].mxu1 %v1054_v4 }
  0x4a   :  { %697 = vmatmul.mubr.bf16.gmra.mrb[12].mxu0 %v1057_v5 }
  0xf5   :  { %v884_v6 = vpop.f32.mrb[0].mxu0 }
  0xf6   :  { %v885_v8 = vpop.f32.mrb[1].mxu0 }
  0xf7   :  { %v886_v9 = vadd.f32 %v885_v8, %v884_v6  ;;  %v887_v10 = vpop.f32.mrb[2].mxu0  ;;  %v912_v11 = vpop.f32.mrb[0].mxu1 }
  0xf8   :  { %v888_v12 = vpop.f32.mrb[3].mxu0  ;;  %v913_v15 = vpop.f32.mrb[1].mxu1 }
  0xf9   :  { %v593_v13 = vadd.f32 %v886_v9, %v778_v7  ;;  %v889_v14 = vadd.f32 %v888_v12, %v887_v10  ;;  %v914_v16 = vadd.f32 %v913_v15, %v912_v11  ;;  %v915_v17 = vpop.f32.mrb[2].mxu1 }
  0xfa   :  { %v916_v19 = vpop.f32.mrb[3].mxu1 }
  0xfb   :  { %v596_v18 = vadd.f32 %v889_v14, %v778_v7  ;;  %v642_v20 = vadd.f32 %v914_v16, %v593_v13  ;;  %v917_v21 = vadd.f32 %v916_v19, %v915_v17 }
  0xfd   :  { %v645_v22 = vadd.f32 %v917_v21, %v596_v18  ;;  %v890_v23 = vpop.f32.mrb[4].mxu0 }
  0xfe   :  { %v891_v24 = vpop.f32.mrb[5].mxu0 }
  0xff   :  { %v892_v25 = vadd.f32 %v891_v24, %v890_v23  ;;  %v893_v26 = vpop.f32.mrb[6].mxu0  ;;  %v918_v27 = vpop.f32.mrb[4].mxu1 }
 0x100   :  { %v894_v28 = vpop.f32.mrb[7].mxu0  ;;  %v919_v31 = vpop.f32.mrb[5].mxu1 }
 0x101   :  { %v601_v29 = vadd.f32 %v892_v25, %v778_v7  ;;  %v895_v30 = vadd.f32 %v894_v28, %v893_v26  ;;  %v920_v32 = vadd.f32 %v919_v31, %v918_v27  ;;  %v921_v33 = vpop.f32.mrb[6].mxu1 }
 0x102   :  { %v922_v35 = vpop.f32.mrb[7].mxu1 }
 0x103   :  { %v604_v34 = vadd.f32 %v895_v30, %v778_v7  ;;  %v650_v36 = vadd.f32 %v920_v32, %v601_v29  ;;  %v923_v37 = vadd.f32 %v922_v35, %v921_v33 }
 0x105   :  { %v653_v38 = vadd.f32 %v923_v37, %v604_v34 }
 0x115   :  { %v940_v39 = vpop.f32.mrb[8].mxu0 }
 0x116   :  { %v941_v40 = vpop.f32.mrb[9].mxu0 }
 0x117   :  { %v942_v41 = vadd.f32 %v941_v40, %v940_v39  ;;  %v943_v42 = vpop.f32.mrb[10].mxu0  ;;  %v980_v44 = vpop.f32.mrb[8].mxu1 }
 0x118   :  { %v944_v43 = vpop.f32.mrb[11].mxu0  ;;  %v739_v47 = vpop.f32.mrb[9].mxu1 }
 0x119   :  { %v945_v45 = vadd.f32 %v944_v43, %v943_v42  ;;  %v691_v46 = vadd.f32 %v942_v41, %v642_v20  ;;  %v981_v48 = vpop.f32.mrb[10].mxu1 }
 0x11a   :  { %v742_v51 = vpop.f32.mrb[11].mxu1 }
 0x11b   :  { %v740_v49 = vadd.f32 %v739_v47, %v691_v46  ;;  %v694_v50 = vadd.f32 %v945_v45, %v645_v22 }
 0x11d   :  { %v743_v52 = vadd.f32 %v742_v51, %v694_v50  ;;  %v946_v53 = vpop.f32.mrb[12].mxu0 }
 0x11e   :  { %v947_v54 = vpop.f32.mrb[13].mxu0 }
 0x11f   :  { %v860_v55 = vpack.c.bf16 %v743_v52, %v740_v49  ;;  %v948_v56 = vadd.f32 %v947_v54, %v946_v53  ;;  %v949_v57 = vpop.f32.mrb[14].mxu0 }
 0x120   :  { %v950_v58 = vpop.f32.mrb[15].mxu0 }
 0x121   :  { %861 = vst [vmem:[%s1300_s3] sm:$0xff] %v860_v55   ;;  %v699_v59 = vadd.f32 %v948_v56, %v650_v36  ;;  %v951_v60 = vadd.f32 %v950_v58, %v949_v57 }
 0x123   :  { %v748_v61 = vadd.f32 %v980_v44, %v699_v59  ;;  %v702_v62 = vadd.f32 %v951_v60, %v653_v38 }
 0x125   :  { %v751_v63 = vadd.f32 %v981_v48, %v702_v62 }
 0x127   :  { %v865_v0 = vpack.c.bf16 %v751_v63, %v748_v61 }
 0x129   :  { %867 = vst [vmem:[%s1300_s3 + $0x8] sm:$0xff] %v865_v0  }

// kernel: flownets_forward.23
= control target key start
LH: loop header
LB: loop body
LE: loop exit
PB: predicated region body
PF: predicated region fallthrough
CT: control target
= control target key end

     0   :  { %s304_s1 = inlined_call_operand.vmem [shape: bf16[128,128], index: 1, kind: input, shape index: {}]   ;;  %s305_s0 = inlined_call_operand.vmem [shape: bf16[32,128], index: 0, kind: input, shape index: {}]   ;;  %s306_s2 = inlined_call_operand.vmem [shape: f32[1,128], index: 2, kind: input, shape index: {}]   ;;  %s307_s3 = inlined_call_operand.vmem [shape: bf16[32,128], index: 3, kind: output, shape index: {}]  }
   0x1   :  { %v235_v0 = vld [vmem:[%s304_s1] sm:$0xff]   ;;  %v236_v1 = vld [vmem:[%s304_s1 + $0x8] sm:$0xff]   ;;  %v237_v2 = vld [vmem:[%s304_s1 + $0x10] sm:$0xff]  }
   0x2   :  { %215 = vmatprep.subr.bf16.mxu0 %v235_v0  ;;  %v238_v3 = vld [vmem:[%s304_s1 + $0x18] sm:$0xff]   ;;  %v243_v4 = vld [vmem:[%s305_s0] sm:$0xff]   ;;  %v240_v6 = vld [vmem:[%s304_s1 + $0x28] sm:$0xff]  }
   0x3   :  { %216 = vmatpush3.bf16.msra.mxu0 %v235_v0  ;;  %231 = vmatprep.mubr.bf16.mxu0 %v243_v4  ;;  %v239_v5 = vld [vmem:[%s304_s1 + $0x20] sm:$0xff]   ;;  %v241_v7 = vld [vmem:[%s304_s1 + $0x30] sm:$0xff]   ;;  %v242_v8 = vld [vmem:[%s304_s1 + $0x38] sm:$0xff]  }
   0x4   :  { %217 = vmatprep.subr.bf16.mxu0 %v236_v1  ;;  %v244_v9 = vld [vmem:[%s305_s0 + $0x8] sm:$0xff]   ;;  %v175_v11 = vld [vmem:[%s306_s2] ss:$0 sm:$0xff] }
   0x7   :  { %218 = vmatpush3.bf16.msra.mxu0 %v236_v1 }
   0x8   :  { %219 = vmatprep.subr.bf16.mxu0 %v237_v2 }
   0xb   :  { %220 = vmatpush3.bf16.msra.mxu0 %v237_v2 }
   0xc   :  { %221 = vmatprep.subr.bf16.mxu0 %v238_v3 }
   0xf   :  { %222 = vmatpush3.bf16.msra.mxu0 %v238_v3 }
  0x10   :  { %223 = vmatprep.subr.bf16.mxu0 %v239_v5 }
  0x13   :  { %224 = vmatpush3.bf16.msra.mxu0 %v239_v5 }
  0x14   :  { %225 = vmatprep.subr.bf16.mxu0 %v240_v6 }
  0x17   :  { %226 = vmatpush3.bf16.msra.mxu0 %v240_v6 }
  0x18   :  { %227 = vmatprep.subr.bf16.mxu0 %v241_v7 }
  0x1b   :  { %228 = vmatpush3.bf16.msra.mxu0 %v241_v7 }
  0x1c   :  { %229 = vmatprep.subr.bf16.mxu0 %v242_v8 }
  0x1f   :  { %230 = vmatpush3.bf16.msra.mxu0 %v242_v8 }
  0x22   :  { %232 = vmatmul.mubr.bf16.vlgmr.msra.gmra.mrb[0].mxu0 %v244_v9 }
  0xf5   :  { %v233_v10 = vpop.f32.mrb[0].mxu0 }
  0xf6   :  { %v136_v12 = vpop.f32.mrb[1].mxu0  ;;  %v145_v14 = vadd.f32 %v233_v10, %v175_v11 }
  0xf7   :  { %v234_v13 = vpop.f32.mrb[2].mxu0  ;;  %v137_v17 = vadd.f32 %v175_v11, %v136_v12 }
  0xf8   :  { %v148_v15 = vadd.f32 %v234_v13, %v175_v11  ;;  %v139_v16 = vpop.f32.mrb[3].mxu0 }
  0xf9   :  { %v140_v18 = vadd.f32 %v175_v11, %v139_v16 }
  0xfa   :  { %v202_v19 = vpack.c.bf16 %v148_v15, %v145_v14 }
  0xfb   :  { %v197_v20 = vpack.c.bf16 %v140_v18, %v137_v17 }
  0xfc   :  { %204 = vst [vmem:[%s307_s3 + $0x8] sm:$0xff] %v202_v19  }
  0xfd   :  { %198 = vst [vmem:[%s307_s3] sm:$0xff] %v197_v20  }

// kernel: flownets_forward.25
= control target key start
LH: loop header
LB: loop body
LE: loop exit
PB: predicated region body
PF: predicated region fallthrough
CT: control target
= control target key end

     0   :  { %s1238_s1 = inlined_call_operand.vmem [shape: bf16[512,128], index: 1, kind: input, shape index: {}]   ;;  %s1239_s0 = inlined_call_operand.vmem [shape: bf16[128,512], index: 0, kind: input, shape index: {}]   ;;  %s1240_s2 = inlined_call_operand.vmem [shape: f32[1,128], index: 2, kind: input, shape index: {}]   ;;  %s1241_s3 = inlined_call_operand.vmem [shape: f32[128,128], index: 3, kind: output, shape index: {}]  }
   0x1   :  { %v877_v0 = vld [vmem:[%s1238_s1 + $0x40] sm:$0xff]   ;;  %v881_v4 = vld [vmem:[%s1238_s1 + $0x48] sm:$0xff]   ;;  %v885_v8 = vld [vmem:[%s1238_s1 + $0x50] sm:$0xff]  }
   0x2   :  { %v878_v1 = vld [vmem:[%s1238_s1 + $0xc0] sm:$0xff]   ;;  %749 = vmatprep.subr.bf16.mxu0 %v877_v0  ;;  %v882_v5 = vld [vmem:[%s1238_s1 + $0xc8] sm:$0xff]   ;;  %v886_v9 = vld [vmem:[%s1238_s1 + $0xd0] sm:$0xff]  }
   0x3   :  { %v879_v2 = vld [vmem:[%s1238_s1] sm:$0xff]   ;;  %813 = vmatprep.subr.bf16.mxu1 %v878_v1  ;;  %v883_v6 = vld [vmem:[%s1238_s1 + $0x8] sm:$0xff]   ;;  %v887_v10 = vld [vmem:[%s1238_s1 + $0x10] sm:$0xff]  }
   0x4   :  { %v880_v3 = vld [vmem:[%s1238_s1 + $0x80] sm:$0xff]   ;;  %750 = vmatpush3.bf16.msra.mxu0 %v879_v2  ;;  %v884_v7 = vld [vmem:[%s1238_s1 + $0x88] sm:$0xff]   ;;  %v888_v11 = vld [vmem:[%s1238_s1 + $0x90] sm:$0xff]  }
   0x5   :  { %814 = vmatpush3.bf16.msra.mxu1 %v880_v3  ;;  %751 = vmatprep.subr.bf16.mxu0 %v881_v4  ;;  %v889_v12 = vld [vmem:[%s1238_s1 + $0x58] sm:$0xff]   ;;  %v893_v16 = vld [vmem:[%s1238_s1 + $0x60] sm:$0xff]   ;;  %v897_v20 = vld [vmem:[%s1238_s1 + $0x68] sm:$0xff]  }
   0x6   :  { %815 = vmatprep.subr.bf16.mxu1 %v882_v5  ;;  %v890_v13 = vld [vmem:[%s1238_s1 + $0xd8] sm:$0xff]   ;;  %v894_v17 = vld [vmem:[%s1238_s1 + $0xe0] sm:$0xff]   ;;  %v898_v21 = vld [vmem:[%s1238_s1 + $0xe8] sm:$0xff]  }
   0x7   :  { %v891_v14 = vld [vmem:[%s1238_s1 + $0x18] sm:$0xff]   ;;  %v895_v18 = vld [vmem:[%s1238_s1 + $0x20] sm:$0xff]   ;;  %v899_v22 = vld [vmem:[%s1238_s1 + $0x28] sm:$0xff]  }
   0x8   :  { %752 = vmatpush3.bf16.msra.mxu0 %v883_v6  ;;  %v892_v15 = vld [vmem:[%s1238_s1 + $0x98] sm:$0xff]   ;;  %v896_v19 = vld [vmem:[%s1238_s1 + $0xa0] sm:$0xff]   ;;  %v900_v23 = vld [vmem:[%s1238_s1 + $0xa8] sm:$0xff]  }
   0x9   :  { %816 = vmatpush3.bf16.msra.mxu1 %v884_v7  ;;  %753 = vmatprep.subr.bf16.mxu0 %v885_v8  ;;  %v901_v24 = vld [vmem:[%s1238_s1 + $0x70] sm:$0xff]   ;;  %v905_v28 = vld [vmem:[%s1238_s1 + $0x78] sm:$0xff]   ;;  %v1172_v2 = vld [vmem:[%s1240_s2] ss:$0 sm:$0xff] }
   0xa   :  { %817 = vmatprep.subr.bf16.mxu1 %v886_v9  ;;  %v902_v25 = vld [vmem:[%s1238_s1 + $0xf0] sm:$0xff]   ;;  %v906_v29 = vld [vmem:[%s1238_s1 + $0xf8] sm:$0xff]  }
   0xb   :  { %v903_v26 = vld [vmem:[%s1238_s1 + $0x30] sm:$0xff]   ;;  %v907_v30 = vld [vmem:[%s1238_s1 + $0x38] sm:$0xff]  }
   0xc   :  { %754 = vmatpush3.bf16.msra.mxu0 %v887_v10  ;;  %v904_v27 = vld [vmem:[%s1238_s1 + $0xb0] sm:$0xff]   ;;  %v908_v31 = vld [vmem:[%s1238_s1 + $0xb8] sm:$0xff]  }
   0xd   :  { %818 = vmatpush3.bf16.msra.mxu1 %v888_v11  ;;  %755 = vmatprep.subr.bf16.mxu0 %v889_v12  ;;  %v909_v32 = vld [vmem:[%s1239_s0] ss:$16 sps:$4 sm:$0xff]   ;;  %v911_v33 = vld [vmem:[%s1239_s0 + $0x4] ss:$16 sps:$4 sm:$0xff]   ;;  %v912_v34 = vld [vmem:[%s1239_s0 + $0x8] ss:$16 sps:$4 sm:$0xff]  }
   0xe   :  { %819 = vmatprep.subr.bf16.mxu1 %v890_v13  ;;  %v914_v35 = vld [vmem:[%s1239_s0 + $0xc] ss:$16 sps:$4 sm:$0xff]   ;;  %502 = vmatprep.mubr.bf16.mxu0 %v911_v33  ;;  %v915_v36 = vld [vmem:[%s1239_s0 + $0x24] ss:$16 sps:$4 sm:$0xff]   ;;  %v919_v38 = vld [vmem:[%s1239_s0 + $0x20] ss:$16 sps:$4 sm:$0xff]  }
   0xf   :  { %599 = vmatprep.mubr.bf16.mxu1 %v914_v35  ;;  %v917_v37 = vld [vmem:[%s1239_s0 + $0x2c] ss:$16 sps:$4 sm:$0xff]   ;;  %v920_v39 = vld [vmem:[%s1239_s0 + $0x28] ss:$16 sps:$4 sm:$0xff]   ;;  %v921_v40 = vld [vmem:[%s1239_s0 + $0x44] ss:$16 sps:$4 sm:$0xff]  }
  0x10   :  { %756 = vmatpush3.bf16.msra.mxu0 %v891_v14  ;;  %v923_v41 = vld [vmem:[%s1239_s0 + $0x4c] ss:$16 sps:$4 sm:$0xff]   ;;  %v925_v42 = vld [vmem:[%s1239_s0 + $0x40] ss:$16 sps:$4 sm:$0xff]   ;;  %v926_v43 = vld [vmem:[%s1239_s0 + $0x48] ss:$16 sps:$4 sm:$0xff]  }
  0x11   :  { %820 = vmatpush3.bf16.msra.mxu1 %v892_v15  ;;  %757 = vmatprep.subr.bf16.mxu0 %v893_v16  ;;  %v927_v44 = vld [vmem:[%s1239_s0 + $0x64] ss:$16 sps:$4 sm:$0xff]   ;;  %v929_v45 = vld [vmem:[%s1239_s0 + $0x6c] ss:$16 sps:$4 sm:$0xff]   ;;  %v931_v46 = vld [vmem:[%s1239_s0 + $0x60] ss:$16 sps:$4 sm:$0xff]  }
  0x12   :  { %821 = vmatprep.subr.bf16.mxu1 %v894_v17  ;;  %v932_v47 = vld [vmem:[%s1239_s0 + $0x68] ss:$16 sps:$4 sm:$0xff]   ;;  %v933_v48 = vld [vmem:[%s1239_s0 + $0x84] ss:$16 sps:$4 sm:$0xff]   ;;  %v935_v49 = vld [vmem:[%s1239_s0 + $0x8c] ss:$16 sps:$4 sm:$0xff]  }
  0x13   :  { %v937_v50 = vld [vmem:[%s1239_s0 + $0x80] ss:$16 sps:$4 sm:$0xff]   ;;  %v938_v51 = vld [vmem:[%s1239_s0 + $0x88] ss:$16 sps:$4 sm:$0xff]   ;;  %v939_v52 = vld [vmem:[%s1239_s0 + $0xa4] ss:$16 sps:$4 sm:$0xff]  }
  0x14   :  { %758 = vmatpush3.bf16.msra.mxu0 %v895_v18  ;;  %v941_v53 = vld [vmem:[%s1239_s0 + $0xac] ss:$16 sps:$4 sm:$0xff]   ;;  %v943_v54 = vld [vmem:[%s1239_s0 + $0xa0] ss:$16 sps:$4 sm:$0xff]   ;;  %v944_v55 = vld [vmem:[%s1239_s0 + $0xa8] ss:$16 sps:$4 sm:$0xff]  }
  0x15   :  { %822 = vmatpush3.bf16.msra.mxu1 %v896_v19  ;;  %759 = vmatprep.subr.bf16.mxu0 %v897_v20  ;;  %v945_v56 = vld [vmem:[%s1239_s0 + $0xc4] ss:$16 sps:$4 sm:$0xff]   ;;  %v947_v57 = vld [vmem:[%s1239_s0 + $0xcc] ss:$16 sps:$4 sm:$0xff]   ;;  %v949_v58 = vld [vmem:[%s1239_s0 + $0xc0] ss:$16 sps:$4 sm:$0xff]  }
  0x16   :  { %823 = vmatprep.subr.bf16.mxu1 %v898_v21  ;;  %v950_v59 = vld [vmem:[%s1239_s0 + $0xc8] ss:$16 sps:$4 sm:$0xff]   ;;  %v951_v60 = vld [vmem:[%s1239_s0 + $0xe4] ss:$16 sps:$4 sm:$0xff]   ;;  %v953_v61 = vld [vmem:[%s1239_s0 + $0xec] ss:$16 sps:$4 sm:$0xff]  }
  0x17   :  { %v955_v62 = vld [vmem:[%s1239_s0 + $0xe0] ss:$16 sps:$4 sm:$0xff]   ;;  %v956_v63 = vld [vmem:[%s1239_s0 + $0xe8] ss:$16 sps:$4 sm:$0xff]  }
  0x18   :  { %760 = vmatpush3.bf16.msra.mxu0 %v899_v22 }
  0x19   :  { %824 = vmatpush3.bf16.msra.mxu1 %v900_v23  ;;  %761 = vmatprep.subr.bf16.mxu0 %v901_v24 }
  0x1a   :  { %825 = vmatprep.subr.bf16.mxu1 %v902_v25 }
  0x1c   :  { %762 = vmatpush3.bf16.msra.mxu0 %v903_v26 }
  0x1d   :  { %826 = vmatpush3.bf16.msra.mxu1 %v904_v27  ;;  %763 = vmatprep.subr.bf16.mxu0 %v905_v28 }
  0x1e   :  { %827 = vmatprep.subr.bf16.mxu1 %v906_v29 }
  0x20   :  { %764 = vmatpush3.bf16.msra.mxu0 %v907_v30 }
  0x21   :  { %828 = vmatpush3.bf16.msra.mxu1 %v908_v31 }
  0x23   :  { %503 = vmatmul.mubr.bf16.vlgmr.msra.gmra.mrb[0].mxu0 %v909_v32 }
  0x24   :  { %600 = vmatmul.mubr.bf16.vlgmr.msra.gmra.mrb[0].mxu1 %v912_v34  ;;  %510 = vmatprep.mubr.bf16.mxu0 %v915_v36 }
  0x25   :  { %607 = vmatprep.mubr.bf16.mxu1 %v917_v37 }
  0x2b   :  { %511 = vmatmul.mubr.bf16.gmra.mrb[4].mxu0 %v919_v38 }
  0x2c   :  { %608 = vmatmul.mubr.bf16.gmra.mrb[4].mxu1 %v920_v39  ;;  %518 = vmatprep.mubr.bf16.mxu0 %v921_v40 }
  0x2d   :  { %615 = vmatprep.mubr.bf16.mxu1 %v923_v41 }
  0x33   :  { %519 = vmatmul.mubr.bf16.gmra.mrb[8].mxu0 %v925_v42 }
  0x34   :  { %616 = vmatmul.mubr.bf16.gmra.mrb[8].mxu1 %v926_v43  ;;  %526 = vmatprep.mubr.bf16.mxu0 %v927_v44 }
  0x35   :  { %623 = vmatprep.mubr.bf16.mxu1 %v929_v45 }
  0x3b   :  { %527 = vmatmul.mubr.bf16.gmra.mrb[12].mxu0 %v931_v46 }
  0x3c   :  { %624 = vmatmul.mubr.bf16.gmra.mrb[12].mxu1 %v932_v47  ;;  %534 = vmatprep.mubr.bf16.mxu0 %v933_v48 }
  0x3d   :  { %631 = vmatprep.mubr.bf16.mxu1 %v935_v49 }
  0x43   :  { %535 = vmatmul.mubr.bf16.gmra.mrb[16].mxu0 %v937_v50 }
  0x44   :  { %632 = vmatmul.mubr.bf16.gmra.mrb[16].mxu1 %v938_v51  ;;  %542 = vmatprep.mubr.bf16.mxu0 %v939_v52 }
  0x45   :  { %639 = vmatprep.mubr.bf16.mxu1 %v941_v53 }
  0x4b   :  { %543 = vmatmul.mubr.bf16.gmra.mrb[20].mxu0 %v943_v54 }
  0x4c   :  { %640 = vmatmul.mubr.bf16.gmra.mrb[20].mxu1 %v944_v55  ;;  %550 = vmatprep.mubr.bf16.mxu0 %v945_v56 }
  0x4d   :  { %647 = vmatprep.mubr.bf16.mxu1 %v947_v57 }
  0x53   :  { %551 = vmatmul.mubr.bf16.gmra.mrb[24].mxu0 %v949_v58 }
  0x54   :  { %648 = vmatmul.mubr.bf16.gmra.mrb[24].mxu1 %v950_v59  ;;  %558 = vmatprep.mubr.bf16.mxu0 %v951_v60 }
  0x55   :  { %655 = vmatprep.mubr.bf16.mxu1 %v953_v61 }
  0x5b   :  { %559 = vmatmul.mubr.bf16.gmra.mrb[28].mxu0 %v955_v62 }
  0x5c   :  { %656 = vmatmul.mubr.bf16.gmra.mrb[28].mxu1 %v956_v63 }
  0xf6   :  { %v765_v0 = vpop.f32.mrb[0].mxu0 }
  0xf7   :  { %v829_v1 = vpop.f32.mrb[0].mxu1  ;;  %v766_v3 = vpop.f32.mrb[1].mxu0 }
  0xf8   :  { %v767_v4 = vadd.f32 %v766_v3, %v765_v0  ;;  %v830_v5 = vpop.f32.mrb[1].mxu1  ;;  %v768_v6 = vpop.f32.mrb[2].mxu0 }
  0xf9   :  { %v831_v7 = vadd.f32 %v830_v5, %v829_v1  ;;  %v832_v8 = vpop.f32.mrb[2].mxu1  ;;  %v769_v9 = vpop.f32.mrb[3].mxu0 }
  0xfa   :  { %v505_v10 = vadd.f32 %v767_v4, %v1172_v2  ;;  %v770_v11 = vadd.f32 %v769_v9, %v768_v6  ;;  %v833_v12 = vpop.f32.mrb[3].mxu1 }
  0xfb   :  { %v834_v13 = vadd.f32 %v833_v12, %v832_v8 }
  0xfc   :  { %v602_v14 = vadd.f32 %v831_v7, %v505_v10  ;;  %v508_v15 = vadd.f32 %v770_v11, %v1172_v2 }
  0xfe   :  { %664 = vst [vmem:[%s1241_s3] sm:$0xff] %v602_v14  ;;  %v605_v16 = vadd.f32 %v834_v13, %v508_v15  ;;  %v771_v17 = vpop.f32.mrb[4].mxu0 }
  0xff   :  { %v835_v18 = vpop.f32.mrb[4].mxu1  ;;  %v772_v19 = vpop.f32.mrb[5].mxu0 }
 0x100   :  { %665 = vst [vmem:[%s1241_s3 + $0x8] sm:$0xff] %v605_v16  ;;  %v773_v20 = vadd.f32 %v772_v19, %v771_v17  ;;  %v836_v21 = vpop.f32.mrb[5].mxu1  ;;  %v774_v22 = vpop.f32.mrb[6].mxu0 }
 0x101   :  { %v837_v23 = vadd.f32 %v836_v21, %v835_v18  ;;  %v838_v24 = vpop.f32.mrb[6].mxu1  ;;  %v775_v25 = vpop.f32.mrb[7].mxu0 }
 0x102   :  { %v513_v26 = vadd.f32 %v773_v20, %v1172_v2  ;;  %v776_v27 = vadd.f32 %v775_v25, %v774_v22  ;;  %v839_v28 = vpop.f32.mrb[7].mxu1 }
 0x103   :  { %v840_v29 = vadd.f32 %v839_v28, %v838_v24 }
 0x104   :  { %v610_v30 = vadd.f32 %v837_v23, %v513_v26  ;;  %v516_v31 = vadd.f32 %v776_v27, %v1172_v2 }
 0x106   :  { %666 = vst [vmem:[%s1241_s3 + $0x10] sm:$0xff] %v610_v30  ;;  %v613_v32 = vadd.f32 %v840_v29, %v516_v31  ;;  %v777_v33 = vpop.f32.mrb[8].mxu0 }
 0x107   :  { %v841_v34 = vpop.f32.mrb[8].mxu1  ;;  %v778_v35 = vpop.f32.mrb[9].mxu0 }
 0x108   :  { %667 = vst [vmem:[%s1241_s3 + $0x18] sm:$0xff] %v613_v32  ;;  %v779_v36 = vadd.f32 %v778_v35, %v777_v33  ;;  %v842_v37 = vpop.f32.mrb[9].mxu1  ;;  %v780_v38 = vpop.f32.mrb[10].mxu0 }
 0x109   :  { %v843_v39 = vadd.f32 %v842_v37, %v841_v34  ;;  %v844_v40 = vpop.f32.mrb[10].mxu1  ;;  %v781_v41 = vpop.f32.mrb[11].mxu0 }
 0x10a   :  { %v521_v42 = vadd.f32 %v779_v36, %v1172_v2  ;;  %v782_v43 = vadd.f32 %v781_v41, %v780_v38  ;;  %v845_v44 = vpop.f32.mrb[11].mxu1 }
 0x10b   :  { %v846_v45 = vadd.f32 %v845_v44, %v844_v40 }
 0x10c   :  { %v618_v46 = vadd.f32 %v843_v39, %v521_v42  ;;  %v524_v47 = vadd.f32 %v782_v43, %v1172_v2 }
 0x10e   :  { %668 = vst [vmem:[%s1241_s3 + $0x20] sm:$0xff] %v618_v46  ;;  %v621_v48 = vadd.f32 %v846_v45, %v524_v47  ;;  %v783_v49 = vpop.f32.mrb[12].mxu0 }
 0x10f   :  { %v847_v50 = vpop.f32.mrb[12].mxu1  ;;  %v784_v51 = vpop.f32.mrb[13].mxu0 }
 0x110   :  { %669 = vst [vmem:[%s1241_s3 + $0x28] sm:$0xff] %v621_v48  ;;  %v785_v52 = vadd.f32 %v784_v51, %v783_v49  ;;  %v848_v53 = vpop.f32.mrb[13].mxu1  ;;  %v786_v54 = vpop.f32.mrb[14].mxu0 }
 0x111   :  { %v849_v55 = vadd.f32 %v848_v53, %v847_v50  ;;  %v850_v56 = vpop.f32.mrb[14].mxu1  ;;  %v787_v57 = vpop.f32.mrb[15].mxu0 }
 0x112   :  { %v529_v58 = vadd.f32 %v785_v52, %v1172_v2  ;;  %v788_v59 = vadd.f32 %v787_v57, %v786_v54  ;;  %v851_v60 = vpop.f32.mrb[15].mxu1 }
 0x113   :  { %v852_v61 = vadd.f32 %v851_v60, %v850_v56 }
 0x114   :  { %v626_v62 = vadd.f32 %v849_v55, %v529_v58  ;;  %v532_v63 = vadd.f32 %v788_v59, %v1172_v2 }
 0x116   :  { %670 = vst [vmem:[%s1241_s3 + $0x30] sm:$0xff] %v626_v62  ;;  %v629_v0 = vadd.f32 %v852_v61, %v532_v63  ;;  %v789_v1 = vpop.f32.mrb[16].mxu0 }
 0x117   :  { %v853_v3 = vpop.f32.mrb[16].mxu1  ;;  %v790_v4 = vpop.f32.mrb[17].mxu0 }
 0x118   :  { %671 = vst [vmem:[%s1241_s3 + $0x38] sm:$0xff] %v629_v0  ;;  %v791_v5 = vadd.f32 %v790_v4, %v789_v1  ;;  %v854_v6 = vpop.f32.mrb[17].mxu1  ;;  %v792_v7 = vpop.f32.mrb[18].mxu0 }
 0x119   :  { %v855_v8 = vadd.f32 %v854_v6, %v853_v3  ;;  %v856_v9 = vpop.f32.mrb[18].mxu1  ;;  %v793_v10 = vpop.f32.mrb[19].mxu0 }
 0x11a   :  { %v537_v11 = vadd.f32 %v791_v5, %v1172_v2  ;;  %v794_v12 = vadd.f32 %v793_v10, %v792_v7  ;;  %v857_v13 = vpop.f32.mrb[19].mxu1 }
 0x11b   :  { %v858_v14 = vadd.f32 %v857_v13, %v856_v9 }
 0x11c   :  { %v634_v15 = vadd.f32 %v855_v8, %v537_v11  ;;  %v540_v16 = vadd.f32 %v794_v12, %v1172_v2 }
 0x11e   :  { %672 = vst [vmem:[%s1241_s3 + $0x40] sm:$0xff] %v634_v15  ;;  %v637_v17 = vadd.f32 %v858_v14, %v540_v16  ;;  %v795_v18 = vpop.f32.mrb[20].mxu0 }
 0x11f   :  { %v859_v19 = vpop.f32.mrb[20].mxu1  ;;  %v796_v20 = vpop.f32.mrb[21].mxu0 }
 0x120   :  { %673 = vst [vmem:[%s1241_s3 + $0x48] sm:$0xff] %v637_v17  ;;  %v797_v21 = vadd.f32 %v796_v20, %v795_v18  ;;  %v860_v22 = vpop.f32.mrb[21].mxu1  ;;  %v798_v23 = vpop.f32.mrb[22].mxu0 }
 0x121   :  { %v861_v24 = vadd.f32 %v860_v22, %v859_v19  ;;  %v862_v25 = vpop.f32.mrb[22].mxu1  ;;  %v799_v26 = vpop.f32.mrb[23].mxu0 }
 0x122   :  { %v545_v27 = vadd.f32 %v797_v21, %v1172_v2  ;;  %v800_v28 = vadd.f32 %v799_v26, %v798_v23  ;;  %v863_v29 = vpop.f32.mrb[23].mxu1 }
 0x123   :  { %v864_v30 = vadd.f32 %v863_v29, %v862_v25 }
 0x124   :  { %v642_v31 = vadd.f32 %v861_v24, %v545_v27  ;;  %v548_v32 = vadd.f32 %v800_v28, %v1172_v2 }
 0x126   :  { %674 = vst [vmem:[%s1241_s3 + $0x50] sm:$0xff] %v642_v31  ;;  %v645_v33 = vadd.f32 %v864_v30, %v548_v32  ;;  %v801_v34 = vpop.f32.mrb[24].mxu0 }
 0x127   :  { %v865_v35 = vpop.f32.mrb[24].mxu1  ;;  %v802_v36 = vpop.f32.mrb[25].mxu0 }
 0x128   :  { %675 = vst [vmem:[%s1241_s3 + $0x58] sm:$0xff] %v645_v33  ;;  %v803_v37 = vadd.f32 %v802_v36, %v801_v34  ;;  %v866_v38 = vpop.f32.mrb[25].mxu1  ;;  %v804_v39 = vpop.f32.mrb[26].mxu0 }
 0x129   :  { %v867_v40 = vadd.f32 %v866_v38, %v865_v35  ;;  %v868_v41 = vpop.f32.mrb[26].mxu1  ;;  %v805_v42 = vpop.f32.mrb[27].mxu0 }
 0x12a   :  { %v553_v43 = vadd.f32 %v803_v37, %v1172_v2  ;;  %v806_v44 = vadd.f32 %v805_v42, %v804_v39  ;;  %v869_v45 = vpop.f32.mrb[27].mxu1 }
 0x12b   :  { %v870_v46 = vadd.f32 %v869_v45, %v868_v41 }
 0x12c   :  { %v650_v47 = vadd.f32 %v867_v40, %v553_v43  ;;  %v556_v48 = vadd.f32 %v806_v44, %v1172_v2 }
 0x12e   :  { %676 = vst [vmem:[%s1241_s3 + $0x60] sm:$0xff] %v650_v47  ;;  %v653_v49 = vadd.f32 %v870_v46, %v556_v48  ;;  %v807_v50 = vpop.f32.mrb[28].mxu0 }
 0x12f   :  { %v871_v51 = vpop.f32.mrb[28].mxu1  ;;  %v808_v52 = vpop.f32.mrb[29].mxu0 }
 0x130   :  { %677 = vst [vmem:[%s1241_s3 + $0x68] sm:$0xff] %v653_v49  ;;  %v809_v53 = vadd.f32 %v808_v52, %v807_v50  ;;  %v872_v54 = vpop.f32.mrb[29].mxu1  ;;  %v810_v55 = vpop.f32.mrb[30].mxu0 }
 0x131   :  { %v873_v56 = vadd.f32 %v872_v54, %v871_v51  ;;  %v874_v57 = vpop.f32.mrb[30].mxu1  ;;  %v811_v58 = vpop.f32.mrb[31].mxu0 }
 0x132   :  { %v561_v59 = vadd.f32 %v809_v53, %v1172_v2  ;;  %v812_v60 = vadd.f32 %v811_v58, %v810_v55  ;;  %v875_v61 = vpop.f32.mrb[31].mxu1 }
 0x133   :  { %v876_v62 = vadd.f32 %v875_v61, %v874_v57 }
 0x134   :  { %v658_v63 = vadd.f32 %v873_v56, %v561_v59  ;;  %v564_v0 = vadd.f32 %v812_v60, %v1172_v2 }
 0x136   :  { %678 = vst [vmem:[%s1241_s3 + $0x70] sm:$0xff] %v658_v63  ;;  %v661_v1 = vadd.f32 %v876_v62, %v564_v0 }
 0x138   :  { %679 = vst [vmem:[%s1241_s3 + $0x78] sm:$0xff] %v661_v1 }

</bundles_post_ra>
